<compile_context>
chip_gen: v6e
topology: v6e:2x2x1
jax: 0.10.0
libtpu: 0.0.40
codegen_flags: <defaults>
</compile_context>

<pallas_src>
import numpy as np
import jax
import jax.numpy as jnp
from jax.experimental import pallas as pl
from jax.experimental.pallas import tpu as pltpu

L2_EPS = 1e-12     # F.normalize eps
GEM_EPS = 1e-6     # GeM clamp eps
GEM_P = 3.0        # GeM p (nn.Parameter init value)
VMEM_LIMIT = 32 * 1024 * 1024   # safe scoped-VMEM budget on v5e/v6e/v7x


def _round_up(n, m):
    return ((n + m - 1) // m) * m


def _pick_batch_block(n, cap=8):
    """Largest Bblk <= cap dividing N that keeps >= 2 grid steps (v7x dual-TC).

    Bblk*Cout >= 256 (Cout=32, Bblk=8) fills the v6e/v7x MXU; cap also bounds
    the per-step VMEM tile."""
    for b in range(min(cap, n), 0, -1):
        if n % b == 0 and n // b >= 2:
            return b
    return n   # n == 1


# ------------------------- in-kernel building blocks ----------------------- #

def _l2_normalize(x, axis):
    """x / max(||x||, eps) via rsqrt (EUP) — identical to F.normalize."""
    ssq = jnp.sum(x * x, axis=axis, keepdims=True)
    return x * jax.lax.rsqrt(jnp.maximum(ssq, L2_EPS * L2_EPS))


def _backbone(x, w, b):
    """Synthetic backbone: 1x1 conv + ReLU, unrolled on the VPU (K=Cin tiny).
    x: (Bblk, Cin, HW), w: (Cout, Cin), b: (Cout, 1) -> (Bblk, Cout, HW) f32."""
    cin = x.shape[1]
    acc = b[None, :, :] + w[None, :, 0:1] * x[:, 0:1, :]   # bias in the init
    for c in range(1, cin):                                # static unroll
        acc = acc + w[None, :, c:c + 1] * x[:, c:c + 1, :]
    return jnp.maximum(acc, 0.0)


def _local_head(feat, q):
    """AdaptiveAvgPool2d((15,15)) as ONE batched MXU matmul with the
    lane-padded averaging matrix Q (f32, f32 accumulation), then L2Norm over
    channels.  feat: (Bblk, Cout, HW) f32, q: (HW, PPp) f32 -> (Bblk, Cout, PPp)."""
    bblk, cout, hw = feat.shape
    feat2d = feat.reshape(bblk * cout, hw)                 # M = Bblk*Cout
    pooled = jnp.dot(feat2d, q, preferred_element_type=jnp.float32)
    pooled = pooled.reshape(bblk, cout, q.shape[1])
    return _l2_normalize(pooled, axis=1)                   # per-location L2


def _global_head(feat, wfc, bfc):
    """L2Norm(dim=1) -> GeM(p=3) -> Flatten -> Linear -> L2Norm.
    feat: (Bblk, Cout, HW), wfc: (Cout, Dp), bfc: (1, Dp) -> (Bblk, Dp)."""
    xn = _l2_normalize(feat, axis=1)                       # per-location L2
    xc = jnp.maximum(xn, GEM_EPS)                          # GeM clamp
    g = jnp.mean(xc * xc * xc, axis=2)                     # (Bblk, Cout)
    g = jnp.exp(jnp.log(g) * (1.0 / GEM_P))                # cube root (EUP)
    v = jnp.dot(g, wfc, preferred_element_type=jnp.float32) + bfc   # (Bblk, Dp)
    return _l2_normalize(v, axis=1)


# ----------------------------- fused kernels ------------------------------- #

def local_fused_kernel(x_ref, w_ref, b_ref, q_ref, o_ref):
    feat = _backbone(x_ref[...], w_ref[...], b_ref[...])
    o_ref[...] = _local_head(feat, q_ref[...])


def global_fused_kernel(x_ref, w_ref, b_ref, wfc_ref, bfc_ref, o_ref):
    feat = _backbone(x_ref[...], w_ref[...], b_ref[...])
    o_ref[...] = _global_head(feat, wfc_ref[...], bfc_ref[...])


def both_fused_kernel(x_ref, w_ref, b_ref, q_ref, wfc_ref, bfc_ref,
                      lo_ref, go_ref):
    feat = _backbone(x_ref[...], w_ref[...], b_ref[...])
    lo_ref[...] = _local_head(feat, q_ref[...])
    go_ref[...] = _global_head(feat, wfc_ref[...], bfc_ref[...])


# ------------------------------- wrappers ----------------------------------- #

def _in_specs_common(bblk, cin, hw, cout):
    return [
        pl.BlockSpec((bblk, cin, hw), lambda n: (n, 0, 0)),   # x (batch block)
        pl.BlockSpec((cout, cin), lambda n: (0, 0)),          # backbone weight
        pl.BlockSpec((cout, 1), lambda n: (0, 0)),            # backbone bias
    ]


def _cost_estimate(n, cin, hw, cout, ppp=None, dp=None):
    """Advisory cost so XLA doesn't treat the fused call as zero-cost."""
    flops = 2 * n * cout * cin * hw                        # backbone 1x1 conv
    trans = 0
    bytes_acc = (n * cin * hw + cout * cin + cout) * 4
    if ppp is not None:                                    # local head
        flops += 2 * n * cout * hw * ppp                   # pooling matmul
        trans += n * ppp                                   # rsqrt per column
        bytes_acc += (hw * ppp + n * cout * ppp) * 4
    if dp is not None:                                     # global head
        flops += 4 * n * cout * hw + 2 * n * cout * dp
        trans += n * hw + 2 * n * cout + n
        bytes_acc += (cout * dp + dp + n * dp) * 4
    return pl.CostEstimate(flops=flops, transcendentals=trans,
                           bytes_accessed=bytes_acc)


def _compiler_params():
    return pltpu.CompilerParams(dimension_semantics=("parallel",),
                                vmem_limit_bytes=VMEM_LIMIT)


def run_local(x, params):
    N, Cin, H, W = x.shape
    HW = H * W
    x3 = x.reshape(N, Cin, HW)
    w_bb, b_bb, q = params["w_bb"], params["b_bb"], params["q_pool_padded"]
    Cout, PPp, pool = w_bb.shape[0], q.shape[1], params["pool_out"]
    Bblk = _pick_batch_block(N)
    y = pl.pallas_call(
        local_fused_kernel,
        out_shape=jax.ShapeDtypeStruct((N, Cout, PPp), jnp.float32),
        grid=(N // Bblk,),
        in_specs=_in_specs_common(Bblk, Cin, HW, Cout) + [
            pl.BlockSpec((HW, PPp), lambda n: (0, 0))],
        out_specs=pl.BlockSpec((Bblk, Cout, PPp), lambda n: (n, 0, 0)),
        compiler_params=_compiler_params(),
        cost_estimate=_cost_estimate(N, Cin, HW, Cout, ppp=PPp),
    )(x3, w_bb, b_bb, q)
    return y[:, :, :pool * pool].reshape(N, Cout, pool, pool)


def run_global(x, params):
    N, Cin, H, W = x.shape
    HW = H * W
    x3 = x.reshape(N, Cin, HW)
    w_bb, b_bb = params["w_bb"], params["b_bb"]
    wfc, bfc, D = params["w_fc_padded"], params["b_fc_padded"], params["fc_dim"]
    Cout, Dp = w_bb.shape[0], wfc.shape[1]
    Bblk = _pick_batch_block(N)
    y = pl.pallas_call(
        global_fused_kernel,
        out_shape=jax.ShapeDtypeStruct((N, Dp), jnp.float32),
        grid=(N // Bblk,),
        in_specs=_in_specs_common(Bblk, Cin, HW, Cout) + [
            pl.BlockSpec((Cout, Dp), lambda n: (0, 0)),
            pl.BlockSpec((1, Dp), lambda n: (0, 0))],
        out_specs=pl.BlockSpec((Bblk, Dp), lambda n: (n, 0)),
        compiler_params=_compiler_params(),
        cost_estimate=_cost_estimate(N, Cin, HW, Cout, dp=Dp),
    )(x3, w_bb, b_bb, wfc, bfc)
    return y[:, :D]


def run_both(x, params):
    """One pallas_call, two outputs: backbone computed once, no HBM feat."""
    N, Cin, H, W = x.shape
    HW = H * W
    x3 = x.reshape(N, Cin, HW)
    w_bb, b_bb, q = params["w_bb"], params["b_bb"], params["q_pool_padded"]
    wfc, bfc = params["w_fc_padded"], params["b_fc_padded"]
    pool, D = params["pool_out"], params["fc_dim"]
    Cout, PPp, Dp = w_bb.shape[0], q.shape[1], wfc.shape[1]
    Bblk = _pick_batch_block(N)
    lo, go = pl.pallas_call(
        both_fused_kernel,
        out_shape=(jax.ShapeDtypeStruct((N, Cout, PPp), jnp.float32),
                   jax.ShapeDtypeStruct((N, Dp), jnp.float32)),
        grid=(N // Bblk,),
        in_specs=_in_specs_common(Bblk, Cin, HW, Cout) + [
            pl.BlockSpec((HW, PPp), lambda n: (0, 0)),
            pl.BlockSpec((Cout, Dp), lambda n: (0, 0)),
            pl.BlockSpec((1, Dp), lambda n: (0, 0))],
        out_specs=(pl.BlockSpec((Bblk, Cout, PPp), lambda n: (n, 0, 0)),
                   pl.BlockSpec((Bblk, Dp), lambda n: (n, 0))),
        compiler_params=_compiler_params(),
        cost_estimate=_cost_estimate(N, Cin, HW, Cout, ppp=PPp, dp=Dp),
    )(x3, w_bb, b_bb, q, wfc, bfc)
    local = lo[:, :, :pool * pool].reshape(N, Cout, pool, pool)
    return local, go[:, :D]


def feature_extractor(x, params, f_type="local"):
    if f_type == "local":
        return run_local(x, params)
    elif f_type == "global":
        return run_global(x, params)
    else:
        raise ValueError(f"Invalid features type: {f_type}")


# ---------------------- adaptive-pool matrix (glue) ------------------------ #

def adaptive_avg_pool_matrix(in_size, out_size):
    """Exact AdaptiveAvgPool1d averaging matrix (out_size, in_size)."""
    m = np.zeros((out_size, in_size), dtype=np.float32)
    for i in range(out_size):
        s = (i * in_size) // out_size
        e = -((-(i + 1) * in_size) // out_size)   # ceil division
        m[i, s:e] = 1.0 / (e - s)
    return m


# ----------------------- pure-JAX reference (checks) ----------------------- #

def reference_forward(x, w_bb, b_bb, ph, pw, w_fc, b_fc):
    hi = jax.lax.Precision.HIGHEST
    feat = jnp.einsum("oc,nchw->nohw", w_bb, x, precision=hi)
    feat = jnp.maximum(feat + b_bb.reshape(1, -1, 1, 1), 0.0)
    # local: AdaptiveAvgPool2d((15,15)) then L2Norm over channels
    pooled = jnp.einsum("ih,jw,nchw->ncij", ph, pw, feat, precision=hi)
    ln = jnp.maximum(jnp.linalg.norm(pooled, axis=1, keepdims=True), L2_EPS)
    loc = pooled / ln
    # global: L2Norm -> GeM -> Flatten -> Linear -> L2Norm
    fn = jnp.maximum(jnp.linalg.norm(feat, axis=1, keepdims=True), L2_EPS)
    xn = feat / fn
    xc = jnp.maximum(xn, GEM_EPS)
    g = jnp.mean(xc ** GEM_P, axis=(2, 3)) ** (1.0 / GEM_P)
    v = jnp.dot(g, w_fc, precision=hi) + b_fc
    vn = jnp.maximum(jnp.linalg.norm(v, axis=1, keepdims=True), L2_EPS)
    return loc, v / vn


# --------------------------------- main ------------------------------------ #

if __name__ == "__main__":
    # N=16 so batch blocking is meaningful: Bblk=8 -> M = 8*32 = 256 per
    # pooling matmul and a 2-step parallel grid (one block per v7x TC).
    N, Cin, H, W = 16, 4, 16, 16       # input x: NCHW
    FEATURES_DIM = 32                  # backbone output channels
    FC_OUTPUT_DIM = 16                 # fc_output_dim
    POOL_OUT = 15                      # AdaptiveAvgPool2d((15, 15))

    key = jax.random.PRNGKey(0)
    kx, kw, kb, kfw, kfb = jax.random.split(key, 5)

    x = jax.random.normal(kx, (N, Cin, H, W), dtype=jnp.float32)

    # Deterministic synthetic parameters.
    w_bb = 0.1 * jax.random.normal(kw, (FEATURES_DIM, Cin), dtype=jnp.float32)
    b_bb = 0.01 * jax.random.normal(kb, (FEATURES_DIM, 1), dtype=jnp.float32)
    w_fc = jax.random.normal(kfw, (FEATURES_DIM, FC_OUTPUT_DIM),
                             dtype=jnp.float32) / np.sqrt(FEATURES_DIM)
    b_fc = 0.01 * jax.random.normal(kfb, (1, FC_OUTPUT_DIM), dtype=jnp.float32)

    # Exact adaptive-avg-pool as a (H*W, 225) matrix, zero-padded to a
    # multiple of 128 lanes (lane-dense output store), kept in f32 for parity
    # with PyTorch's f32 AdaptiveAvgPool2d.
    ph = adaptive_avg_pool_matrix(H, POOL_OUT)
    pw = adaptive_avg_pool_matrix(W, POOL_OUT)
    q = np.kron(ph, pw).T.astype(np.float32)               # (H*W, 225)
    PP = POOL_OUT * POOL_OUT
    PP_PAD = _round_up(PP, 128)
    q_pad = np.zeros((H * W, PP_PAD), dtype=np.float32)
    q_pad[:, :PP] = q

    # fc weights/bias zero-padded to 128 lanes (lane-dense global store).
    D_PAD = _round_up(FC_OUTPUT_DIM, 128)
    w_fc_pad = jnp.zeros((FEATURES_DIM, D_PAD), jnp.float32)
    w_fc_pad = w_fc_pad.at[:, :FC_OUTPUT_DIM].set(w_fc)
    b_fc_pad = jnp.zeros((1, D_PAD), jnp.float32)
    b_fc_pad = b_fc_pad.at[:, :FC_OUTPUT_DIM].set(b_fc)

    params = dict(
        w_bb=w_bb, b_bb=b_bb,
        q_pool_padded=jnp.asarray(q_pad, dtype=jnp.float32),
        w_fc_padded=w_fc_pad, b_fc_padded=b_fc_pad,
        pool_out=POOL_OUT, fc_dim=FC_OUTPUT_DIM,
    )

    # Single fused call producing both descriptors (backbone computed once).
    local_out, global_out = run_both(x, params)
    jax.block_until_ready((local_out, global_out))

    # Individual paths, matching the torch module's f_type switch.
    local_only = feature_extractor(x, params, f_type="local")
    global_only = feature_extractor(x, params, f_type="global")
    jax.block_until_ready((local_only, global_only))

    assert local_out.shape == (N, FEATURES_DIM, POOL_OUT, POOL_OUT)
    assert global_out.shape == (N, FC_OUTPUT_DIM)
    assert bool(jnp.all(jnp.isfinite(local_out)))
    assert bool(jnp.all(jnp.isfinite(global_out)))
    # Global descriptors are L2-normalized -> unit norm.
    assert bool(jnp.allclose(jnp.linalg.norm(global_out, axis=-1), 1.0, atol=1e-4))
    # Fused-both path matches the single-path kernels.
    assert bool(jnp.allclose(local_only, local_out, atol=1e-5, rtol=1e-5))
    assert bool(jnp.allclose(global_only, global_out, atol=1e-5, rtol=1e-5))
    # Pallas kernels match the pure-JAX reference of the torch forward pass.
    ref_local, ref_global = reference_forward(x, w_bb, b_bb,
                                              jnp.asarray(ph), jnp.asarray(pw),
                                              w_fc, b_fc)
    assert bool(jnp.allclose(local_out, ref_local, atol=1e-4, rtol=1e-4))
    assert bool(jnp.allclose(global_out, ref_global, atol=1e-4, rtol=1e-4))

    print("KERNEL_OK")
</pallas_src>

<mosaic_0001>
module attributes {stable_mosaic.version = 11 : i64} {
  func.func @both_fused_kernel(%arg0: i32, %arg1: memref<8x4x256xf32, #tpu.memory_space<vmem>>, %arg2: memref<32x4xf32, #tpu.memory_space<vmem>>, %arg3: memref<32x1xf32, #tpu.memory_space<vmem>>, %arg4: memref<256x256xf32, #tpu.memory_space<vmem>>, %arg5: memref<32x128xf32, #tpu.memory_space<vmem>>, %arg6: memref<1x128xf32, #tpu.memory_space<vmem>>, %arg7: memref<8x32x256xf32, #tpu.memory_space<vmem>>, %arg8: memref<8x128xf32, #tpu.memory_space<vmem>>) attributes {dimension_semantics = [#tpu.dimension_semantics<parallel>], iteration_bounds = array<i64: 2>, scalar_prefetch = 0 : i64, scratch_operands = 0 : i64, tpu.core_type = #tpu.core_type<tc>, window_params = [{transform_indices = @transform_0, window_bounds = array<i64: 8, 4, 256>}, {pipeline_mode = #tpu.pipeline_mode<synchronous>, transform_indices = @transform_1, window_bounds = array<i64: 32, 4>}, {pipeline_mode = #tpu.pipeline_mode<synchronous>, transform_indices = @transform_2, window_bounds = array<i64: 32, 1>}, {pipeline_mode = #tpu.pipeline_mode<synchronous>, transform_indices = @transform_3, window_bounds = array<i64: 256, 256>}, {pipeline_mode = #tpu.pipeline_mode<synchronous>, transform_indices = @transform_4, window_bounds = array<i64: 32, 128>}, {pipeline_mode = #tpu.pipeline_mode<synchronous>, transform_indices = @transform_5, window_bounds = array<i64: 1, 128>}, {transform_indices = @transform_6, window_bounds = array<i64: 8, 32, 256>}, {transform_indices = @transform_7, window_bounds = array<i64: 8, 128>}]} {
    %c0 = arith.constant 0 : index
    %c0_0 = arith.constant 0 : index
    %c0_1 = arith.constant 0 : index
    %0 = vector.load %arg1[%c0, %c0_0, %c0_1] : memref<8x4x256xf32, #tpu.memory_space<vmem>>, vector<8x4x256xf32>
    %c0_2 = arith.constant 0 : index
    %c0_3 = arith.constant 0 : index
    %1 = vector.load %arg2[%c0_2, %c0_3] : memref<32x4xf32, #tpu.memory_space<vmem>>, vector<32x4xf32>
    %c0_4 = arith.constant 0 : index
    %c0_5 = arith.constant 0 : index
    %2 = vector.load %arg3[%c0_4, %c0_5] : memref<32x1xf32, #tpu.memory_space<vmem>>, vector<32x1xf32>
    %3 = vector.shape_cast %2 : vector<32x1xf32> to vector<1x32x1xf32>
    %4 = vector.extract_strided_slice %1 {offsets = [0, 0], sizes = [32, 1], strides = [1, 1]} : vector<32x4xf32> to vector<32x1xf32>
    %5 = vector.shape_cast %4 : vector<32x1xf32> to vector<1x32x1xf32>
    %6 = vector.extract_strided_slice %0 {offsets = [0, 0, 0], sizes = [8, 1, 256], strides = [1, 1, 1]} : vector<8x4x256xf32> to vector<8x1x256xf32>
    %7 = vector.broadcast %5 : vector<1x32x1xf32> to vector<8x32x256xf32>
    %8 = vector.broadcast %6 : vector<8x1x256xf32> to vector<8x32x256xf32>
    %9 = arith.mulf %7, %8 : vector<8x32x256xf32>
    %10 = vector.broadcast %3 : vector<1x32x1xf32> to vector<8x32x256xf32>
    %11 = arith.addf %10, %9 : vector<8x32x256xf32>
    %12 = vector.extract_strided_slice %1 {offsets = [0, 1], sizes = [32, 1], strides = [1, 1]} : vector<32x4xf32> to vector<32x1xf32>
    %13 = vector.shape_cast %12 : vector<32x1xf32> to vector<1x32x1xf32>
    %14 = vector.extract_strided_slice %0 {offsets = [0, 1, 0], sizes = [8, 1, 256], strides = [1, 1, 1]} : vector<8x4x256xf32> to vector<8x1x256xf32>
    %15 = vector.broadcast %13 : vector<1x32x1xf32> to vector<8x32x256xf32>
    %16 = vector.broadcast %14 : vector<8x1x256xf32> to vector<8x32x256xf32>
    %17 = arith.mulf %15, %16 : vector<8x32x256xf32>
    %18 = arith.addf %11, %17 : vector<8x32x256xf32>
    %19 = vector.extract_strided_slice %1 {offsets = [0, 2], sizes = [32, 1], strides = [1, 1]} : vector<32x4xf32> to vector<32x1xf32>
    %20 = vector.shape_cast %19 : vector<32x1xf32> to vector<1x32x1xf32>
    %21 = vector.extract_strided_slice %0 {offsets = [0, 2, 0], sizes = [8, 1, 256], strides = [1, 1, 1]} : vector<8x4x256xf32> to vector<8x1x256xf32>
    %22 = vector.broadcast %20 : vector<1x32x1xf32> to vector<8x32x256xf32>
    %23 = vector.broadcast %21 : vector<8x1x256xf32> to vector<8x32x256xf32>
    %24 = arith.mulf %22, %23 : vector<8x32x256xf32>
    %25 = arith.addf %18, %24 : vector<8x32x256xf32>
    %26 = vector.extract_strided_slice %1 {offsets = [0, 3], sizes = [32, 1], strides = [1, 1]} : vector<32x4xf32> to vector<32x1xf32>
    %27 = vector.shape_cast %26 : vector<32x1xf32> to vector<1x32x1xf32>
    %28 = vector.extract_strided_slice %0 {offsets = [0, 3, 0], sizes = [8, 1, 256], strides = [1, 1, 1]} : vector<8x4x256xf32> to vector<8x1x256xf32>
    %29 = vector.broadcast %27 : vector<1x32x1xf32> to vector<8x32x256xf32>
    %30 = vector.broadcast %28 : vector<8x1x256xf32> to vector<8x32x256xf32>
    %31 = arith.mulf %29, %30 : vector<8x32x256xf32>
    %32 = arith.addf %25, %31 : vector<8x32x256xf32>
    %cst = arith.constant 0.000000e+00 : f32
    %33 = vector.broadcast %cst : f32 to vector<8x32x256xf32>
    %34 = arith.maximumf %32, %33 : vector<8x32x256xf32>
    %c0_6 = arith.constant 0 : index
    %c0_7 = arith.constant 0 : index
    %35 = vector.load %arg4[%c0_6, %c0_7] : memref<256x256xf32, #tpu.memory_space<vmem>>, vector<256x256xf32>
    %36 = vector.shape_cast %34 : vector<8x32x256xf32> to vector<256x256xf32>
    %cst_8 = arith.constant dense<0.000000e+00> : vector<256x256xf32>
    %37 = tpu.matmul %36, %35, %cst_8 {dimension_numbers = #tpu.dot_dimension_numbers<[1], [0], [0], [1], [0, 0, 1, 1], [], []>} : vector<256x256xf32>, vector<256x256xf32>, vector<256x256xf32> -> vector<256x256xf32>
    %38 = vector.shape_cast %37 : vector<256x256xf32> to vector<8x32x256xf32>
    %39 = arith.mulf %38, %38 : vector<8x32x256xf32>
    %cst_9 = arith.constant dense<0.000000e+00> : vector<8x256xf32>
    %40 = vector.multi_reduction <add>, %39, %cst_9 [1] : vector<8x32x256xf32> to vector<8x256xf32>
    %41 = vector.shape_cast %40 : vector<8x256xf32> to vector<8x1x256xf32>
    %cst_10 = arith.constant 1.000000e-24 : f32
    %42 = vector.broadcast %cst_10 : f32 to vector<8x1x256xf32>
    %43 = arith.maximumf %41, %42 : vector<8x1x256xf32>
    %44 = math.rsqrt %43 : vector<8x1x256xf32>
    %45 = vector.broadcast %44 : vector<8x1x256xf32> to vector<8x32x256xf32>
    %46 = arith.mulf %38, %45 : vector<8x32x256xf32>
    %c0_11 = arith.constant 0 : index
    %c0_12 = arith.constant 0 : index
    %c0_13 = arith.constant 0 : index
    %47 = vector.load %arg7[%c0_11, %c0_12, %c0_13] : memref<8x32x256xf32, #tpu.memory_space<vmem>>, vector<8x32x256xf32>
    tpu.vector_store %arg7[%c0_11, %c0_12, %c0_13], %46 {strides = array<i32>} : memref<8x32x256xf32, #tpu.memory_space<vmem>>, vector<8x32x256xf32>,
    %c0_14 = arith.constant 0 : index
    %c0_15 = arith.constant 0 : index
    %48 = vector.load %arg5[%c0_14, %c0_15] : memref<32x128xf32, #tpu.memory_space<vmem>>, vector<32x128xf32>
    %c0_16 = arith.constant 0 : index
    %c0_17 = arith.constant 0 : index
    %49 = vector.load %arg6[%c0_16, %c0_17] : memref<1x128xf32, #tpu.memory_space<vmem>>, vector<1x128xf32>
    %50 = arith.mulf %34, %34 : vector<8x32x256xf32>
    %cst_18 = arith.constant dense<0.000000e+00> : vector<8x256xf32>
    %51 = vector.multi_reduction <add>, %50, %cst_18 [1] : vector<8x32x256xf32> to vector<8x256xf32>
    %52 = vector.shape_cast %51 : vector<8x256xf32> to vector<8x1x256xf32>
    %cst_19 = arith.constant 1.000000e-24 : f32
    %53 = vector.broadcast %cst_19 : f32 to vector<8x1x256xf32>
    %54 = arith.maximumf %52, %53 : vector<8x1x256xf32>
    %55 = math.rsqrt %54 : vector<8x1x256xf32>
    %56 = vector.broadcast %55 : vector<8x1x256xf32> to vector<8x32x256xf32>
    %57 = arith.mulf %34, %56 : vector<8x32x256xf32>
    %cst_20 = arith.constant 9.99999997E-7 : f32
    %58 = vector.broadcast %cst_20 : f32 to vector<8x32x256xf32>
    %59 = arith.maximumf %57, %58 : vector<8x32x256xf32>
    %60 = arith.mulf %59, %59 : vector<8x32x256xf32>
    %61 = arith.mulf %60, %59 : vector<8x32x256xf32>
    %cst_21 = arith.constant dense<0.000000e+00> : vector<8x32xf32>
    %62 = vector.multi_reduction <add>, %61, %cst_21 [2] : vector<8x32x256xf32> to vector<8x32xf32>
    %cst_22 = arith.constant 2.560000e+02 : f32
    %63 = vector.broadcast %cst_22 : f32 to vector<8x32xf32>
    %64 = arith.divf %62, %63 : vector<8x32xf32>
    %65 = math.log %64 : vector<8x32xf32>
    %cst_23 = arith.constant 0.333333343 : f32
    %66 = vector.broadcast %cst_23 : f32 to vector<8x32xf32>
    %67 = arith.mulf %65, %66 : vector<8x32xf32>
    %68 = math.exp %67 : vector<8x32xf32>
    %cst_24 = arith.constant dense<0.000000e+00> : vector<8x128xf32>
    %69 = tpu.matmul %68, %48, %cst_24 {dimension_numbers = #tpu.dot_dimension_numbers<[1], [0], [0], [1], [0, 0, 1, 1], [], []>} : vector<8x32xf32>, vector<32x128xf32>, vector<8x128xf32> -> vector<8x128xf32>
    %70 = vector.broadcast %49 : vector<1x128xf32> to vector<8x128xf32>
    %71 = arith.addf %69, %70 : vector<8x128xf32>
    %72 = arith.mulf %71, %71 : vector<8x128xf32>
    %cst_25 = arith.constant dense<0.000000e+00> : vector<8xf32>
    %73 = vector.multi_reduction <add>, %72, %cst_25 [1] : vector<8x128xf32> to vector<8xf32>
    %74 = vector.shape_cast %73 : vector<8xf32> to vector<8x1xf32>
    %cst_26 = arith.constant 1.000000e-24 : f32
    %75 = vector.broadcast %cst_26 : f32 to vector<8x1xf32>
    %76 = arith.maximumf %74, %75 : vector<8x1xf32>
    %77 = math.rsqrt %76 : vector<8x1xf32>
    %78 = vector.broadcast %77 : vector<8x1xf32> to vector<8x128xf32>
    %79 = arith.mulf %71, %78 : vector<8x128xf32>
    %c0_27 = arith.constant 0 : index
    %c0_28 = arith.constant 0 : index
    %80 = vector.load %arg8[%c0_27, %c0_28] : memref<8x128xf32, #tpu.memory_space<vmem>>, vector<8x128xf32>
    tpu.vector_store %arg8[%c0_27, %c0_28], %79 {strides = array<i32>} : memref<8x128xf32, #tpu.memory_space<vmem>>, vector<8x128xf32>,
    return
  }
  func.func @transform_0(%arg0: i32) -> (i32, i32, i32) {
    %c0_i32 = arith.constant 0 : i32
    %c0_i32_0 = arith.constant 0 : i32
    %c0_i32_1 = arith.constant 0 : i32
    return %arg0, %c0_i32, %c0_i32_0 : i32, i32, i32
  }
  func.func @transform_1(%arg0: i32) -> (i32, i32) {
    %c0_i32 = arith.constant 0 : i32
    %c0_i32_0 = arith.constant 0 : i32
    %c0_i32_1 = arith.constant 0 : i32
    return %c0_i32, %c0_i32_0 : i32, i32
  }
  func.func @transform_2(%arg0: i32) -> (i32, i32) {
    %c0_i32 = arith.constant 0 : i32
    %c0_i32_0 = arith.constant 0 : i32
    %c0_i32_1 = arith.constant 0 : i32
    return %c0_i32, %c0_i32_0 : i32, i32
  }
  func.func @transform_3(%arg0: i32) -> (i32, i32) {
    %c0_i32 = arith.constant 0 : i32
    %c0_i32_0 = arith.constant 0 : i32
    %c0_i32_1 = arith.constant 0 : i32
    return %c0_i32, %c0_i32_0 : i32, i32
  }
  func.func @transform_4(%arg0: i32) -> (i32, i32) {
    %c0_i32 = arith.constant 0 : i32
    %c0_i32_0 = arith.constant 0 : i32
    %c0_i32_1 = arith.constant 0 : i32
    return %c0_i32, %c0_i32_0 : i32, i32
  }
  func.func @transform_5(%arg0: i32) -> (i32, i32) {
    %c0_i32 = arith.constant 0 : i32
    %c0_i32_0 = arith.constant 0 : i32
    %c0_i32_1 = arith.constant 0 : i32
    return %c0_i32, %c0_i32_0 : i32, i32
  }
  func.func @transform_6(%arg0: i32) -> (i32, i32, i32) {
    %c0_i32 = arith.constant 0 : i32
    %c0_i32_0 = arith.constant 0 : i32
    %c0_i32_1 = arith.constant 0 : i32
    return %arg0, %c0_i32, %c0_i32_0 : i32, i32, i32
  }
  func.func @transform_7(%arg0: i32) -> (i32, i32) {
    %c0_i32 = arith.constant 0 : i32
    %c0_i32_0 = arith.constant 0 : i32
    return %arg0, %c0_i32 : i32, i32
  }
}

</mosaic_0001>

<bundles_post_ra>
// kernel: tpu_custom_call.1
= control target key start
LH: loop header
LB: loop body
LE: loop exit
PB: predicated region body
PF: predicated region fallthrough
CT: control target
= control target key end

     0   :  { %s6578_s0 = inlined_call_operand.hbm [shape: f32[16,4,256], index: 0, kind: input, shape index: {}]   ;;  %s6579_s1 = inlined_call_operand.vmem [shape: f32[32,4], index: 1, kind: input, shape index: {}]   ;;  %s6580_s2 = inlined_call_operand.vmem [shape: f32[32,1], index: 2, kind: input, shape index: {}]   ;;  %s6581_s3 = inlined_call_operand.hbm [shape: f32[256,256], index: 3, kind: input, shape index: {}]   ;;  %s6582_s4 = inlined_call_operand.vmem [shape: f32[32,128], index: 4, kind: input, shape index: {}]   ;;  %s6583_s5 = inlined_call_operand.vmem [shape: f32[1,128], index: 5, kind: input, shape index: {}]   ;;  %s6584_s6 = inlined_call_operand.hbm [shape: f32[16,32,256], index: 6, kind: output, shape index: {0}]   ;;  %s6585_s7 = inlined_call_operand.hbm [shape: f32[16,128], index: 7, kind: output, shape index: {1}]  }
   0x1   :  { %6748 = sst [smem:[#allocation97_spill]] %s6581_s3 }
   0x2   :  { %13 = vsyncpa [#allocation3], 0 }
   0x3   :  { %15 = vsyncpa [#allocation3 + $0x1], 0 }
   0x4   :  { %16 = vsyncpa [#allocation6], 0 }
   0x5   :  { %17 = vsyncpa [#allocation4], 0 }
   0x6   :  { %19 = vsyncpa [#allocation4 + $0x1], 0 }
   0x7   :  { %20 = vsyncpa [#allocation9], 0 }
   0x8   :  { %22 = vsyncpa [#allocation9 + $0x1], 0  ;;  %s4109_s24 = smov 0   ;;  %s4111_s25 = smov 0  }
   0x9   :  { %s4113_s26 = smov 0   ;;  %s4115_s27 = smov 0  }
   0xa LB: > { %s4130_s28 = sadd.s32 4294967295, %s4051_s27   ;;  %s3509_s29 = sadd.s32 4294967294, %s4051_s27   ;;  %s4051_s27 = sphi %s4115_s27, %s7038_s27   ;;  %s4047_s26 = sphi %s4113_s26, %s7037_s26   ;;  %s4043_s25 = sphi %s4111_s25, %s7036_s25   ;;  %s4039_s24 = sphi %s4109_s24, %s7035_s24  }
   0xb   : > { %p48_p0 = scmp.ne.s32.totalorder %s4043_s25, %s4039_s24  ;;  %p6586_p1 = scmp.eq.s32.totalorder %s4130_s28, 0 }
   0xc   : > { %p183_p3 = scmp.eq.s32.totalorder %s3509_s29, 1  ;;  %p3510_p5 = scmp.ge.s32.totalorder %s4051_s27, 1 }
   0xd   : > { %p4139_p4 = por %p6586_p1, %p48_p0  ;;  %p216_p7 = scmp.lt.s32.totalorder %s4051_s27, 3 }
   0xe   : > { %p4144_p6 = por %p183_p3, %p48_p0  ;;  %s4053_s10 = smov [#allocation5]  }
   0xf   : > { %s6749_s30 = scalar_select %p4139_p4, 1, 0 }
  0x10   : > { %s6750_s8 = scalar_select %p4144_p6, 1, 0 }
  0x11   : > { %p4149_p8 = pnand %p3510_p5, %p216_p7  ;;  %s234_s11 = sshll.u32 %s4053_s10, 4  ;;  %s235_s11 = int_to_ptr.vmem [resolvable:$true] %s234_s11 }
  0x12   : > { %s4163_s13 = sadd.s32 1, %s4051_s27   ;;  %s35_s14 = sadd.s32 1, %s4047_s26 }
  0x13   : > { %s6751_s9 = scalar_select %p4149_p8, 1, 0 }
  0x14   : > { %p3626_p9 = pneg %p4149_p8  ;;  %s32_s15 = ssub.s32 %s4051_s27, %s4163_s13 }
  0x15   : > { %s3910_s16 = scalar_lea.vmem %s235_s11, 8192  ;;  %p3918_p5 = scmp.lt.s32.totalorder %s235_s11, %s235_s11 }
  0x16   : > { %p4158_p11 = pnand %p3626_p9, %p6586_p1  ;;  %p3911_p13 = scmp.ne.s32.totalorder %s235_s11, %s3910_s16 }
  0x17   : > { %p3919_p7 = scmp.lt.s32.totalorder %s3910_s16, %s3910_s16 }
  0x18   : > { %p3901_p12 = pneg %p4158_p11 }
  0x19   : > { %p3920_p10 = por %p3919_p7, %p3918_p5 }
  0x1a   : > { %p3913_p0 = pnand %p3911_p13, %p3901_p12 }
  0x1c   : > { %p3914_p3 = pneg %p3913_p0 }
  0x1e   : > { %p3921_p2 = pnand %p3920_p10, %p3914_p3 }
  0x20   : > { %3924 = shalt.err (!%p3921_p2)
}
  0x21   : > { %s4054_s17 = smov 256   ;;  %s4055_s18 = smov 16  }
  0x22   : > { %s6753_s3 = sld [smem:[#allocation97_spill]]  ;;  %p33_p9 = scmp.eq.s32.totalorder %s32_s15, 0 }
  0x23   : > { %p42_p12 = scmp.ne.s32.totalorder %s4047_s26, %s4043_s25  ;;  %p43_p10 = scmp.eq.s32.totalorder %s4051_s27, 0 }
  0x24   : > { %p3642_p2 = scmp.lt.s32.totalorder %s4051_s27, 2  ;;  %p6754_p0 = scmp.eq.s32.totalorder %s4130_s28, 1 }
  0x25   : > { %s4180_s21 = scalar_select %p33_p9, %s4047_s26, %s35_s14  }
  0x26   : > { %p44_p13 = por %p43_p10, %p42_p12  ;;  %p4184_p3 = por %p6754_p0, %p42_p12 }
  0x27   : > { %s254_s23 = sand.u32 1, %s4047_s26   ;;  %s3533_s29 = sshll.u32 %s4051_s27, 10 }
  0x28   : > { %3629 = dma.hbm_to_vmem [thread:$0]  (!%p4158_p11), %s6753_s3, 8192, %s235_s11, [#allocation6], %s4054_s17, %s4054_s17, %s4055_s18  }
  0x29   : > { %s6755_s22 = scalar_select %p4184_p3, 1, 0 }
  0x2a   : > { %s3513_s10 = sshll.u32 %s254_s23, 6  ;;  %s4193_s19 = scalar_lea.hbm %s6578_s0, %s3533_s29 }
  0x2b   : > { %s258_s11 = scalar_lea.vmem [#allocation2], %s3513_s10  ;;  %p4195_p11 = pnand %p3642_p2, %p44_p13 }
  0x2c   : > { %s266_s14 = sshll.u32 %s258_s11, 4  ;;  %s4201_s17 = scalar_lea.sflag [#allocation3], %s254_s23  ;;  %s4199_s14 = int_to_ptr.vmem [resolvable:$true] %s266_s14 }
  0x2d   : > { %s3925_s18 = scalar_lea.hbm %s4193_s19, 1024  ;;  %p3927_p7 = pneg %p4195_p11 }
  0x2e   : > { %p3926_p5 = scmp.ne.s32.totalorder %s4193_s19, %s3925_s18  ;;  %s3930_s10 = scalar_lea.hbm %s6578_s0, 2048 }
  0x2f   : > { %p3931_p10 = scmp.lt.s32.totalorder %s4193_s19, %s6578_s0  ;;  %p3932_p2 = scmp.lt.s32.totalorder %s3930_s10, %s3925_s18 }
  0x30   : > { %p3928_p9 = pnand %p3927_p7, %p3926_p5 }
  0x31   : > { %p3933_p13 = por %p3932_p2, %p3931_p10 }
  0x32   : > { %p3929_p12 = pneg %p3928_p9 }
  0x34   : > { %p3934_p0 = pnand %p3933_p13, %p3929_p12 }
  0x36   : > { %3937 = shalt.err (!%p3934_p0)
}
  0x37   : > { %s3938_s23 = scalar_lea.vmem %s4199_s14, 1024  ;;  %s4056_s11 = smov [#allocation2]  }
  0x38   : > { %p3939_p1 = scmp.ne.s32.totalorder %s4199_s14, %s3938_s23  ;;  %s3943_s3 = sshll.u32 %s4056_s11, 4  ;;  %s3944_s3 = int_to_ptr.vmem [resolvable:$false] %s3943_s3 }
  0x39   : > { %s3945_s20 = scalar_lea.vmem %s3944_s3, 2048  ;;  %p3946_p9 = scmp.lt.s32.totalorder %s4199_s14, %s3944_s3 }
  0x3a   : > { %p3941_p6 = pnand %p3939_p1, %p3927_p7  ;;  %p3947_p3 = scmp.lt.s32.totalorder %s3945_s20, %s3938_s23 }
  0x3c   : > { %p3942_p5 = pneg %p3941_p6  ;;  %p3948_p4 = por %p3947_p3, %p3946_p9 }
  0x3e   : > { %p3949_p8 = pnand %p3948_p4, %p3942_p5 }
  0x40   : > { %3952 = shalt.err (!%p3949_p8)
}
  0x41   : > { %s4057_s18 = smov 128   ;;  %s4058_s29 = smov 8  }
  0x42   : > { %3633 = dma.hbm_to_vmem [thread:$0]  (!%p4195_p11), %s4193_s19, 1024, %s4199_s14, %s4201_s17, %s4057_s18, %s4057_s18, %s4058_s29  }
  0x43   : > { %p6757_p1 = scmp.ne.s32.totalorder %s6751_s9, 0 }
  0x45   : > { %278 = sbr.rel (%p6757_p1) target bundleno = 1062 (0x426), region = 44 }
  0x4a   : > { %s4225_s10 = sand.u32 1, %s4043_s25   ;;  %p6758_p4 = scmp.ne.s32.totalorder %s6749_s30, 0 }
  0x4b   : > { %s3518_s3 = sshll.u32 %s4225_s10, 6  ;;  %s281_s12 = scalar_lea.sflag [#allocation3], %s4225_s10 }
  0x4c   : > { %s4229_s16 = scalar_lea.vmem [#allocation2], %s3518_s3 }
  0x4d   : > { %4022 = dma.done.wait (%p6758_p4), %s281_s12, 1024  }
  0x4e   : > { %4024 = vsyncadd (%p6758_p4), %s281_s12, 4294966272  ;;  %p6759_p6 = scmp.eq.s32.totalorder %s4130_s28, 0 }
  0x50   : > { %4026 = dma.done.wait (%p6759_p6), [#allocation6], 8192   ;;  %p6760_p8 = pmov %p6759_p6 }
  0x51   : > { %v4059_v0 = vmov 0   ;;  %v4244_v1 = vld [vmem:[%s6579_s1 + $0x10] sm:$0xff]  ;;  %v4249_v2 = vld [vmem:[%s6579_s1] sm:$0xff]  ;;  %v4259_v4 = vld [vmem:[%s6579_s1 + $0x8] sm:$0xff]  ;;  %v4060_v13 = vmov 1   ;;  %v4061_v27 = vmov 2  }
  0x52   : > { %4028 = vsyncadd (%p6760_p8), [#allocation6], 4294959104  ;;  %3691 = vset.pattern.permute.xlu1 %v4059_v0  ;;  %3690 = vset.pattern.permute.xlu0 %v4059_v0  ;;  %v338_v3 = vld [vmem:[%s6580_s2] sm:$0xff]  ;;  %v1621_v5 = vld [vmem:[#allocation5 + $0xf8] sm:$0xff]  ;;  %v4062_v35 = vmov 3   ;;  %vm4064_vm0 = vmmov 0  }
  0x53   : > { %354 = vperm.xlu1 %3691, %v4244_v1   ;;  %344 = vperm.xlu0 %3690, %v4249_v2   ;;  %v1620_v6 = vld [vmem:[#allocation5 + $0xf0] sm:$0xff]  ;;  %v1619_v7 = vld [vmem:[#allocation5 + $0xe8] sm:$0xff]  ;;  %v1618_v8 = vld [vmem:[#allocation5 + $0xe0] sm:$0xff]  ;;  %vm3118_vm1 = vcmask 130112   ;;  %vm3125_vm2 = vcmask 195712   ;;  %vm3132_vm3 = vcmask 261312  }
  0x54   : > { %3552 = vmatprep.subr.mxu1 %v1621_v5  ;;  %1654 = vmatprep.subr.mxu0 %v1621_v5  ;;  %v1617_v9 = vld [vmem:[#allocation5 + $0xd8] sm:$0xff]  ;;  %v339_v10 = vld [vmem:[%s6580_s2 + $0x8] sm:$0xff]  ;;  %v1616_v11 = vld [vmem:[#allocation5 + $0xd0] sm:$0xff]  ;;  %vm3267_vm4 = vcmask 1041409   ;;  %vm3269_vm5 = vcmask 1042434   ;;  %vm3271_vm6 = vcmask 1043459  }
  0x55   : > { %3584 = vmatpush1.msra.mxu1 %v1620_v6  ;;  %1655 = vmatpush1.msra.mxu0 %v1620_v6  ;;  %v1615_v12 = vld [vmem:[#allocation5 + $0xc8] sm:$0xff]  ;;  %v1614_v14 = vld [vmem:[#allocation5 + $0xc0] sm:$0xff]  ;;  %v1613_v15 = vld [vmem:[#allocation5 + $0xb8] sm:$0xff]  ;;  %vm3273_vm7 = vcmask 1044484   ;;  %vm3275_vm8 = vcmask 1045509   ;;  %vm3277_vm9 = vcmask 1046534  }
  0x56   : > { %3553 = vmatprep.subr.mxu1 %v1619_v7  ;;  %1656 = vmatprep.subr.mxu0 %v1619_v7  ;;  %v4270_v16 = vld [vmem:[%s6579_s1 + $0x18] sm:$0xff]  ;;  %v1612_v17 = vld [vmem:[#allocation5 + $0xb0] sm:$0xff]  ;;  %v1611_v18 = vld [vmem:[#allocation5 + $0xa8] sm:$0xff]  ;;  %vm3279_vm10 = vcmask 1047559   ;;  %vm3281_vm11 = vcmask 261120   ;;  %s3535_s19 = sshll.u32 %s4130_s28, 13 }
  0x57   : > { %580 = vperm.xlu1 %3691, %v338_v3   ;;  %349 = vperm.xlu0 %3690, %v4259_v4   ;;  %v1610_v19 = vld [vmem:[#allocation5 + $0xa0] sm:$0xff]  ;;  %v1609_v20 = vld [vmem:[#allocation5 + $0x98] sm:$0xff]  ;;  %v340_v21 = vld [vmem:[%s6580_s2 + $0x10] sm:$0xff]  ;;  %s6514_s30 = scalar_lea.hbm %s6584_s6, %s3535_s19  ;;  %s3362_s23 = scalar_lea.sflag [#allocation4], %s4225_s10 }
  0x58   : > { %3585 = vmatpush1.msra.mxu1 %v1618_v8  ;;  %1657 = vmatpush1.msra.mxu0 %v1618_v8  ;;  %v1608_v22 = vld [vmem:[#allocation5 + $0x90] sm:$0xff]  ;;  %v1607_v23 = vld [vmem:[#allocation5 + $0x88] sm:$0xff]  ;;  %v1606_v24 = vld [vmem:[#allocation5 + $0x80] sm:$0xff]  ;;  %p7032_p11 = scmp.ne.s32.totalorder %s6755_s22, 0  ;;  %s4065_s20 = smov [#allocation7]  }
  0x59   : > { %3554 = vmatprep.subr.mxu1 %v1617_v9  ;;  %1658 = vmatprep.subr.mxu0 %v1617_v9  ;;  %v1605_v25 = vld [vmem:[#allocation5 + $0x78] sm:$0xff]  ;;  %v1604_v26 = vld [vmem:[#allocation5 + $0x70] sm:$0xff]  ;;  %v1603_v28 = vld [vmem:[#allocation5 + $0x68] sm:$0xff]  ;;  %s3957_s18 = sshll.u32 %s4065_s20, 4  ;;  %s3958_s18 = int_to_ptr.vmem [resolvable:$false] %s3957_s18 }
  0x5a   : > { %3586 = vmatpush1.msra.mxu1 %v1616_v11  ;;  %1659 = vmatpush1.msra.mxu0 %v1616_v11  ;;  %v1602_v29 = vld [vmem:[#allocation5 + $0x60] sm:$0xff]  ;;  %v1601_v30 = vld [vmem:[#allocation5 + $0x58] sm:$0xff]  ;;  %v1600_v32 = vld [vmem:[#allocation5 + $0x50] sm:$0xff]  ;;  %s3959_s29 = scalar_lea.vmem %s3958_s18, 16384 }
  0x5b   : > { %3692 = vset.pattern.permute.xlu1 %v4060_v13  ;;  %585 = vperm.xlu0 %3690, %v339_v10   ;;  %v341_v31 = vld [vmem:[%s6580_s2 + $0x18] sm:$0xff]  ;;  %v1599_v33 = vld [vmem:[#allocation5 + $0x48] sm:$0xff]  ;;  %v1598_v34 = vld [vmem:[#allocation5 + $0x40] sm:$0xff] }
  0x5c   : > { %663 = vperm.xlu1 %3692, %v4249_v2   ;;  %3555 = vmatprep.subr.mxu1 %v1615_v12  ;;  %v1597_v36 = vld [vmem:[#allocation5 + $0x38] sm:$0xff]  ;;  %v1596_v37 = vld [vmem:[#allocation5 + $0x30] sm:$0xff]  ;;  %v1595_v38 = vld [vmem:[#allocation5 + $0x28] sm:$0xff] }
  0x5d   : > { %3587 = vmatpush1.msra.mxu1 %v1614_v14  ;;  %1660 = vmatprep.subr.mxu0 %v1615_v12  ;;  %v1594_v39 = vld [vmem:[#allocation5 + $0x20] sm:$0xff]  ;;  %v1593_v40 = vld [vmem:[#allocation5 + $0x18] sm:$0xff]  ;;  %v1592_v41 = vld [vmem:[#allocation5 + $0x10] sm:$0xff]  ;;  %v6590_v12 = vlaneseq }
  0x5e   : > { %3556 = vmatprep.subr.mxu1 %v1613_v15  ;;  %1661 = vmatpush1.msra.mxu0 %v1614_v14  ;;  %v1591_v42 = vld [vmem:[#allocation5 + $0x8] sm:$0xff]  ;;  %v1590_v43 = vld [vmem:[#allocation5] sm:$0xff]  ;;  %v1653_v44 = vld [vmem:[#allocation5 + $0x1f8] sm:$0xff] }
  0x5f   : > { %3693 = vset.pattern.permute.xlu0 %v4060_v13  ;;  %3588 = vmatpush1.msra.mxu1 %v1612_v17  ;;  %v1652_v45 = vld [vmem:[#allocation5 + $0x1f0] sm:$0xff]  ;;  %v1651_v46 = vld [vmem:[#allocation5 + $0x1e8] sm:$0xff]  ;;  %v1650_v47 = vld [vmem:[#allocation5 + $0x1e0] sm:$0xff] }
  0x60   : > { %3694 = vset.pattern.permute.xlu1 %v4059_v0  ;;  %667 = vperm.xlu0 %3693, %v4259_v4   ;;  %v1649_v48 = vld [vmem:[#allocation5 + $0x1d8] sm:$0xff]  ;;  %v1648_v49 = vld [vmem:[#allocation5 + $0x1d0] sm:$0xff]  ;;  %v1647_v50 = vld [vmem:[#allocation5 + $0x1c8] sm:$0xff] }
  0x61   : > { %359 = vperm.xlu1 %3694, %v4270_v16   ;;  %3557 = vmatprep.subr.mxu1 %v1611_v18  ;;  %v1646_v51 = vld [vmem:[#allocation5 + $0x1c0] sm:$0xff]  ;;  %v1645_v52 = vld [vmem:[#allocation5 + $0x1b8] sm:$0xff]  ;;  %v1644_v53 = vld [vmem:[#allocation5 + $0x1b0] sm:$0xff] }
  0x62   : > { %3589 = vmatpush1.msra.mxu1 %v1610_v19  ;;  %1662 = vmatprep.subr.mxu0 %v1613_v15  ;;  %v1643_v54 = vld [vmem:[#allocation5 + $0x1a8] sm:$0xff]  ;;  %v1642_v55 = vld [vmem:[#allocation5 + $0x1a0] sm:$0xff]  ;;  %v1641_v56 = vld [vmem:[#allocation5 + $0x198] sm:$0xff] }
  0x63   : > { %3558 = vmatprep.subr.mxu1 %v1609_v20  ;;  %1663 = vmatpush1.msra.mxu0 %v1612_v17  ;;  %v1640_v57 = vld [vmem:[#allocation5 + $0x190] sm:$0xff]  ;;  %v1639_v58 = vld [vmem:[#allocation5 + $0x188] sm:$0xff]  ;;  %v1638_v59 = vld [vmem:[#allocation5 + $0x180] sm:$0xff] }
  0x64   : > { %671 = vperm.xlu0 %3693, %v4244_v1   ;;  %3590 = vmatpush1.msra.mxu1 %v1608_v22  ;;  %v1637_v60 = vld [vmem:[#allocation5 + $0x178] sm:$0xff]  ;;  %v1636_v61 = vld [vmem:[#allocation5 + $0x170] sm:$0xff]  ;;  %v1635_v62 = vld [vmem:[#allocation5 + $0x168] sm:$0xff] }
  0x65   : > { %590 = vperm.xlu1 %3694, %v340_v21   ;;  %3559 = vmatprep.subr.mxu1 %v1607_v23  ;;  %v1634_v63 = vld [vmem:[#allocation5 + $0x160] sm:$0xff]  ;;  %v1628_v5 = vld [vmem:[#allocation5 + $0x130] sm:$0xff]  ;;  %v1627_v6 = vld [vmem:[#allocation5 + $0x128] sm:$0xff] }
  0x66   : > { %3591 = vmatpush1.msra.mxu1 %v1606_v24  ;;  %1664 = vmatprep.subr.mxu0 %v1611_v18  ;;  %v1630_v3 = vld [vmem:[#allocation5 + $0x140] sm:$0xff]  ;;  %v1625_v8 = vld [vmem:[#allocation5 + $0x118] sm:$0xff]  ;;  %v1624_v9 = vld [vmem:[#allocation5 + $0x110] sm:$0xff] }
  0x67   : > { %3560 = vmatprep.subr.mxu1 %v1605_v25  ;;  %1665 = vmatpush1.msra.mxu0 %v1610_v19  ;;  %v1626_v7 = vld [vmem:[#allocation5 + $0x120] sm:$0xff]  ;;  %v1623_v10 = vld [vmem:[#allocation5 + $0x108] sm:$0xff] }
  0x68   : > { %3696 = vset.pattern.permute.xlu0 %v4061_v27  ;;  %3592 = vmatpush1.msra.mxu1 %v1604_v26  ;;  %v1622_v11 = vld [vmem:[#allocation5 + $0x100] sm:$0xff] }
  0x69   : > { %3695 = vset.pattern.permute.xlu1 %v4061_v27  ;;  %955 = vperm.xlu0 %3696, %v4259_v4  }
  0x6a   : > { %951 = vperm.xlu1 %3695, %v4249_v2   ;;  %3561 = vmatprep.subr.mxu1 %v1603_v28 }
  0x6b   : > { %1666 = vmatprep.subr.mxu0 %v1609_v20  ;;  %3593 = vmatpush1.msra.mxu1 %v1602_v29 }
  0x6c   : > { %1667 = vmatpush1.msra.mxu0 %v1608_v22  ;;  %3562 = vmatprep.subr.mxu1 %v1601_v30 }
  0x6d   : > { %959 = vperm.xlu0 %3696, %v4244_v1   ;;  %1668 = vmatprep.subr.mxu0 %v1607_v23 }
  0x6e   : > { %3697 = vset.pattern.permute.xlu1 %v4059_v0  ;;  %3594 = vmatpush1.msra.mxu1 %v1600_v32  ;;  %v1633_v0 = vld [vmem:[#allocation5 + $0x158] sm:$0xff] }
  0x6f   : > { %595 = vperm.xlu1 %3697, %v341_v31   ;;  %1669 = vmatpush1.msra.mxu0 %v1606_v24  ;;  %v327_v31 = vld [vmem:[%s4229_s16 + $0x8] sm:$0xff] }
  0x70   : > { %3563 = vmatprep.subr.mxu1 %v1599_v33  ;;  %1670 = vmatprep.subr.mxu0 %v1605_v25  ;;  %v326_v25 = vld [vmem:[%s4229_s16] sm:$0xff] }
  0x71   : > { %3700 = vset.pattern.permute.xlu0 %v4062_v35  ;;  %3595 = vmatpush1.msra.mxu1 %v1598_v34 }
  0x72   : > { %1243 = vperm.xlu0 %3700, %v4259_v4   ;;  %1671 = vmatpush1.msra.mxu0 %v1604_v26  ;;  %v1629_v4 = vld [vmem:[#allocation5 + $0x138] sm:$0xff] }
  0x73   : > { %3698 = vset.pattern.permute.xlu1 %v4060_v13  ;;  %3564 = vmatprep.subr.mxu1 %v1597_v36  ;;  %v4295_v13 = vshrl.u32 %v6590_v12, 7 }
  0x74   : > { %675 = vperm.xlu1 %3698, %v4270_v16   ;;  %1672 = vmatprep.subr.mxu0 %v1603_v28 }
  0x75   : > { %3596 = vmatpush1.msra.mxu1 %v1596_v37  ;;  %1673 = vmatpush1.msra.mxu0 %v1602_v29  ;;  %6761 = vst [vmem:[#allocation14_spill] sm:$0xff] %v4295_v13  ;;  %v4298_v14 = vsub.s32 4, %v4295_v13  ;;  %v4301_v15 = vsub.s32 5, %v4295_v13  ;;  %v4305_v17 = vsub.s32 6, %v4295_v13  ;;  %v4308_v18 = vsub.s32 0, %v4295_v13 }
  0x76   : > { %1251 = vperm.xlu0 %3700, %v4270_v16   ;;  %3565 = vmatprep.subr.mxu1 %v1595_v38  ;;  %v4312_v20 = vsub.s32 1, %v4295_v13  ;;  %v4316_v22 = vsub.s32 2, %v4295_v13  ;;  %v4319_v23 = vsub.s32 3, %v4295_v13  ;;  %v4322_v24 = vsub.s32 7, %v4295_v13 }
  0x77   : > { %1674 = vmatprep.subr.mxu0 %v1601_v30  ;;  %3597 = vmatpush1.msra.mxu1 %v1594_v39  ;;  %6762 = vst [vmem:[#allocation15_spill] sm:$0xff] %v4301_v15  ;;  %6763 = vst [vmem:[#allocation16_spill] sm:$0xff] %v4305_v17 }
  0x78   : > { %3699 = vset.pattern.permute.xlu1 %v4062_v35  ;;  %1675 = vmatpush1.msra.mxu0 %v1600_v32  ;;  %6764 = vst [vmem:[#allocation17_spill] sm:$0xff] %v4308_v18  ;;  %6765 = vst [vmem:[#allocation18_spill] sm:$0xff] %v4312_v20 }
  0x79   : > { %1239 = vperm.xlu1 %3699, %v4249_v2   ;;  %3566 = vmatprep.subr.mxu1 %v1593_v40  ;;  %v1631_v2 = vld [vmem:[#allocation5 + $0x148] sm:$0xff]  ;;  %6766 = vst [vmem:[#allocation19_spill] sm:$0xff] %v4316_v22  ;;  %6767 = vst [vmem:[#allocation20_spill] sm:$0xff] %v4319_v23 }
  0x7a   : > { %1676 = vmatprep.subr.mxu0 %v1599_v33  ;;  %3598 = vmatpush1.msra.mxu1 %v1592_v41  ;;  %6768 = vst [vmem:[#allocation21_spill] sm:$0xff] %v4322_v24 }
  0x7b   : > { %1677 = vmatpush1.msra.mxu0 %v1598_v34  ;;  %3567 = vmatprep.subr.mxu1 %v1591_v42 }
  0x7c   : > { %1678 = vmatprep.subr.mxu0 %v1597_v36  ;;  %3599 = vmatpush1.msra.mxu1 %v1590_v43  ;;  %v685_v36 = vrot.slane %v326_v25, %v4301_v15 }
  0x7d   : > { %3701 = vset.pattern.permute.xlu1 %v4061_v27  ;;  %1679 = vmatpush1.msra.mxu0 %v1596_v37  ;;  %v973_v37 = vrot.slane %v326_v25, %v4305_v17 }
  0x7e   : > { %963 = vperm.xlu1 %3701, %v4270_v16   ;;  %3568 = vmatprep.subr.mxu1 %v1653_v44  ;;  %v330_v16 = vld [vmem:[%s4229_s16 + $0x20] sm:$0xff] }
  0x7f   : > { %1680 = vmatprep.subr.mxu0 %v1595_v38  ;;  %3600 = vmatpush2.msra.mxu1 %v1652_v45  ;;  %v409_v19 = vrot.slane %v330_v16, %v4298_v14  ;;  %v717_v21 = vrot.slane %v330_v16, %v4301_v15  ;;  %v1005_v26 = vrot.slane %v330_v16, %v4305_v17 }
  0x80   : > { %1681 = vmatpush1.msra.mxu0 %v1594_v39  ;;  %3569 = vmatprep.subr.mxu1 %v1651_v46  ;;  %v405_v29 = vrot.slane %v330_v16, %v4308_v18  ;;  %v713_v30 = vrot.slane %v330_v16, %v4312_v20  ;;  %v1293_v32 = vrot.slane %v330_v16, %v4322_v24 }
  0x81   : > { %1682 = vmatprep.subr.mxu0 %v1593_v40  ;;  %3601 = vmatpush2.msra.mxu1 %v1650_v47  ;;  %v4327_v27 = vrot.slane %v409_v19, %v4308_v18  ;;  %v4330_v28 = vrot.slane %v717_v21, %v4312_v20  ;;  %v1001_v33 = vrot.slane %v330_v16, %v4316_v22 }
  0x82   : > { %3702 = vset.pattern.permute.xlu1 %v4062_v35  ;;  %1683 = vmatpush1.msra.mxu0 %v1592_v41  ;;  %v1289_v34 = vrot.slane %v330_v16, %v4319_v23  ;;  %v377_v35 = vrot.slane %v326_v25, %v4298_v14  ;;  %v1261_v38 = vrot.slane %v326_v25, %v4322_v24 }
  0x83   : > { %1247 = vperm.xlu1 %3702, %v4244_v1   ;;  %3570 = vmatprep.subr.mxu1 %v1649_v48  ;;  %v1632_v1 = vld [vmem:[#allocation5 + $0x150] sm:$0xff]  ;;  %6769 = vst [vmem:[#allocation22_spill] sm:$0xff] %v4327_v27  ;;  %6770 = vst [vmem:[#allocation23_spill] sm:$0xff] %v4330_v28  ;;  %v373_v39 = vrot.slane %v326_v25, %v4308_v18  ;;  %v681_v40 = vrot.slane %v326_v25, %v4312_v20 }
  0x84   : > { %1684 = vmatprep.subr.mxu0 %v1591_v42  ;;  %3602 = vmatpush2.msra.mxu1 %v1648_v49  ;;  %v969_v41 = vrot.slane %v326_v25, %v4316_v22  ;;  %v1257_v42 = vrot.slane %v326_v25, %v4319_v23 }
  0x85   : > { %1685 = vmatpush1.msra.mxu0 %v1590_v43  ;;  %3571 = vmatprep.subr.mxu1 %v1647_v50  ;;  %v385_v43 = vrot.slane %v327_v31, %v4298_v14 }
  0x86   : > { %1686 = vmatprep.subr.mxu0 %v1653_v44  ;;  %3603 = vmatpush2.msra.mxu1 %v1646_v51  ;;  %v4348_v44 = vrot.slane %v1005_v26, %v4316_v22 }
  0x87   : > { %1687 = vmatpush2.msra.mxu0 %v1652_v45  ;;  %3572 = vmatprep.subr.mxu1 %v1645_v52  ;;  %v4351_v45 = vrot.slane %v405_v29, %v4308_v18 }
  0x88   : > { %1688 = vmatprep.subr.mxu0 %v1651_v46  ;;  %3604 = vmatpush2.msra.mxu1 %v1644_v53  ;;  %6771 = vst [vmem:[#allocation24_spill] sm:$0xff] %v4348_v44  ;;  %v4354_v46 = vrot.slane %v713_v30, %v4312_v20 }
  0x89   : > { %1689 = vmatpush2.msra.mxu0 %v1650_v47  ;;  %3573 = vmatprep.subr.mxu1 %v1643_v54  ;;  %6772 = vst [vmem:[#allocation25_spill] sm:$0xff] %v4351_v45  ;;  %v693_v47 = vrot.slane %v327_v31, %v4301_v15 }
  0x8a   : > { %1690 = vmatprep.subr.mxu0 %v1649_v48  ;;  %3605 = vmatpush2.msra.mxu1 %v1642_v55  ;;  %6773 = vst [vmem:[#allocation26_spill] sm:$0xff] %v4354_v46  ;;  %v4358_v48 = vrot.slane %v1293_v32, %v4319_v23 }
  0x8b   : > { %1691 = vmatpush2.msra.mxu0 %v1648_v49  ;;  %3574 = vmatprep.subr.mxu1 %v1641_v56  ;;  %v4361_v49 = vrot.slane %v1001_v33, %v4316_v22 }
  0x8c   : > { %1692 = vmatprep.subr.mxu0 %v1647_v50  ;;  %3606 = vmatpush2.msra.mxu1 %v1640_v57  ;;  %6774 = vst [vmem:[#allocation27_spill] sm:$0xff] %v4358_v48  ;;  %v4364_v50 = vrot.slane %v1289_v34, %v4319_v23 }
  0x8d   : > { %1693 = vmatpush2.msra.mxu0 %v1646_v51  ;;  %3575 = vmatprep.subr.mxu1 %v1639_v58  ;;  %6775 = vst [vmem:[#allocation28_spill] sm:$0xff] %v4361_v49  ;;  %v4367_v51 = vrot.slane %v377_v35, %v4308_v18 }
  0x8e   : > { %1694 = vmatprep.subr.mxu0 %v1645_v52  ;;  %3607 = vmatpush2.msra.mxu1 %v1638_v59  ;;  %6776 = vst [vmem:[#allocation29_spill] sm:$0xff] %v4364_v50  ;;  %v331_v52 = vld [vmem:[%s4229_s16 + $0x28] sm:$0xff] }
  0x8f   : > { %1695 = vmatpush2.msra.mxu0 %v1644_v53  ;;  %3576 = vmatprep.subr.mxu1 %v1637_v60  ;;  %v4371_v53 = vrot.slane %v685_v36, %v4312_v20  ;;  %v1009_v16 = vrot.slane %v331_v52, %v4316_v22  ;;  %v1297_v19 = vrot.slane %v331_v52, %v4319_v23 }
  0x90   : > { %1696 = vmatprep.subr.mxu0 %v1643_v54  ;;  %3608 = vmatpush2.msra.mxu1 %v1636_v61  ;;  %v4374_v54 = vrot.slane %v973_v37, %v4316_v22 }
  0x91   : > { %1697 = vmatpush2.msra.mxu0 %v1642_v55  ;;  %3577 = vmatprep.subr.mxu1 %v1635_v62  ;;  %v4377_v55 = vrot.slane %v1261_v38, %v4319_v23 }
  0x92   : > { %1698 = vmatprep.subr.mxu0 %v1641_v56  ;;  %3609 = vmatpush2.msra.mxu1 %v1634_v63  ;;  %v4380_v56 = vrot.slane %v373_v39, %v4308_v18 }
  0x93   : > { %1699 = vmatpush2.msra.mxu0 %v1640_v57  ;;  %3578 = vmatprep.subr.mxu1 %v1633_v0  ;;  %v4383_v57 = vrot.slane %v681_v40, %v4312_v20  ;;  %v4455_v40 = vrot.slane %v1009_v16, %v4316_v22 }
  0x94   : > { %1700 = vmatprep.subr.mxu0 %v1639_v58  ;;  %3610 = vmatpush2.msra.mxu1 %v1632_v1  ;;  %v4386_v58 = vrot.slane %v969_v41, %v4316_v22  ;;  %v4458_v41 = vrot.slane %v1297_v19, %v4319_v23 }
  0x95   : > { %1701 = vmatpush2.msra.mxu0 %v1638_v59  ;;  %3579 = vmatprep.subr.mxu1 %v1631_v2  ;;  %v4389_v59 = vrot.slane %v1257_v42, %v4319_v23  ;;  %6788 = vst [vmem:[#allocation41_spill] sm:$0xff] %v4455_v40 }
  0x96   : > { %1702 = vmatprep.subr.mxu0 %v1637_v60  ;;  %3611 = vmatpush2.msra.mxu1 %v1630_v3  ;;  %v4392_v60 = vrot.slane %v385_v43, %v4308_v18  ;;  %6789 = vst [vmem:[#allocation42_spill] sm:$0xff] %v4458_v41 }
  0x97   : > { %1703 = vmatpush2.msra.mxu0 %v1636_v61  ;;  %3580 = vmatprep.subr.mxu1 %v1629_v4  ;;  %v4395_v61 = vrot.slane %v693_v47, %v4312_v20 }
  0x98   : > { %1704 = vmatprep.subr.mxu0 %v1635_v62  ;;  %3612 = vmatpush2.msra.mxu1 %v1628_v5  ;;  %6777 = vst [vmem:[#allocation30_spill] sm:$0xff] %v4392_v60  ;;  %v981_v62 = vrot.slane %v327_v31, %v4305_v17 }
  0x99   : > { %1705 = vmatpush2.msra.mxu0 %v1634_v63  ;;  %3581 = vmatprep.subr.mxu1 %v1627_v6  ;;  %6778 = vst [vmem:[#allocation31_spill] sm:$0xff] %v4395_v61  ;;  %v1269_v63 = vrot.slane %v327_v31, %v4322_v24 }
  0x9a   : > { %1706 = vmatprep.subr.mxu0 %v1633_v0  ;;  %3613 = vmatpush2.msra.mxu1 %v1626_v7  ;;  %v417_v0 = vrot.slane %v331_v52, %v4298_v14  ;;  %v4418_v25 = vrot.slane %v981_v62, %v4316_v22 }
  0x9b   : > { %1707 = vmatpush2.msra.mxu0 %v1632_v1  ;;  %3582 = vmatprep.subr.mxu1 %v1625_v8  ;;  %v4401_v1 = vld [vmem:[%s4229_s16 + $0x10] sm:$0xff]  ;;  %v4421_v26 = vrot.slane %v1269_v63, %v4319_v23  ;;  %v329_v63 = vld [vmem:[%s4229_s16 + $0x18] sm:$0xff] }
  0x9c   : > { %1708 = vmatprep.subr.mxu0 %v1631_v2  ;;  %3614 = vmatpush2.msra.mxu1 %v1624_v9  ;;  %v725_v2 = vrot.slane %v331_v52, %v4301_v15  ;;  %v393_v21 = vrot.slane %v4401_v1, %v4298_v14  ;;  %v4424_v29 = vrot.slane %v417_v0, %v4308_v18 }
  0x9d   : > { %1709 = vmatpush2.msra.mxu0 %v1630_v3  ;;  %3583 = vmatprep.subr.mxu1 %v1623_v10  ;;  %v1013_v3 = vrot.slane %v331_v52, %v4305_v17  ;;  %6779 = vst [vmem:[#allocation32_spill] sm:$0xff] %v4421_v26  ;;  %v701_v43 = vrot.slane %v4401_v1, %v4301_v15 }
  0x9e   : > { %1710 = vmatprep.subr.mxu0 %v1629_v4  ;;  %3615 = vmatpush2.msra.mxu1 %v1622_v11  ;;  %v1301_v4 = vrot.slane %v331_v52, %v4322_v24  ;;  %6780 = vst [vmem:[#allocation33_spill] sm:$0xff] %v4424_v29  ;;  %v4461_v42 = vrot.slane %v393_v21, %v4308_v18 }
  0x9f   : > { %1711 = vmatpush2.msra.mxu0 %v1628_v5  ;;  %v381_v5 = vrot.slane %v327_v31, %v4308_v18  ;;  %v4431_v32 = vrot.slane %v1013_v3, %v4316_v22  ;;  %v389_v62 = vrot.slane %v4401_v1, %v4308_v18  ;;  %v989_v3 = vrot.slane %v4401_v1, %v4305_v17 }
  0xa0   : > { %1712 = vmatprep.subr.mxu0 %v1627_v6  ;;  %v332_v6 = vld [vmem:[%s4229_s16 + $0x30] sm:$0xff]  ;;  %v4434_v33 = vrot.slane %v1301_v4, %v4319_v23  ;;  %6790 = vst [vmem:[#allocation43_spill] sm:$0xff] %v4461_v42  ;;  %v1273_v19 = vrot.slane %v4401_v1, %v4319_v23  ;;  %v401_v12 = vrot.slane %v329_v63, %v4298_v14 }
  0xa1   : > { %1713 = vmatpush2.msra.mxu0 %v1626_v7  ;;  %v689_v7 = vrot.slane %v327_v31, %v4312_v20  ;;  %v425_v30 = vrot.slane %v332_v6, %v4298_v14  ;;  %v4437_v34 = vrot.slane %v381_v5, %v4308_v18  ;;  %v1021_v4 = vrot.slane %v332_v6, %v4305_v17 }
  0xa2   : > { %1714 = vmatprep.subr.mxu0 %v1625_v8  ;;  %v977_v8 = vrot.slane %v327_v31, %v4316_v22  ;;  %6782 = vst [vmem:[#allocation35_spill] sm:$0xff] %v4434_v33  ;;  %v697_v5 = vrot.slane %v4401_v1, %v4312_v20  ;;  %v729_v16 = vrot.slane %v332_v6, %v4312_v20 }
  0xa3   : > { %1715 = vmatpush2.msra.mxu0 %v1624_v9  ;;  %v1265_v9 = vrot.slane %v327_v31, %v4319_v23  ;;  %v4428_v31 = vrot.slane %v725_v2, %v4312_v20  ;;  %6783 = vst [vmem:[#allocation36_spill] sm:$0xff] %v4437_v34  ;;  %v4440_v35 = vrot.slane %v689_v7, %v4312_v20 }
  0xa4   : > { %1716 = vmatprep.subr.mxu0 %v1623_v10  ;;  %v413_v10 = vrot.slane %v331_v52, %v4308_v18  ;;  %v4443_v36 = vrot.slane %v977_v8, %v4316_v22  ;;  %v4466_v47 = vrot.slane %v425_v30, %v4308_v18  ;;  %v421_v7 = vrot.slane %v332_v6, %v4308_v18  ;;  %v333_v8 = vld [vmem:[%s4229_s16 + $0x38] sm:$0xff] }
  0xa5   : > { %1717 = vmatpush2.msra.mxu0 %v1622_v11  ;;  %v721_v11 = vrot.slane %v331_v52, %v4312_v20  ;;  %6781 = vst [vmem:[#allocation34_spill] sm:$0xff] %v4428_v31  ;;  %6784 = vst [vmem:[#allocation37_spill] sm:$0xff] %v4440_v35  ;;  %v4446_v37 = vrot.slane %v1265_v9, %v4319_v23  ;;  %v733_v52 = vrot.slane %v332_v6, %v4301_v15 }
  0xa6   : > { %v4449_v38 = vrot.slane %v413_v10, %v4308_v18  ;;  %6791 = vst [vmem:[#allocation44_spill] sm:$0xff] %v4466_v47  ;;  %v1277_v9 = vrot.slane %v4401_v1, %v4322_v24  ;;  %v1309_v10 = vrot.slane %v332_v6, %v4322_v24  ;;  %v1017_v21 = vrot.slane %v332_v6, %v4316_v22 }
  0xa7   : > { %6785 = vst [vmem:[#allocation38_spill] sm:$0xff] %v4446_v37  ;;  %v4452_v39 = vrot.slane %v721_v11, %v4312_v20  ;;  %v985_v11 = vrot.slane %v4401_v1, %v4316_v22  ;;  %v1305_v30 = vrot.slane %v332_v6, %v4319_v23  ;;  %v4495_v13 = vrot.slane %v701_v43, %v4312_v20 }
  0xa8   : > { %6786 = vst [vmem:[#allocation39_spill] sm:$0xff] %v4449_v38  ;;  %v4498_v17 = vrot.slane %v733_v52, %v4312_v20  ;;  %v4501_v24 = vrot.slane %v389_v62, %v4308_v18  ;;  %v433_v15 = vrot.slane %v333_v8, %v4298_v14  ;;  %v4509_v41 = vrot.slane %v989_v3, %v4316_v22 }
  0xa9   : > { %6787 = vst [vmem:[#allocation40_spill] sm:$0xff] %v4452_v39  ;;  %6794 = vst [vmem:[#allocation47_spill] sm:$0xff] %v4495_v13  ;;  %v4512_v6 = vrot.slane %v1021_v4, %v4316_v22  ;;  %v4515_v43 = vrot.slane %v697_v5, %v4312_v20  ;;  %v4518_v52 = vrot.slane %v421_v7, %v4308_v18 }
  0xaa   : > { %6795 = vst [vmem:[#allocation48_spill] sm:$0xff] %v4498_v17  ;;  %6796 = vst [vmem:[#allocation49_spill] sm:$0xff] %v4501_v24  ;;  %v4521_v62 = vrot.slane %v1277_v9, %v4319_v23  ;;  %v4524_v14 = vrot.slane %v1309_v10, %v4319_v23  ;;  %v4527_v63 = vrot.slane %v985_v11, %v4316_v22 }
  0xab   : > { %6799 = vst [vmem:[#allocation52_spill] sm:$0xff] %v4509_v41  ;;  %6800 = vst [vmem:[#allocation53_spill] sm:$0xff] %v4512_v6  ;;  %v4530_v3 = vrot.slane %v729_v16, %v4312_v20  ;;  %v4533_v4 = vrot.slane %v1273_v19, %v4319_v23  ;;  %v4536_v5 = vrot.slane %v1017_v21, %v4316_v22 }
  0xac   : > { %6801 = vst [vmem:[#allocation54_spill] sm:$0xff] %v4515_v43  ;;  %6802 = vst [vmem:[#allocation55_spill] sm:$0xff] %v4518_v52  ;;  %v4539_v7 = vrot.slane %v1305_v30, %v4319_v23  ;;  %v4542_v8 = vrot.slane %v401_v12, %v4308_v18  ;;  %v4553_v16 = vrot.slane %v433_v15, %v4308_v18 }
  0xad   : > { %6803 = vst [vmem:[#allocation56_spill] sm:$0xff] %v4521_v62  ;;  %6804 = vst [vmem:[#allocation57_spill] sm:$0xff] %v4524_v14 }
  0xae   : > { %6805 = vst [vmem:[#allocation58_spill] sm:$0xff] %v4527_v63  ;;  %6806 = vst [vmem:[#allocation59_spill] sm:$0xff] %v4530_v3 }
  0xaf   : > { %6807 = vst [vmem:[#allocation60_spill] sm:$0xff] %v4533_v4  ;;  %6808 = vst [vmem:[#allocation61_spill] sm:$0xff] %v4536_v5 }
  0xb0   : > { %6809 = vst [vmem:[#allocation62_spill] sm:$0xff] %v4539_v7  ;;  %6810 = vst [vmem:[#allocation63_spill] sm:$0xff] %v4542_v8 }
  0xb1   : > { %6811 = vst [vmem:[#allocation64_spill] sm:$0xff] %v4553_v16 }
  0xce   : > { %v4472_v0 = vpop.permute.xlu1 %354  ;;  %v4474_v2 = vpop.permute.xlu0 %344 }
  0xcf   : > { %6792 = vst [vmem:[#allocation45_spill] sm:$0xff] %v4472_v0  ;;  %6793 = vst [vmem:[#allocation46_spill] sm:$0xff] %v4474_v2  ;;  %v515_v9 = vmul.f32 %v4367_v51, %v4474_v2  ;;  %v514_v10 = vmul.f32 %v4380_v56, %v4474_v2  ;;  %v4550_v11 = vmul.f32 %v4367_v51, %v4472_v0 }
  0xd0   : > { %v4559_v21 = vmul.f32 %v4327_v27, %v4472_v0  ;;  %v4563_v12 = vmul.f32 %v4380_v56, %v4472_v0  ;;  %v523_v30 = vmul.f32 %v4392_v60, %v4474_v2  ;;  %v555_v23 = vmul.f32 %v4424_v29, %v4474_v2 }
  0xd1   : > { %v4573_v15 = vmul.f32 %v4351_v45, %v4472_v0  ;;  %v522_v18 = vmul.f32 %v4437_v34, %v4474_v2  ;;  %v554_v16 = vmul.f32 %v4449_v38, %v4474_v2  ;;  %v4581_v20 = vmul.f32 %v4392_v60, %v4472_v0 }
  0xd2   : > { %v4504_v47 = vpop.permute.xlu1 %580  ;;  %v4506_v1 = vpop.permute.xlu0 %349  ;;  %v4585_v8 = vmul.f32 %v4424_v29, %v4472_v0  ;;  %v4589_v7 = vmul.f32 %v4437_v34, %v4472_v0  ;;  %v4593_v5 = vmul.f32 %v4449_v38, %v4472_v0  ;;  %v4597_v3 = vmul.f32 %v4461_v42, %v4474_v2 }
  0xd3   : > { %6797 = vst [vmem:[#allocation50_spill] sm:$0xff] %v4504_v47  ;;  %6798 = vst [vmem:[#allocation51_spill] sm:$0xff] %v4506_v1  ;;  %v549_v52 = vmul.f32 %v4327_v27, %v4506_v1  ;;  %v548_v4 = vmul.f32 %v4351_v45, %v4506_v1  ;;  %v599_v63 = vadd.f32 %v4504_v47, %v515_v9 }
  0xd4   : > { %6814 = vst [vmem:[#allocation67_spill] sm:$0xff] %v4589_v7  ;;  %6815 = vst [vmem:[#allocation68_spill] sm:$0xff] %v4593_v5  ;;  %v598_v43 = vadd.f32 %v4504_v47, %v514_v10  ;;  %v517_v24 = vmul.f32 %v4367_v51, %v4506_v1  ;;  %v516_v0 = vmul.f32 %v4380_v56, %v4506_v1 }
  0xd5   : > { %6816 = vst [vmem:[#allocation69_spill] sm:$0xff] %v4597_v3  ;;  %v607_v14 = vadd.f32 %v4504_v47, %v523_v30  ;;  %v639_v42 = vadd.f32 %v4504_v47, %v555_v23  ;;  %v525_v10 = vmul.f32 %v4392_v60, %v4506_v1  ;;  %v557_v62 = vmul.f32 %v4424_v29, %v4506_v1 }
  0xd6   : > { %v4555_v19 = vpop.permute.xlu0 %585  ;;  %v606_v13 = vadd.f32 %v4504_v47, %v522_v18  ;;  %v638_v5 = vadd.f32 %v4504_v47, %v554_v16  ;;  %v524_v29 = vmul.f32 %v4437_v34, %v4506_v1  ;;  %v556_v2 = vmul.f32 %v4449_v38, %v4506_v1 }
  0xd7   : > { %6812 = vst [vmem:[#allocation65_spill] sm:$0xff] %v4555_v19  ;;  %v4569_v22 = vpop.permute.xlu1 %663  ;;  %v633_v7 = vadd.f32 %v4555_v19, %v549_v52  ;;  %v632_v37 = vadd.f32 %v4555_v19, %v548_v4  ;;  %v601_v18 = vadd.f32 %v4555_v19, %v517_v24  ;;  %v600_v16 = vadd.f32 %v4555_v19, %v516_v0 }
  0xd8   : > { %6813 = vst [vmem:[#allocation66_spill] sm:$0xff] %v4569_v22  ;;  %v823_v17 = vmul.f32 %v4371_v53, %v4569_v22  ;;  %v822_v9 = vmul.f32 %v4383_v57, %v4569_v22  ;;  %v831_v30 = vmul.f32 %v4395_v61, %v4569_v22  ;;  %v863_v23 = vmul.f32 %v4428_v31, %v4569_v22 }
  0xd9   : > { %v830_v3 = vmul.f32 %v4440_v35, %v4569_v22  ;;  %v862_v60 = vmul.f32 %v4452_v39, %v4569_v22  ;;  %v609_v22 = vadd.f32 %v4555_v19, %v525_v10  ;;  %v641_v40 = vadd.f32 %v4555_v19, %v557_v62 }
  0xda   : > { %v887_v33 = vadd.f32 %v823_v17, %v599_v63  ;;  %v886_v26 = vadd.f32 %v822_v9, %v598_v43  ;;  %v4651_v4 = vadd.f32 %v831_v30, %v607_v14  ;;  %v4653_v24 = vadd.f32 %v863_v23, %v639_v42 }
  0xdb   : > { %v4611_v6 = vpop.permute.xlu0 %667  ;;  %v4655_v0 = vadd.f32 %v830_v3, %v606_v13  ;;  %v4657_v17 = vadd.f32 %v862_v60, %v638_v5  ;;  %v608_v43 = vadd.f32 %v4555_v19, %v524_v29  ;;  %v640_v62 = vadd.f32 %v4555_v19, %v556_v2 }
  0xdc   : > { %6817 = vst [vmem:[#allocation70_spill] sm:$0xff] %v4611_v6  ;;  %v4621_v41 = vpop.permute.xlu1 %359  ;;  %v857_v1 = vmul.f32 %v4330_v28, %v4611_v6  ;;  %v856_v52 = vmul.f32 %v4354_v46, %v4611_v6  ;;  %v825_v63 = vmul.f32 %v4371_v53, %v4611_v6  ;;  %v824_v9 = vmul.f32 %v4383_v57, %v4611_v6 }
  0xdd   : > { %6818 = vst [vmem:[#allocation71_spill] sm:$0xff] %v4621_v41  ;;  %v4667_v14 = vmul.f32 %v4367_v51, %v4621_v41  ;;  %v4671_v13 = vmul.f32 %v4327_v27, %v4621_v41  ;;  %v4675_v60 = vmul.f32 %v4380_v56, %v4621_v41  ;;  %v4679_v29 = vmul.f32 %v4351_v45, %v4621_v41 }
  0xde   : > { %v833_v42 = vmul.f32 %v4395_v61, %v4611_v6  ;;  %v865_v2 = vmul.f32 %v4428_v31, %v4611_v6  ;;  %v921_v3 = vadd.f32 %v857_v1, %v633_v7  ;;  %v920_v5 = vadd.f32 %v856_v52, %v632_v37 }
  0xdf   : > { %v4641_v47 = vpop.permute.xlu0 %671  ;;  %v832_v10 = vmul.f32 %v4440_v35, %v4611_v6  ;;  %v864_v56 = vmul.f32 %v4452_v39, %v4611_v6  ;;  %v889_v6 = vadd.f32 %v825_v63, %v601_v18  ;;  %v888_v38 = vadd.f32 %v824_v9, %v600_v16 }
  0xe0   : > { %6819 = vst [vmem:[#allocation72_spill] sm:$0xff] %v4641_v47  ;;  %v4645_v34 = vpop.permute.xlu1 %590  ;;  %v827_v23 = vmul.f32 %v4371_v53, %v4641_v47  ;;  %v859_v45 = vmul.f32 %v4330_v28, %v4641_v47  ;;  %v826_v27 = vmul.f32 %v4383_v57, %v4641_v47  ;;  %v858_v37 = vmul.f32 %v4354_v46, %v4641_v47 }
  0xe1   : > { %v603_v1 = vadd.f32 %v4645_v34, %v4550_v11  ;;  %v635_v7 = vadd.f32 %v4645_v34, %v4559_v21  ;;  %v602_v52 = vadd.f32 %v4645_v34, %v4563_v12  ;;  %v634_v19 = vadd.f32 %v4645_v34, %v4573_v15 }
  0xe2   : > { %v4709_v41 = vadd.f32 %v833_v42, %v609_v22  ;;  %v4711_v39 = vadd.f32 %v865_v2, %v641_v40  ;;  %v4719_v46 = vadd.f32 %v832_v10, %v608_v43  ;;  %v4721_v12 = vadd.f32 %v864_v56, %v640_v62 }
  0xe3   : > { %v891_v63 = vadd.f32 %v827_v23, %v603_v1  ;;  %v923_v9 = vadd.f32 %v859_v45, %v635_v7  ;;  %v890_v43 = vadd.f32 %v826_v27, %v602_v52  ;;  %v922_v42 = vadd.f32 %v858_v37, %v634_v19 }
  0xe4   : > { %v4685_v51 = vpop.permute.xlu0 %955  ;;  %6822 = vst [vmem:[#allocation75_spill] sm:$0xff] %v4719_v46  ;;  %6823 = vst [vmem:[#allocation76_spill] sm:$0xff] %v4721_v12  ;;  %v4739_v10 = vadd.f32 %v4645_v34, %v4581_v20  ;;  %v4743_v56 = vmul.f32 %v4395_v61, %v4641_v47  ;;  %v4747_v27 = vadd.f32 %v4645_v34, %v4585_v8 }
  0xe5   : > { %6820 = vst [vmem:[#allocation73_spill] sm:$0xff] %v4685_v51  ;;  %v4691_v30 = vpop.permute.xlu1 %951  ;;  %v1145_v11 = vmul.f32 %v4348_v44, %v4685_v51  ;;  %v1144_v21 = vmul.f32 %v4361_v49, %v4685_v51  ;;  %v1113_v40 = vmul.f32 %v4374_v54, %v4685_v51  ;;  %v1112_v18 = vmul.f32 %v4386_v58, %v4685_v51 }
  0xe6   : > { %6821 = vst [vmem:[#allocation74_spill] sm:$0xff] %v4691_v30  ;;  %v1111_v15 = vmul.f32 %v4374_v54, %v4691_v30  ;;  %v1110_v22 = vmul.f32 %v4386_v58, %v4691_v30  ;;  %v1119_v62 = vmul.f32 %v4418_v25, %v4691_v30  ;;  %v1151_v2 = vmul.f32 %v4431_v32, %v4691_v30 }
  0xe7   : > { %v1209_v12 = vadd.f32 %v1145_v11, %v921_v3  ;;  %v1208_v46 = vadd.f32 %v1144_v21, %v920_v5  ;;  %v4751_v45 = vmul.f32 %v4428_v31, %v4641_v47  ;;  %v1177_v20 = vadd.f32 %v1113_v40, %v889_v6 }
  0xe8   : > { %v4713_v35 = vpop.permute.xlu0 %959  ;;  %v1175_v23 = vadd.f32 %v1111_v15, %v887_v33  ;;  %v1174_v37 = vadd.f32 %v1110_v22, %v886_v26  ;;  %v1176_v1 = vadd.f32 %v1112_v18, %v888_v38  ;;  %v4770_v38 = vadd.f32 %v1119_v62, %v4651_v4  ;;  %v6827_v18 = vld [vmem:[#allocation41_spill] sm:$0xff] }
  0xe9   : > { %v1115_v8 = vmul.f32 %v4374_v54, %v4713_v35  ;;  %v1147_v5 = vmul.f32 %v4348_v44, %v4713_v35  ;;  %v1114_v33 = vmul.f32 %v4386_v58, %v4713_v35  ;;  %v1146_v26 = vmul.f32 %v4361_v49, %v4713_v35 }
  0xea   : > { %v4731_v16 = vpop.permute.xlu1 %595  ;;  %v4773_v6 = vadd.f32 %v1151_v2, %v4653_v24  ;;  %v1118_v40 = vmul.f32 %v4443_v36, %v4691_v30  ;;  %v1150_v31 = vmul.f32 %v6827_v18, %v4691_v30  ;;  %v1121_v4 = vmul.f32 %v4418_v25, %v4685_v51 }
  0xeb   : > { %6824 = vst [vmem:[#allocation77_spill] sm:$0xff] %v4731_v16  ;;  %v1153_v24 = vmul.f32 %v4431_v32, %v4685_v51  ;;  %v4791_v62 = vadd.f32 %v1115_v8, %v891_v63  ;;  %v4793_v2 = vadd.f32 %v1147_v5, %v923_v9  ;;  %v605_v30 = vadd.f32 %v4731_v16, %v4667_v14 }
  0xec   : > { %v637_v61 = vadd.f32 %v4731_v16, %v4671_v13  ;;  %v604_v63 = vadd.f32 %v4731_v16, %v4675_v60  ;;  %v636_v9 = vadd.f32 %v4731_v16, %v4679_v29  ;;  %v4825_v29 = vadd.f32 %v1150_v31, %v4657_v17  ;;  %v6835_v31 = vld [vmem:[#allocation26_spill] sm:$0xff] }
  0xed   : > { %v4753_v19 = vpop.permute.xlu0 %1243 }
  0xee   : > { %6825 = vst [vmem:[#allocation78_spill] sm:$0xff] %v4753_v19  ;;  %v1433_v7 = vmul.f32 %v4358_v48, %v4753_v19  ;;  %v1432_v3 = vmul.f32 %v4364_v50, %v4753_v19  ;;  %v1401_v15 = vmul.f32 %v4377_v55, %v4753_v19  ;;  %v1400_v22 = vmul.f32 %v4389_v59, %v4753_v19 }
  0xef   : > { %v4763_v52 = vpop.permute.xlu1 %675 }
  0xf0   : > { %6826 = vst [vmem:[#allocation79_spill] sm:$0xff] %v4763_v52  ;;  %v1497_v11 = vadd.f32 %v1433_v7, %v1209_v12  ;;  %v1496_v21 = vadd.f32 %v1432_v3, %v1208_v46  ;;  %v4795_v7 = vadd.f32 %v1114_v33, %v890_v43  ;;  %v4797_v3 = vadd.f32 %v1146_v26, %v922_v42  ;;  %v6831_v33 = vld [vmem:[#allocation32_spill] sm:$0xff] }
  0xf1   : > { %v829_v43 = vmul.f32 %v4371_v53, %v4763_v52  ;;  %v861_v42 = vmul.f32 %v4330_v28, %v4763_v52  ;;  %v828_v60 = vmul.f32 %v4383_v57, %v4763_v52  ;;  %v4832_v53 = vmul.f32 %v6831_v33, %v4753_v19 }
  0xf2   : > { %v4787_v12 = vmax.f32 %v1497_v11, 0.0  ;;  %v4789_v46 = vmax.f32 %v1496_v21, 0.0  ;;  %v1465_v11 = vadd.f32 %v1401_v15, %v1177_v20  ;;  %v1464_v21 = vadd.f32 %v1400_v22, %v1176_v1  ;;  %v4837_v15 = vpop.permute.xlu0 %1251 }
  0xf3   : > { %v4822_v20 = vadd.f32 %v1118_v40, %v4655_v0  ;;  %v4828_v1 = vadd.f32 %v1121_v4, %v4709_v41  ;;  %v4835_v26 = vadd.f32 %v1153_v24, %v4711_v39  ;;  %6832 = vst [vmem:[#allocation32_spill] sm:$0xff] %v4837_v15  ;;  %v860_v17 = vmul.f32 %v6835_v31, %v4763_v52  ;;  %v6836_v41 = vld [vmem:[#allocation35_spill] sm:$0xff] }
  0xf4   : > { %6828 = vst [vmem:[#allocation41_spill] sm:$0xff] %v4787_v12  ;;  %6829 = vst [vmem:[#allocation80_spill] sm:$0xff] %v4789_v46  ;;  %v4803_v47 = vpop.permute.xlu1 %1239  ;;  %1820 = vmatprep.mubr.f32.mxu1 %v4787_v12  ;;  %v4839_v57 = vmax.f32 %v1465_v11, 0.0  ;;  %v4841_v0 = vmax.f32 %v1464_v21, 0.0  ;;  %v893_v39 = vadd.f32 %v829_v43, %v605_v30  ;;  %v925_v4 = vadd.f32 %v861_v42, %v637_v61 }
  0xf5   : > { %6830 = vst [vmem:[#allocation81_spill] sm:$0xff] %v4803_v47  ;;  %1821 = vmatmul.mubr.f32.vlgmr.msra.gmra.mxu1 %v4789_v46  ;;  %v1399_v14 = vmul.f32 %v4377_v55, %v4803_v47  ;;  %v1398_v13 = vmul.f32 %v4389_v59, %v4803_v47  ;;  %v892_v21 = vadd.f32 %v828_v60, %v604_v63 }
  0xf6   : > { %6833 = vst [vmem:[#allocation82_spill] sm:$0xff] %v4839_v57  ;;  %6834 = vst [vmem:[#allocation83_spill] sm:$0xff] %v4841_v0  ;;  %v1404_v61 = vmul.f32 %v4389_v59, %v4837_v15  ;;  %v2287_v42 = vmul.f32 %v4839_v57, %v4839_v57  ;;  %v2286_v60 = vmul.f32 %v4841_v0, %v4841_v0 }
  0xf7   : > { %v1463_v8 = vadd.f32 %v1399_v14, %v1175_v23  ;;  %v1462_v5 = vadd.f32 %v1398_v13, %v1174_v37  ;;  %v4847_v23 = vmul.f32 %v6836_v41, %v4753_v19  ;;  %v1405_v13 = vmul.f32 %v4377_v55, %v4837_v15 }
  0xf8   : > { %v1436_v31 = vmul.f32 %v4364_v50, %v4837_v15 }
  0xf9   : > { %v4849_v37 = vpop.permute.xlu1 %963  ;;  %v4851_v22 = vmax.f32 %v1463_v8, 0.0  ;;  %v4853_v40 = vmax.f32 %v1462_v5, 0.0  ;;  %v1437_v8 = vmul.f32 %v4358_v48, %v4837_v15  ;;  %v924_v5 = vadd.f32 %v860_v17, %v636_v9 }
  0xfa   : > { %6837 = vst [vmem:[#allocation35_spill] sm:$0xff] %v4849_v37  ;;  %v1117_v24 = vmul.f32 %v4374_v54, %v4849_v37  ;;  %v1149_v11 = vmul.f32 %v4348_v44, %v4849_v37  ;;  %v1116_v14 = vmul.f32 %v4386_v58, %v4849_v37  ;;  %v4870_v54 = vmul.f32 %v4443_v36, %v4685_v51 }
  0xfb   : > { %6838 = vst [vmem:[#allocation84_spill] sm:$0xff] %v4851_v22  ;;  %6839 = vst [vmem:[#allocation85_spill] sm:$0xff] %v4853_v40  ;;  %1718 = vmatprep.mubr.f32.mxu0 %v4851_v22  ;;  %v1148_v43 = vmul.f32 %v4361_v49, %v4849_v37 }
  0xfc   : > { %1719 = vmatmul.mubr.f32.vlgmr.msra.gmra.mxu0 %v4853_v40  ;;  %v1181_v30 = vadd.f32 %v1117_v24, %v893_v39  ;;  %v1213_v63 = vadd.f32 %v1149_v11, %v925_v4  ;;  %v1180_v58 = vadd.f32 %v1116_v14, %v892_v21  ;;  %v2285_v39 = vmul.f32 %v4851_v22, %v4851_v22  ;;  %v6840_v21 = vld [vmem:[#allocation38_spill] sm:$0xff] }
  0xfd   : > { %1724 = vmatprep.mubr.f32.mxu0 %v4839_v57  ;;  %v1407_v24 = vmul.f32 %v6831_v33, %v4803_v47  ;;  %v1439_v11 = vmul.f32 %v6836_v41, %v4803_v47  ;;  %v1406_v14 = vmul.f32 %v6840_v21, %v4803_v47  ;;  %v1212_v46 = vadd.f32 %v1148_v43, %v924_v5 }
  0xfe   : > { %v4884_v4 = vpop.permute.xlu1 %1247  ;;  %v1469_v28 = vadd.f32 %v1405_v13, %v1181_v30  ;;  %v1501_v22 = vadd.f32 %v1437_v8, %v1213_v63  ;;  %v1468_v57 = vadd.f32 %v1404_v61, %v1180_v58  ;;  %v6841_v13 = vld [vmem:[#allocation42_spill] sm:$0xff] }
  0xff   : > { %v1403_v9 = vmul.f32 %v4377_v55, %v4884_v4  ;;  %v1435_v17 = vmul.f32 %v4358_v48, %v4884_v4  ;;  %v1402_v49 = vmul.f32 %v4389_v59, %v4884_v4  ;;  %v1434_v44 = vmul.f32 %v4364_v50, %v4884_v4 }
 0x100   : > { %1725 = vmatmul.mubr.f32.gmra.mxu0 %v4841_v0  ;;  %v2284_v59 = vmul.f32 %v4853_v40, %v4853_v40  ;;  %v1471_v16 = vadd.f32 %v1407_v24, %v4770_v38  ;;  %v1503_v50 = vadd.f32 %v1439_v11, %v4773_v6  ;;  %v1438_v8 = vmul.f32 %v6841_v13, %v4803_v47 }
 0x101   : > { %v1467_v15 = vadd.f32 %v1403_v9, %v4791_v62  ;;  %v1499_v37 = vadd.f32 %v1435_v17, %v4793_v2  ;;  %v1466_v55 = vadd.f32 %v1402_v49, %v4795_v7  ;;  %v1498_v48 = vadd.f32 %v1434_v44, %v4797_v3 }
 0x102   : > { %v2357_v49 = vadd.f32 %v2287_v42, %v2285_v39  ;;  %v4919_v44 = vmax.f32 %v1469_v28, 0.0  ;;  %v1500_v7 = vadd.f32 %v1436_v31, %v1212_v46  ;;  %v1470_v3 = vadd.f32 %v1406_v14, %v4822_v20  ;;  %v6855_v39 = vld [vmem:[#allocation76_spill] sm:$0xff] }
 0x103   : > { %v4911_v61 = vmax.f32 %v1467_v15, 0.0  ;;  %v4913_v30 = vmax.f32 %v1499_v37, 0.0  ;;  %v4915_v62 = vmax.f32 %v1466_v55, 0.0  ;;  %v4917_v2 = vmax.f32 %v1498_v48, 0.0 }
 0x104   : > { %6846 = vst [vmem:[#allocation88_spill] sm:$0xff] %v4919_v44  ;;  %v4928_v15 = vmax.f32 %v1501_v22, 0.0  ;;  %v4930_v48 = vmax.f32 %v1468_v57, 0.0  ;;  %v1502_v28 = vadd.f32 %v1438_v8, %v4825_v29  ;;  %v1473_v46 = vadd.f32 %v4832_v53, %v4828_v1 }
 0x105   : > { %6842 = vst [vmem:[#allocation38_spill] sm:$0xff] %v4911_v61  ;;  %6843 = vst [vmem:[#allocation42_spill] sm:$0xff] %v4913_v30  ;;  %1730 = vmatprep.mubr.f32.mxu0 %v4911_v61  ;;  %v2289_v38 = vmul.f32 %v4911_v61, %v4911_v61  ;;  %1826 = vmatprep.mubr.f32.mxu1 %v4913_v30  ;;  %v2288_v6 = vmul.f32 %v4915_v62, %v4915_v62  ;;  %v4941_v57 = vmax.f32 %v1471_v16, 0.0 }
 0x106   : > { %6844 = vst [vmem:[#allocation86_spill] sm:$0xff] %v4915_v62  ;;  %6845 = vst [vmem:[#allocation87_spill] sm:$0xff] %v4917_v2  ;;  %1731 = vmatmul.mubr.f32.gmra.mxu0 %v4915_v62  ;;  %1827 = vmatmul.mubr.f32.gmra.mxu1 %v4917_v2  ;;  %v1408_v20 = vmul.f32 %v6840_v21, %v4753_v19  ;;  %v2348_v31 = vadd.f32 %v2286_v60, %v2284_v59  ;;  %v4947_v63 = vmax.f32 %v1500_v7, 0.0  ;;  %v6854_v60 = vld [vmem:[#allocation75_spill] sm:$0xff] }
 0x107   : > { %6847 = vst [vmem:[#allocation89_spill] sm:$0xff] %v4928_v15  ;;  %6848 = vst [vmem:[#allocation90_spill] sm:$0xff] %v4930_v48  ;;  %v2358_v37 = vadd.f32 %v2357_v49, %v2289_v38  ;;  %1736 = vmatprep.mubr.f32.mxu0 %v4919_v44  ;;  %1832 = vmatprep.mubr.f32.mxu1 %v4928_v15  ;;  %v1505_v22 = vadd.f32 %v4847_v23, %v4835_v26  ;;  %v4955_v16 = vmax.f32 %v1503_v50, 0.0 }
 0x108   : > { %6849 = vst [vmem:[#allocation91_spill] sm:$0xff] %v4941_v57  ;;  %v2291_v29 = vmul.f32 %v4919_v44, %v4919_v44  ;;  %6850 = vst [vmem:[#allocation92_spill] sm:$0xff] %v4947_v63  ;;  %v1152_v1 = vmul.f32 %v6827_v18, %v4685_v51  ;;  %v1440_v53 = vmul.f32 %v6841_v13, %v4753_v19  ;;  %v4957_v42 = vmax.f32 %v1470_v3, 0.0  ;;  %v6858_v3 = vld [vmem:[#allocation67_spill] sm:$0xff] }
 0x109   : > { %v2349_v58 = vadd.f32 %v2348_v31, %v2288_v6  ;;  %v2290_v43 = vmul.f32 %v4930_v48, %v4930_v48  ;;  %6851 = vst [vmem:[#allocation93_spill] sm:$0xff] %v4955_v16  ;;  %v4961_v23 = vmax.f32 %v1502_v28, 0.0  ;;  %v1184_v5 = vadd.f32 %v4870_v54, %v6854_v60  ;;  %v6859_v6 = vld [vmem:[#allocation46_spill] sm:$0xff]  ;;  %v6862_v31 = vld [vmem:[#allocation37_spill] sm:$0xff]  ;;  %v6874_v44 = vld [vmem:[#allocation31_spill] sm:$0xff] }
 0x10a   : > { %6852 = vst [vmem:[#allocation94_spill] sm:$0xff] %v4957_v42  ;;  %v2359_v26 = vadd.f32 %v2358_v37, %v2291_v29  ;;  %1737 = vmatmul.mubr.f32.gmra.mxu0 %v4930_v48  ;;  %1833 = vmatmul.mubr.f32.gmra.mxu1 %v4947_v63  ;;  %v1216_v24 = vadd.f32 %v1152_v1, %v6855_v39  ;;  %v4968_v50 = vmax.f32 %v1473_v46, 0.0  ;;  %v4980_v49 = vmax.f32 %v1505_v22, 0.0  ;;  %v6863_v22 = vld [vmem:[#allocation69_spill] sm:$0xff]  ;;  %v6864_v29 = vld [vmem:[#allocation50_spill] sm:$0xff] }
 0x10b   : > { %6853 = vst [vmem:[#allocation95_spill] sm:$0xff] %v4961_v23  ;;  %1742 = vmatprep.mubr.f32.mxu0 %v4941_v57  ;;  %1838 = vmatprep.mubr.f32.mxu1 %v4955_v16  ;;  %v899_v11 = vadd.f32 %v4743_v56, %v4739_v10  ;;  %v1123_v14 = vmul.f32 %v4418_v25, %v4713_v35 }
 0x10c   : > { %6856 = vst [vmem:[#allocation75_spill] sm:$0xff] %v4968_v50  ;;  %v1411_v9 = vmul.f32 %v6831_v33, %v4884_v4  ;;  %v1472_v17 = vadd.f32 %v1408_v20, %v1184_v5  ;;  %v1504_v55 = vadd.f32 %v1440_v53, %v1216_v24  ;;  %v931_v54 = vadd.f32 %v4751_v45, %v4747_v27  ;;  %v6860_v27 = vld [vmem:[#allocation44_spill] sm:$0xff] }
 0x10d   : > { %v1155_v59 = vmul.f32 %v4431_v32, %v4713_v35  ;;  %v2350_v8 = vadd.f32 %v2349_v58, %v2290_v43  ;;  %6857 = vst [vmem:[#allocation76_spill] sm:$0xff] %v4980_v49  ;;  %v1187_v7 = vadd.f32 %v1123_v14, %v899_v11  ;;  %v1443_v10 = vmul.f32 %v6836_v41, %v4884_v4  ;;  %v6861_v20 = vld [vmem:[#allocation72_spill] sm:$0xff] }
 0x10e   : > { %1743 = vmatmul.mubr.f32.gmra.mxu0 %v4957_v42  ;;  %1839 = vmatmul.mubr.f32.gmra.mxu1 %v4961_v23  ;;  %v610_v38 = vadd.f32 %v4645_v34, %v6858_v3  ;;  %v563_v45 = vmul.f32 %v6860_v27, %v6859_v6  ;;  %v2360_v28 = vrot.slane %v2359_v26, 4  ;;  %v834_v37 = vmul.f32 %v6862_v31, %v6861_v20 }
 0x10f   : > { %v1219_v56 = vadd.f32 %v1155_v59, %v931_v54  ;;  %1748 = vmatprep.mubr.f32.mxu0 %v4968_v50  ;;  %1844 = vmatprep.mubr.f32.mxu1 %v4980_v49  ;;  %v1475_v46 = vadd.f32 %v1411_v9, %v1187_v7  ;;  %v4996_v1 = vadd.f32 %v6864_v29, %v6863_v22  ;;  %v4998_v53 = vmax.f32 %v1472_v17, 0.0  ;;  %v6869_v17 = vld [vmem:[#allocation68_spill] sm:$0xff] }
 0x110   : > { %v5000_v58 = vmax.f32 %v1504_v55, 0.0  ;;  %v1122_v60 = vmul.f32 %v4443_v36, %v4713_v35  ;;  %v2351_v5 = vrot.slane %v2350_v8, 4  ;;  %v2293_v39 = vmul.f32 %v4941_v57, %v4941_v57 }
 0x111   : > { %6865 = vst [vmem:[#allocation67_spill] sm:$0xff] %v4998_v53  ;;  %v1507_v43 = vadd.f32 %v1443_v10, %v1219_v56  ;;  %v5006_v24 = vmax.f32 %v1475_v46, 0.0  ;;  %v898_v11 = vadd.f32 %v834_v37, %v610_v38  ;;  %v1410_v9 = vmul.f32 %v6840_v21, %v4884_v4 }
 0x112   : > { %6866 = vst [vmem:[#allocation44_spill] sm:$0xff] %v5000_v58  ;;  %1749 = vmatmul.mubr.f32.gmra.mxu0 %v4998_v53  ;;  %1845 = vmatmul.mubr.f32.gmra.mxu1 %v5000_v58  ;;  %v642_v55 = vadd.f32 %v4645_v34, %v6869_v17  ;;  %v5017_v54 = vadd.f32 %v6864_v29, %v563_v45  ;;  %v6872_v17 = vld [vmem:[#allocation71_spill] sm:$0xff] }
 0x113   : > { %6867 = vst [vmem:[#allocation72_spill] sm:$0xff] %v5006_v24  ;;  %v5010_v14 = vmax.f32 %v1507_v43, 0.0  ;;  %v2361_v59 = vadd.f32 %v2360_v28, %v2359_v26  ;;  %v2325_v7 = vmul.f32 %v4955_v16, %v4955_v16  ;;  %v2295_v10 = vmul.f32 %v4968_v50, %v4968_v50  ;;  %1754 = vmatprep.mubr.f32.mxu0 %v5006_v24  ;;  %v6871_v26 = vld [vmem:[#allocation40_spill] sm:$0xff] }
 0x114   : > { %v1186_v56 = vadd.f32 %v1122_v60, %v898_v11  ;;  %v5026_v3 = vmul.f32 %v4787_v12, %v4787_v12  ;;  %v5030_v38 = vmul.f32 %v4957_v42, %v4957_v42  ;;  %v866_v45 = vmul.f32 %v6871_v26, %v6861_v20  ;;  %v6873_v12 = vld [vmem:[#allocation30_spill] sm:$0xff]  ;;  %v6881_v50 = vld [vmem:[#allocation36_spill] sm:$0xff] }
 0x115   : > { %6868 = vst [vmem:[#allocation37_spill] sm:$0xff] %v5010_v14  ;;  %1850 = vmatprep.mubr.f32.mxu1 %v5010_v14  ;;  %v1154_v28 = vmul.f32 %v6827_v18, %v4713_v35  ;;  %v5037_v46 = vadd.f32 %v2351_v5, %v2350_v8  ;;  %v2375_v37 = vadd.f32 %v2295_v10, %v2293_v39  ;;  %v6877_v10 = vld [vmem:[#allocation35_spill] sm:$0xff] }
 0x116   : > { %6870 = vst [vmem:[#allocation69_spill] sm:$0xff] %v5026_v3  ;;  %v2327_v22 = vmul.f32 %v4980_v49, %v4980_v49  ;;  %v1474_v43 = vadd.f32 %v1410_v9, %v1186_v56  ;;  %v930_v60 = vadd.f32 %v866_v45, %v642_v55  ;;  %v1442_v11 = vmul.f32 %v6841_v13, %v4884_v4  ;;  %v6876_v9 = vld [vmem:[#allocation77_spill] sm:$0xff] }
 0x117   : > { %v529_v16 = vmul.f32 %v6873_v12, %v6872_v17  ;;  %v837_v48 = vmul.f32 %v6874_v44, %v4763_v52  ;;  %v2362_v3 = vrot.slane %v2361_v59, 2  ;;  %v5049_v8 = vmul.f32 %v4998_v53, %v4998_v53  ;;  %v6878_v45 = vld [vmem:[#allocation33_spill] sm:$0xff] }
 0x118   : > { %v2447_v61 = vadd.f32 %v2327_v22, %v2325_v7  ;;  %v5051_v5 = vmax.f32 %v1474_v43, 0.0  ;;  %v1218_v39 = vadd.f32 %v1154_v28, %v930_v60  ;;  %v1125_v56 = vmul.f32 %v4418_v25, %v6877_v10  ;;  %v6879_v7 = vld [vmem:[#allocation32_spill] sm:$0xff]  ;;  %v6880_v28 = vld [vmem:[#allocation34_spill] sm:$0xff] }
 0x119   : > { %v613_v55 = vadd.f32 %v6876_v9, %v529_v16  ;;  %v561_v12 = vmul.f32 %v6878_v45, %v6872_v17  ;;  %v2353_v49 = vrot.slane %v5037_v46, 2  ;;  %v2297_v44 = vmul.f32 %v5006_v24, %v5006_v24 }
 0x11a   : > { %6875 = vst [vmem:[#allocation68_spill] sm:$0xff] %v5051_v5  ;;  %1755 = vmatmul.mubr.f32.gmra.mxu0 %v5051_v5  ;;  %v1413_v22 = vmul.f32 %v6831_v33, %v6879_v7  ;;  %v869_v43 = vmul.f32 %v6880_v28, %v4763_v52  ;;  %v1506_v16 = vadd.f32 %v1442_v11, %v1218_v39 }
 0x11b   : > { %v901_v60 = vadd.f32 %v837_v48, %v613_v55  ;;  %v645_v25 = vadd.f32 %v6876_v9, %v561_v12  ;;  %v1157_v45 = vmul.f32 %v4431_v32, %v6877_v10  ;;  %v5069_v62 = vadd.f32 %v2362_v3, %v2361_v59  ;;  %v6883_v3 = vld [vmem:[#allocation39_spill] sm:$0xff] }
 0x11c   : > { %v2329_v24 = vmul.f32 %v5010_v14, %v5010_v14  ;;  %v528_v53 = vmul.f32 %v6881_v50, %v6872_v17  ;;  %v836_v33 = vmul.f32 %v6862_v31, %v4763_v52  ;;  %v5077_v57 = vmax.f32 %v1506_v16, 0.0  ;;  %v6885_v16 = vld [vmem:[#allocation47_spill] sm:$0xff] }
 0x11d   : > { %v1189_v11 = vadd.f32 %v1125_v56, %v901_v60  ;;  %v933_v48 = vadd.f32 %v869_v43, %v645_v25  ;;  %v1445_v39 = vmul.f32 %v6836_v41, %v6879_v7  ;;  %v1124_v59 = vmul.f32 %v4443_v36, %v6877_v10  ;;  %v6884_v43 = vld [vmem:[#allocation66_spill] sm:$0xff] }
 0x11e   : > { %6882 = vst [vmem:[#allocation40_spill] sm:$0xff] %v5077_v57  ;;  %v612_v32 = vadd.f32 %v6876_v9, %v528_v53  ;;  %v560_v55 = vmul.f32 %v6883_v3, %v6872_v17  ;;  %v868_v50 = vmul.f32 %v6871_v26, %v4763_v52  ;;  %v2376_v12 = vadd.f32 %v2375_v37, %v2297_v44  ;;  %v6887_v44 = vld [vmem:[#allocation74_spill] sm:$0xff] }
 0x11f   : > { %1851 = vmatmul.mubr.f32.gmra.mxu1 %v5077_v57  ;;  %v1477_v31 = vadd.f32 %v1413_v22, %v1189_v11  ;;  %v1221_v56 = vadd.f32 %v1157_v45, %v933_v48  ;;  %v1412_v28 = vmul.f32 %v6840_v21, %v6879_v7  ;;  %v1156_v36 = vmul.f32 %v6827_v18, %v6877_v10  ;;  %v6888_v22 = vld [vmem:[#allocation52_spill] sm:$0xff] }
 0x120   : > { %v900_v41 = vadd.f32 %v836_v33, %v612_v32  ;;  %v644_v53 = vadd.f32 %v6876_v9, %v560_v55  ;;  %v839_v60 = vmul.f32 %v6885_v16, %v6884_v43  ;;  %v1444_v37 = vmul.f32 %v6841_v13, %v6879_v7  ;;  %v6889_v48 = vld [vmem:[#allocation56_spill] sm:$0xff]  ;;  %v6892_v55 = vld [vmem:[#allocation53_spill] sm:$0xff] }
 0x121   : > { %v5096_v25 = vmax.f32 %v1477_v31, 0.0  ;;  %v1509_v26 = vadd.f32 %v1445_v39, %v1221_v56  ;;  %v1127_v45 = vmul.f32 %v6888_v22, %v6887_v44  ;;  %v1415_v32 = vmul.f32 %v6889_v48, %v4803_v47  ;;  %v6891_v39 = vld [vmem:[#allocation48_spill] sm:$0xff] }
 0x122   : > { %v1188_v11 = vadd.f32 %v1124_v59, %v900_v41  ;;  %v932_v21 = vadd.f32 %v868_v50, %v644_v53  ;;  %v903_v33 = vadd.f32 %v839_v60, %v4996_v1  ;;  %v871_v13 = vmul.f32 %v6891_v39, %v6884_v43  ;;  %v6893_v60 = vld [vmem:[#allocation57_spill] sm:$0xff] }
 0x123   : > { %6886 = vst [vmem:[#allocation30_spill] sm:$0xff] %v5096_v25  ;;  %1760 = vmatprep.mubr.f32.mxu0 %v5096_v25  ;;  %v2299_v18 = vmul.f32 %v5096_v25, %v5096_v25  ;;  %v5108_v3 = vmax.f32 %v1509_v26, 0.0  ;;  %v1159_v31 = vmul.f32 %v6892_v55, %v6887_v44  ;;  %v2448_v59 = vadd.f32 %v2447_v61, %v2329_v24  ;;  %v6894_v26 = vld [vmem:[#allocation49_spill] sm:$0xff]  ;;  %v6896_v61 = vld [vmem:[#allocation54_spill] sm:$0xff] }
 0x124   : > { %v1476_v50 = vadd.f32 %v1412_v28, %v1188_v11  ;;  %v1220_v56 = vadd.f32 %v1156_v36, %v932_v21  ;;  %v1191_v1 = vadd.f32 %v1127_v45, %v903_v33  ;;  %v935_v53 = vadd.f32 %v871_v13, %v5017_v54  ;;  %v6899_v21 = vld [vmem:[#allocation58_spill] sm:$0xff] }
 0x125   : > { %6890 = vst [vmem:[#allocation31_spill] sm:$0xff] %v5108_v3  ;;  %v2377_v41 = vadd.f32 %v2376_v12, %v2299_v18  ;;  %1856 = vmatprep.mubr.f32.mxu1 %v5108_v3  ;;  %v1447_v14 = vmul.f32 %v6893_v60, %v4803_v47  ;;  %v530_v25 = vmul.f32 %v6894_v26, %v6859_v6 }
 0x126   : > { %v5120_v42 = vmax.f32 %v1476_v50, 0.0  ;;  %v1508_v40 = vadd.f32 %v1444_v37, %v1220_v56  ;;  %v1479_v0 = vadd.f32 %v1415_v32, %v1191_v1  ;;  %v838_v24 = vmul.f32 %v6896_v61, %v6884_v43  ;;  %v6900_v32 = vld [vmem:[#allocation80_spill] sm:$0xff] }
 0x127   : > { %v2354_v28 = vadd.f32 %v2353_v49, %v5037_v46  ;;  %v2296_v12 = vmul.f32 %v5051_v5, %v5051_v5  ;;  %v2331_v54 = vmul.f32 %v5108_v3, %v5108_v3  ;;  %v1223_v36 = vadd.f32 %v1159_v31, %v935_v53 }
 0x128   : > { %6895 = vst [vmem:[#allocation33_spill] sm:$0xff] %v5120_v42  ;;  %1761 = vmatmul.mubr.f32.gmra.mxu0 %v5120_v42  ;;  %v5130_v45 = vmax.f32 %v1508_v40, 0.0  ;;  %v5132_v11 = vmax.f32 %v1479_v0, 0.0  ;;  %v614_v37 = vadd.f32 %v6864_v29, %v530_v25  ;;  %v1126_v33 = vmul.f32 %v6899_v21, %v6887_v44 }
 0x129   : > { %v5139_v49 = vmul.f32 %v6900_v32, %v6900_v32  ;;  %v2364_v46 = vrot.slane %v5069_v62, 1  ;;  %v2324_v18 = vmul.f32 %v4961_v23, %v4961_v23  ;;  %v1511_v13 = vadd.f32 %v1447_v14, %v1223_v36  ;;  %v6905_v32 = vld [vmem:[#allocation59_spill] sm:$0xff] }
 0x12a   : > { %6897 = vst [vmem:[#allocation34_spill] sm:$0xff] %v5130_v45  ;;  %6898 = vst [vmem:[#allocation36_spill] sm:$0xff] %v5132_v11  ;;  %v2366_v40 = vadd.f32 %v5049_v8, %v5030_v38  ;;  %v2378_v0 = vrot.slane %v2377_v41, 4  ;;  %v2449_v31 = vadd.f32 %v2448_v59, %v2331_v54  ;;  %1857 = vmatmul.mubr.f32.gmra.mxu1 %v5130_v45  ;;  %1766 = vmatprep.mubr.f32.mxu0 %v5132_v11  ;;  %v6903_v38 = vld [vmem:[#allocation60_spill] sm:$0xff]  ;;  %v6904_v59 = vld [vmem:[#allocation55_spill] sm:$0xff] }
 0x12b   : > { %6901 = vst [vmem:[#allocation39_spill] sm:$0xff] %v5139_v49  ;;  %v902_v25 = vadd.f32 %v838_v24, %v614_v37  ;;  %v2355_v50 = vrot.slane %v2354_v28, 1  ;;  %v2326_v56 = vmul.f32 %v5000_v58, %v5000_v58  ;;  %v2328_v1 = vmul.f32 %v5077_v57, %v5077_v57 }
 0x12c   : > { %v5152_v53 = vmax.f32 %v1511_v13, 0.0  ;;  %v2367_v14 = vadd.f32 %v2366_v40, %v2296_v12  ;;  %v1414_v8 = vmul.f32 %v6903_v38, %v4803_v47  ;;  %v562_v54 = vmul.f32 %v6904_v59, %v6859_v6 }
 0x12d   : > { %v1190_v36 = vadd.f32 %v1126_v33, %v902_v25  ;;  %v2365_v3 = vadd.f32 %v2364_v46, %v5069_v62  ;;  %v2438_v24 = vadd.f32 %v2326_v56, %v2324_v18  ;;  %v2298_v37 = vmul.f32 %v5120_v42, %v5120_v42  ;;  %v6907_v46 = vld [vmem:[#allocation61_spill] sm:$0xff]  ;;  %v6909_v42 = vld [vmem:[#allocation62_spill] sm:$0xff] }
 0x12e   : > { %6902 = vst [vmem:[#allocation47_spill] sm:$0xff] %v5152_v53  ;;  %1862 = vmatprep.mubr.f32.mxu1 %v5152_v53  ;;  %v870_v13 = vmul.f32 %v6905_v32, %v6884_v43  ;;  %v2379_v57 = vadd.f32 %v2378_v0, %v2377_v41  ;;  %v2450_v12 = vrot.slane %v2449_v31, 4  ;;  %v646_v40 = vadd.f32 %v6864_v29, %v562_v54  ;;  %v6912_v54 = vld [vmem:[#allocation43_spill] sm:$0xff] }
 0x12f   : > { %v1478_v33 = vadd.f32 %v1414_v8, %v1190_v36  ;;  %v5167_v25 = vmul.f32 %v4928_v15, %v4928_v15  ;;  %v2356_v58 = vadd.f32 %v2355_v50, %v2354_v28  ;;  %v2439_v62 = vadd.f32 %v2438_v24, %v2328_v1  ;;  %v6911_v8 = vld [vmem:[#allocation51_spill] sm:$0xff]  ;;  %v6913_v28 = vld [vmem:[#allocation70_spill] sm:$0xff] }
 0x130   : > { %v1158_v18 = vmul.f32 %v6907_v46, %v6887_v44  ;;  %v2368_v56 = vadd.f32 %v2367_v14, %v2298_v37  ;;  %v934_v49 = vadd.f32 %v870_v13, %v646_v40  ;;  %v1446_v41 = vmul.f32 %v6909_v42, %v4803_v47 }
 0x131   : > { %6906 = vst [vmem:[#allocation52_spill] sm:$0xff] %v5167_v25  ;;  %v5171_v23 = vmax.f32 %v1478_v33, 0.0  ;;  %v2493_v0 = vmax.f32 %v2365_v3, 1e-24  ;;  %v5177_v36 = vmul.f32 %v4947_v63, %v4947_v63  ;;  %v533_v15 = vmul.f32 %v6912_v54, %v6911_v8  ;;  %v6915_v33 = vld [vmem:[#allocation65_spill] sm:$0xff] }
 0x132   : > { %v841_v50 = vmul.f32 %v6885_v16, %v6913_v28  ;;  %v2380_v1 = vrot.slane %v2379_v57, 2  ;;  %v2451_v24 = vadd.f32 %v2450_v12, %v2449_v31  ;;  %v2330_v14 = vmul.f32 %v5130_v45, %v5130_v45 }
 0x133   : > { %6908 = vst [vmem:[#allocation56_spill] sm:$0xff] %v5171_v23  ;;  %6910 = vst [vmem:[#allocation48_spill] sm:$0xff] %v5177_v36  ;;  %1767 = vmatmul.mubr.f32.gmra.mxu0 %v5171_v23  ;;  %v1222_v37 = vadd.f32 %v1158_v18, %v934_v49  ;;  %v5188_v3 = vmul.f32 %v4913_v30, %v4913_v30  ;;  %v2492_v13 = vmax.f32 %v2356_v58, 1e-24  ;;  %v2369_v31 = vrot.slane %v2368_v56, 4 }
 0x134   : > { %v617_v40 = vadd.f32 %v6915_v33, %v533_v15  ;;  %v1129_v63 = vmul.f32 %v6888_v22, %v4685_v51  ;;  %v5195_v36 = vmul.f32 %v4917_v2, %v4917_v2  ;;  %v2440_v12 = vadd.f32 %v2439_v62, %v2330_v14 }
 0x135   : > { %6914 = vst [vmem:[#allocation53_spill] sm:$0xff] %v5188_v3  ;;  %v1510_v45 = vadd.f32 %v1446_v41, %v1222_v37  ;;  %3703 = vrsqrt.f32 %v2493_v0  ;;  %v1417_v49 = vmul.f32 %v6889_v48, %v4753_v19  ;;  %v565_v58 = vmul.f32 %v6860_v27, %v6911_v8 }
 0x136   : > { %6916 = vst [vmem:[#allocation57_spill] sm:$0xff] %v5195_v36  ;;  %v905_v25 = vadd.f32 %v841_v50, %v617_v40  ;;  %v2381_v18 = vadd.f32 %v2380_v1, %v2379_v57  ;;  %v2452_v15 = vrot.slane %v2451_v24, 2  ;;  %v873_v3 = vmul.f32 %v6891_v39, %v6913_v28 }
 0x137   : > { %v5201_v30 = vmax.f32 %v1510_v45, 0.0  ;;  %3705 = vrsqrt.f32 %v2492_v13  ;;  %v649_v62 = vadd.f32 %v6915_v33, %v565_v58  ;;  %v1161_v41 = vmul.f32 %v6892_v55, %v4685_v51 }
 0x138   : > { %v1193_v2 = vadd.f32 %v1129_v63, %v905_v25  ;;  %v2370_v0 = vadd.f32 %v2369_v31, %v2368_v56  ;;  %v2441_v50 = vrot.slane %v2440_v12, 4  ;;  %v5210_v14 = vmul.f32 %v5132_v11, %v5132_v11 }
 0x139   : > { %6917 = vst [vmem:[#allocation49_spill] sm:$0xff] %v5201_v30  ;;  %1863 = vmatmul.mubr.f32.gmra.mxu1 %v5201_v30  ;;  %v1449_v57 = vmul.f32 %v6893_v60, %v4753_v19  ;;  %v937_v1 = vadd.f32 %v873_v3, %v649_v62  ;;  %v532_v63 = vmul.f32 %v6894_v26, %v6911_v8  ;;  %v2382_v37 = vrot.slane %v2381_v18, 1 }
 0x13a   : > { %v1481_v45 = vadd.f32 %v1417_v49, %v1193_v2  ;;  %v840_v25 = vmul.f32 %v6896_v61, %v6913_v28  ;;  %v5219_v56 = vadd.f32 %v2452_v15, %v2451_v24  ;;  %v5223_v13 = vmul.f32 %v5152_v53, %v5152_v53 }
 0x13b   : > { %v1128_v40 = vmul.f32 %v6899_v21, %v4685_v51  ;;  %v1225_v2 = vadd.f32 %v1161_v41, %v937_v1  ;;  %v616_v3 = vadd.f32 %v6915_v33, %v532_v63  ;;  %v564_v49 = vmul.f32 %v6904_v59, %v6911_v8 }
 0x13c   : > { %v5227_v31 = vmax.f32 %v1481_v45, 0.0  ;;  %v2371_v58 = vrot.slane %v2370_v0, 2  ;;  %v5232_v62 = vadd.f32 %v2441_v50, %v2440_v12  ;;  %v1416_v24 = vmul.f32 %v6903_v38, %v4753_v19  ;;  %v6919_v50 = vld [vmem:[#allocation45_spill] sm:$0xff] }
 0x13d   : > { %v872_v15 = vmul.f32 %v6905_v32, %v6913_v28  ;;  %v1513_v53 = vadd.f32 %v1449_v57, %v1225_v2  ;;  %v904_v45 = vadd.f32 %v840_v25, %v616_v3  ;;  %v648_v41 = vadd.f32 %v6915_v33, %v564_v49 }
 0x13e   : > { %6918 = vst [vmem:[#allocation54_spill] sm:$0xff] %v5227_v31  ;;  %1772 = vmatprep.mubr.f32.mxu0 %v5227_v31  ;;  %v1160_v1 = vmul.f32 %v6907_v46, %v4685_v51  ;;  %v5242_v63 = vadd.f32 %v2382_v37, %v2381_v18  ;;  %v535_v36 = vmul.f32 %v6912_v54, %v6919_v50 }
 0x13f   : > { %v843_v11 = vmul.f32 %v6885_v16, %v6861_v20  ;;  %v5249_v5 = vmax.f32 %v1513_v53, 0.0  ;;  %v1192_v28 = vadd.f32 %v1128_v40, %v904_v45  ;;  %v936_v57 = vadd.f32 %v872_v15, %v648_v41 }
 0x140   : > { %v1448_v25 = vmul.f32 %v6909_v42, %v4753_v19  ;;  %v619_v2 = vadd.f32 %v4645_v34, %v535_v36  ;;  %v1131_v18 = vmul.f32 %v6888_v22, %v4713_v35  ;;  %v567_v37 = vmul.f32 %v6860_v27, %v6919_v50 }
 0x141   : > { %6920 = vst [vmem:[#allocation58_spill] sm:$0xff] %v5249_v5  ;;  %v875_v3 = vmul.f32 %v6891_v39, %v6861_v20  ;;  %1868 = vmatprep.mubr.f32.mxu1 %v5249_v5  ;;  %v1480_v53 = vadd.f32 %v1416_v24, %v1192_v28  ;;  %v1224_v49 = vadd.f32 %v1160_v1, %v936_v57 }
 0x142   : > { %v1419_v40 = vmul.f32 %v6889_v48, %v4884_v4  ;;  %v1163_v15 = vmul.f32 %v6892_v55, %v4713_v35  ;;  %v5265_v36 = vpop.eup %3703  ;;  %v907_v45 = vadd.f32 %v843_v11, %v619_v2  ;;  %v651_v41 = vadd.f32 %v4645_v34, %v567_v37 }
 0x143   : > { %6921 = vst [vmem:[#allocation60_spill] sm:$0xff] %v5265_v36  ;;  %v534_v12 = vmul.f32 %v6894_v26, %v6919_v50  ;;  %v842_v19 = vmul.f32 %v6896_v61, %v6861_v20  ;;  %v5272_v51 = vadd.f32 %v2371_v58, %v2370_v0  ;;  %v5274_v28 = vmax.f32 %v1480_v53, 0.0 }
 0x144   : > { %v1512_v24 = vadd.f32 %v1448_v25, %v1224_v49  ;;  %v1451_v1 = vmul.f32 %v6893_v60, %v4884_v4  ;;  %v5278_v57 = vpop.eup %3705  ;;  %v1195_v36 = vadd.f32 %v1131_v18, %v907_v45  ;;  %v939_v11 = vadd.f32 %v875_v3, %v651_v41 }
 0x145   : > { %6922 = vst [vmem:[#allocation55_spill] sm:$0xff] %v5274_v28  ;;  %6923 = vst [vmem:[#allocation59_spill] sm:$0xff] %v5278_v57  ;;  %v618_v2 = vadd.f32 %v4645_v34, %v534_v12  ;;  %v1130_v37 = vmul.f32 %v6899_v21, %v4713_v35  ;;  %1773 = vmatmul.mubr.f32.gmra.mxu0 %v5274_v28  ;;  %v566_v58 = vmul.f32 %v6904_v59, %v6919_v50 }
 0x146   : > { %v5285_v0 = vmax.f32 %v1512_v24, 0.0  ;;  %v874_v25 = vmul.f32 %v6905_v32, %v6861_v20  ;;  %v1483_v53 = vadd.f32 %v1419_v40, %v1195_v36  ;;  %v1227_v18 = vadd.f32 %v1163_v15, %v939_v11 }
 0x147   : > { %v906_v3 = vadd.f32 %v842_v19, %v618_v2  ;;  %v1418_v12 = vmul.f32 %v6903_v38, %v4884_v4  ;;  %v5296_v45 = vmul.f32 %v5171_v23, %v5171_v23  ;;  %v650_v41 = vadd.f32 %v4645_v34, %v566_v58 }
 0x148   : > { %6924 = vst [vmem:[#allocation61_spill] sm:$0xff] %v5285_v0  ;;  %1869 = vmatmul.mubr.f32.gmra.mxu1 %v5285_v0  ;;  %v1162_v24 = vmul.f32 %v6907_v46, %v4713_v35  ;;  %v5302_v33 = vmax.f32 %v1483_v53, 0.0  ;;  %v1515_v40 = vadd.f32 %v1451_v1, %v1227_v18  ;;  %v537_v15 = vmul.f32 %v6912_v54, %v6872_v17 }
 0x149   : > { %v1194_v19 = vadd.f32 %v1130_v37, %v906_v3  ;;  %v938_v11 = vadd.f32 %v874_v25, %v650_v41  ;;  %v1450_v2 = vmul.f32 %v6909_v42, %v4884_v4  ;;  %v845_v49 = vmul.f32 %v6885_v16, %v4763_v52 }
 0x14a   : > { %6925 = vst [vmem:[#allocation62_spill] sm:$0xff] %v5302_v33  ;;  %1778 = vmatprep.mubr.f32.mxu0 %v5302_v33  ;;  %v5312_v58 = vmax.f32 %v1515_v40, 0.0  ;;  %v621_v1 = vadd.f32 %v6876_v9, %v537_v15  ;;  %v1133_v37 = vmul.f32 %v6888_v22, %v6877_v10  ;;  %v2303_v54 = vmul.f32 %v5227_v31, %v5227_v31  ;;  %v6952_v31 = vld [vmem:[#allocation83_spill] sm:$0xff]  ;;  %v6955_v23 = vld [vmem:[#allocation60_spill] sm:$0xff] }
 0x14b   : > { %v1482_v53 = vadd.f32 %v1418_v12, %v1194_v19  ;;  %v1226_v25 = vadd.f32 %v1162_v24, %v938_v11  ;;  %v569_v18 = vmul.f32 %v6860_v27, %v6872_v17  ;;  %v877_v16 = vmul.f32 %v6891_v39, %v4763_v52 }
 0x14c   : > { %6926 = vst [vmem:[#allocation51_spill] sm:$0xff] %v5312_v58  ;;  %v2335_v3 = vmul.f32 %v5249_v5, %v5249_v5  ;;  %1874 = vmatprep.mubr.f32.mxu1 %v5312_v58  ;;  %v909_v41 = vadd.f32 %v845_v49, %v621_v1  ;;  %v1421_v22 = vmul.f32 %v6889_v48, %v6879_v7 }
 0x14d   : > { %v5326_v12 = vmax.f32 %v1482_v53, 0.0  ;;  %v2305_v24 = vmul.f32 %v5302_v33, %v5302_v33  ;;  %v1514_v40 = vadd.f32 %v1450_v2, %v1226_v25  ;;  %v653_v27 = vadd.f32 %v6876_v9, %v569_v18 }
 0x14e   : > { %v1165_v39 = vmul.f32 %v6892_v55, %v6877_v10  ;;  %v2393_v19 = vadd.f32 %v2303_v54, %v5210_v14  ;;  %v2465_v15 = vadd.f32 %v2335_v3, %v5223_v13  ;;  %v1197_v11 = vadd.f32 %v1133_v37, %v909_v41 }
 0x14f   : > { %6927 = vst [vmem:[#allocation43_spill] sm:$0xff] %v5326_v12  ;;  %1779 = vmatmul.mubr.f32.gmra.mxu0 %v5326_v12  ;;  %v536_v49 = vmul.f32 %v6894_v26, %v6872_v17  ;;  %v5340_v48 = vmax.f32 %v1514_v40, 0.0  ;;  %v941_v53 = vadd.f32 %v877_v16, %v653_v27  ;;  %v1453_v2 = vmul.f32 %v6893_v60, %v6879_v7  ;;  %v5371_v27 = vld [vmem:[%s4229_s16 + $0x18] sm:$0xff] }
 0x150   : > { %v844_v1 = vmul.f32 %v6896_v61, %v4763_v52  ;;  %v2302_v55 = vmul.f32 %v5274_v28, %v5274_v28  ;;  %v1485_v14 = vadd.f32 %v1421_v22, %v1197_v11  ;;  %v1132_v37 = vmul.f32 %v6899_v21, %v6877_v10 }
 0x151   : > { %6928 = vst [vmem:[#allocation45_spill] sm:$0xff] %v5340_v48  ;;  %v620_v13 = vadd.f32 %v6876_v9, %v536_v49  ;;  %v2394_v54 = vadd.f32 %v2393_v19, %v2305_v24  ;;  %1875 = vmatmul.mubr.f32.gmra.mxu1 %v5340_v48  ;;  %v1229_v26 = vadd.f32 %v1165_v39, %v941_v53  ;;  %v6931_v39 = vld [vmem:[#allocation15_spill] sm:$0xff]  ;;  %v6932_v19 = vld [vmem:[#allocation16_spill] sm:$0xff] }
 0x152   : > { %v568_v60 = vmul.f32 %v6904_v59, %v6872_v17  ;;  %v876_v61 = vmul.f32 %v6905_v32, %v4763_v52  ;;  %v2337_v25 = vmul.f32 %v5312_v58, %v5312_v58  ;;  %v5358_v18 = vmax.f32 %v1485_v14, 0.0  ;;  %v6930_v59 = vld [vmem:[#allocation63_spill] sm:$0xff] }
 0x153   : > { %v908_v16 = vadd.f32 %v844_v1, %v620_v13  ;;  %v1420_v21 = vmul.f32 %v6903_v38, %v6879_v7  ;;  %v1517_v3 = vadd.f32 %v1453_v2, %v1229_v26  ;;  %v1164_v22 = vmul.f32 %v6907_v46, %v6877_v10  ;;  %v6934_v2 = vld [vmem:[#allocation21_spill] sm:$0xff]  ;;  %v5411_v58 = vld [vmem:[%s4229_s16 + $0x38] sm:$0xff]  ;;  %s3520_s16 = sshll.u32 %s4225_s10, 9 }
 0x154   : > { %6929 = vst [vmem:[#allocation96_spill] sm:$0xff] %v5358_v18  ;;  %v652_v41 = vadd.f32 %v6876_v9, %v568_v60  ;;  %v539_v24 = vmul.f32 %v6930_v59, %v6859_v6  ;;  %1784 = vmatprep.mubr.f32.mxu0 %v5358_v18  ;;  %v2307_v32 = vmul.f32 %v5358_v18, %v5358_v18  ;;  %v6936_v60 = vld [vmem:[#allocation19_spill] sm:$0xff]  ;;  %s6017_s15 = scalar_lea.vmem [#allocation7], %s3520_s16 }
 0x155   : > { %v1196_v40 = vadd.f32 %v1132_v37, %v908_v16  ;;  %v709_v38 = vrot.slane %v5371_v27, %v6931_v39  ;;  %v997_v11 = vrot.slane %v5371_v27, %v6932_v19  ;;  %v5377_v49 = vmax.f32 %v1517_v3, 0.0  ;;  %v6935_v37 = vld [vmem:[#allocation18_spill] sm:$0xff]  ;;  %s3381_s17 = sshll.u32 %s6017_s15, 4  ;;  %s6517_s17 = int_to_ptr.vmem [resolvable:$true] %s3381_s17 }
 0x156   : > { %v940_v46 = vadd.f32 %v876_v61, %v652_v41  ;;  %v1452_v53 = vmul.f32 %v6909_v42, %v6879_v7  ;;  %v1285_v1 = vrot.slane %v5371_v27, %v6934_v2  ;;  %v2395_v14 = vadd.f32 %v2394_v54, %v2307_v32  ;;  %v6938_v32 = vld [vmem:[#allocation20_spill] sm:$0xff]  ;;  %s3953_s11 = scalar_lea.vmem %s6517_s17, 8192  ;;  %p3960_p10 = scmp.lt.s32.totalorder %s6517_s17, %s3958_s18 }
 0x157   : > { %6933 = vst [vmem:[#allocation63_spill] sm:$0xff] %v5377_v49  ;;  %v1484_v13 = vadd.f32 %v1420_v21, %v1196_v40  ;;  %v5384_v26 = vrot.slane %v709_v38, %v6935_v37  ;;  %v5387_v16 = vrot.slane %v997_v11, %v6936_v60  ;;  %v2466_v36 = vadd.f32 %v2465_v15, %v2337_v25  ;;  %p3954_p3 = scmp.ne.s32.totalorder %s6517_s17, %s3953_s11  ;;  %p3961_p2 = scmp.lt.s32.totalorder %s3959_s29, %s3953_s11 }
 0x158   : > { %v2304_v3 = vmul.f32 %v5326_v12, %v5326_v12  ;;  %1880 = vmatprep.mubr.f32.mxu1 %v5377_v49  ;;  %v1228_v61 = vadd.f32 %v1164_v22, %v940_v46  ;;  %v623_v42 = vadd.f32 %v6864_v29, %v539_v24  ;;  %v5400_v40 = vrot.slane %v1285_v1, %v6938_v32  ;;  %v6939_v22 = vld [vmem:[#allocation64_spill] sm:$0xff] }
 0x159   : > { %v5393_v41 = vmax.f32 %v1484_v13, 0.0  ;;  %v847_v54 = vmul.f32 %v5384_v26, %v6884_v43  ;;  %v1135_v21 = vmul.f32 %v5387_v16, %v6887_v44  ;;  %v2384_v15 = vadd.f32 %v2302_v55, %v5296_v45  ;;  %p3955_p7 = pnand %p3954_p3, %p7032_p11  ;;  %p3962_p13 = por %p3961_p2, %p3960_p10 }
 0x15a   : > { %v2339_v25 = vmul.f32 %v5377_v49, %v5377_v49  ;;  %v1516_v38 = vadd.f32 %v1452_v53, %v1228_v61  ;;  %v571_v24 = vmul.f32 %v6939_v22, %v6859_v6  ;;  %v2396_v11 = vrot.slane %v2395_v14, 4 }
 0x15b   : > { %6937 = vst [vmem:[#allocation15_spill] sm:$0xff] %v5393_v41  ;;  %1785 = vmatmul.mubr.f32.gmra.mxu0 %v5393_v41  ;;  %v911_v46 = vadd.f32 %v847_v54, %v623_v42  ;;  %v1423_v13 = vmul.f32 %v5400_v40, %v4803_v47  ;;  %v741_v1 = vrot.slane %v5411_v58, %v6931_v39  ;;  %v6941_v42 = vrot.slane %v5219_v56, 1  ;;  %p3956_p12 = pneg %p3955_p7 }
 0x15c   : > { %v2385_v45 = vadd.f32 %v2384_v15, %v2304_v3  ;;  %v5415_v55 = vmax.f32 %v1516_v38, 0.0  ;;  %v1029_v53 = vrot.slane %v5411_v58, %v6932_v19  ;;  %v1317_v61 = vrot.slane %v5411_v58, %v6934_v2 }
 0x15d   : > { %v2455_v54 = vadd.f32 %v6941_v42, %v5219_v56  ;;  %v2467_v49 = vadd.f32 %v2466_v36, %v2339_v25  ;;  %v1199_v5 = vadd.f32 %v1135_v21, %v911_v46  ;;  %v5425_v18 = vrot.slane %v741_v1, %v6935_v37  ;;  %p3963_p0 = pnand %p3962_p13, %p3956_p12 }
 0x15e   : > { %6940 = vst [vmem:[#allocation16_spill] sm:$0xff] %v5415_v55  ;;  %v6942_v39 = vrot.slane %v5232_v62, 2  ;;  %v2306_v15 = vmul.f32 %v5393_v41, %v5393_v41  ;;  %1881 = vmatmul.mubr.f32.gmra.mxu1 %v5415_v55  ;;  %v655_v19 = vadd.f32 %v6864_v29, %v571_v24  ;;  %v5435_v2 = vrot.slane %v1029_v53, %v6936_v60 }
 0x15f   : > { %v2397_v56 = vadd.f32 %v2396_v11, %v2395_v14  ;;  %v1487_v36 = vadd.f32 %v1423_v13, %v1199_v5  ;;  %v879_v21 = vmul.f32 %v5425_v18, %v6884_v43  ;;  %v5440_v25 = vrot.slane %v1317_v61, %v6938_v32  ;;  %v6944_v61 = vld [vmem:[#allocation17_spill] sm:$0xff] }
 0x160   : > { %v2444_v3 = vadd.f32 %v6942_v39, %v5232_v62  ;;  %v6943_v62 = vrot.slane %v5272_v51, 1  ;;  %v2332_v46 = vmul.f32 %v5201_v30, %v5201_v30  ;;  %v2386_v1 = vadd.f32 %v2385_v45, %v2306_v15 }
 0x161   : > { %v1167_v24 = vmul.f32 %v5435_v2, %v6887_v44  ;;  %v2468_v53 = vrot.slane %v2467_v49, 4  ;;  %v5449_v14 = vmax.f32 %v1487_v36, 0.0  ;;  %v943_v5 = vadd.f32 %v879_v21, %v655_v19 }
 0x162   : > { %v2374_v38 = vadd.f32 %v6943_v62, %v5272_v51  ;;  %v1455_v11 = vmul.f32 %v5440_v25, %v4803_v47  ;;  %v2334_v13 = vmul.f32 %v5285_v0, %v5285_v0  ;;  %v2336_v51 = vmul.f32 %v5340_v48, %v5340_v48 }
 0x163   : > { %v397_v42 = vrot.slane %v5371_v27, %v6944_v61  ;;  %v705_v45 = vrot.slane %v5371_v27, %v6935_v37  ;;  %v6945_v39 = vmax.f32 %v5242_v63, 1e-24  ;;  %v2503_v15 = vmax.f32 %v2455_v54, 1e-24  ;;  %1790 = vmatprep.mubr.f32.mxu0 %v5449_v14 }
 0x164   : > { %v2398_v19 = vrot.slane %v2397_v56, 2  ;;  %v1231_v36 = vadd.f32 %v1167_v24, %v943_v5  ;;  %v2456_v21 = vadd.f32 %v2334_v13, %v2332_v46  ;;  %v2387_v62 = vrot.slane %v2386_v1, 4 }
 0x165   : > { %3707 = vrsqrt.f32 %v6945_v39  ;;  %v5465_v0 = vrot.slane %v397_v42, %v6944_v61  ;;  %v5468_v48 = vrot.slane %v705_v45, %v6935_v37  ;;  %v2445_v30 = vrot.slane %v2444_v3, 1 }
 0x166   : > { %v2469_v41 = vadd.f32 %v2468_v53, %v2467_v49  ;;  %v1519_v33 = vadd.f32 %v1455_v11, %v1231_v36  ;;  %v993_v63 = vrot.slane %v5371_v27, %v6936_v60  ;;  %v2494_v39 = vmax.f32 %v2374_v38, 1e-24 }
 0x167   : > { %v2457_v54 = vadd.f32 %v2456_v21, %v2336_v51  ;;  %v538_v12 = vmul.f32 %v5465_v0, %v6859_v6  ;;  %v846_v46 = vmul.f32 %v5468_v48, %v6884_v43  ;;  %3709 = vrsqrt.f32 %v2503_v15 }
 0x168   : > { %v2399_v24 = vadd.f32 %v2398_v19, %v2397_v56  ;;  %v5476_v5 = vmax.f32 %v1519_v33, 0.0  ;;  %v5479_v13 = vrot.slane %v993_v63, %v6936_v60  ;;  %v2388_v49 = vadd.f32 %v2387_v62, %v2386_v1 }
 0x169   : > { %v2338_v53 = vmul.f32 %v5415_v55, %v5415_v55  ;;  %v622_v38 = vadd.f32 %v6864_v29, %v538_v12  ;;  %v1281_v11 = vrot.slane %v5371_v27, %v6938_v32  ;;  %v5486_v51 = vadd.f32 %v2445_v30, %v2444_v3 }
 0x16a   : > { %v2470_v42 = vrot.slane %v2469_v41, 2  ;;  %1886 = vmatprep.mubr.f32.mxu1 %v5476_v5  ;;  %v1134_v33 = vmul.f32 %v5479_v13, %v6887_v44  ;;  %v429_v56 = vrot.slane %v5411_v58, %v6944_v61  ;;  %3711 = vrsqrt.f32 %v2494_v39 }
 0x16b   : > { %6946 = vst [vmem:[#allocation21_spill] sm:$0xff] %v5486_v51  ;;  %v5493_v1 = vadd.f32 %v2457_v54, %v2338_v53  ;;  %v910_v45 = vadd.f32 %v846_v46, %v622_v38  ;;  %v5496_v12 = vrot.slane %v1281_v11, %v6938_v32  ;;  %v2400_v15 = vrot.slane %v2399_v24, 1 }
 0x16c   : > { %v5499_v30 = vrot.slane %v429_v56, %v6944_v61  ;;  %v737_v27 = vrot.slane %v5411_v58, %v6935_v37  ;;  %v1025_v3 = vrot.slane %v5411_v58, %v6936_v60  ;;  %v2389_v19 = vrot.slane %v2388_v49, 2 }
 0x16d   : > { %v1198_v36 = vadd.f32 %v1134_v33, %v910_v45  ;;  %v1422_v21 = vmul.f32 %v5496_v12, %v4803_v47  ;;  %v1313_v62 = vrot.slane %v5411_v58, %v6938_v32  ;;  %v5509_v63 = vadd.f32 %v2470_v42, %v2469_v41  ;;  %v6948_v42 = vld [vmem:[#allocation70_spill] sm:$0xff] }
 0x16e   : > { %v570_v61 = vmul.f32 %v5499_v30, %v6859_v6  ;;  %v5514_v39 = vrot.slane %v737_v27, %v6935_v37  ;;  %v5517_v54 = vrot.slane %v1025_v3, %v6936_v60  ;;  %v2459_v46 = vrot.slane %v5493_v1, 4  ;;  %v6949_v27 = vld [vmem:[#allocation65_spill] sm:$0xff]  ;;  %v6957_v6 = vld [vmem:[#allocation84_spill] sm:$0xff] }
 0x16f   : > { %6947 = vst [vmem:[#allocation18_spill] sm:$0xff] %v5509_v63  ;;  %v1486_v53 = vadd.f32 %v1422_v21, %v1198_v36  ;;  %v5521_v38 = vrot.slane %v1313_v62, %v6938_v32  ;;  %v541_v58 = vmul.f32 %v6930_v59, %v6911_v8  ;;  %v849_v60 = vmul.f32 %v5384_v26, %v6948_v42  ;;  %v6950_v62 = vld [vmem:[#allocation73_spill] sm:$0xff] }
 0x170   : > { %v654_v41 = vadd.f32 %v6864_v29, %v570_v61  ;;  %v878_v11 = vmul.f32 %v5514_v39, %v6884_v43  ;;  %v1166_v37 = vmul.f32 %v5517_v54, %v6887_v44  ;;  %v5534_v56 = vadd.f32 %v2400_v15, %v2399_v24  ;;  %v6951_v15 = vld [vmem:[#allocation78_spill] sm:$0xff]  ;;  %v6956_v29 = vld [vmem:[#allocation85_spill] sm:$0xff] }
 0x171   : > { %v5536_v32 = vadd.f32 %v2389_v19, %v2388_v49  ;;  %v5538_v45 = vmax.f32 %v1486_v53, 0.0  ;;  %v625_v3 = vadd.f32 %v6949_v27, %v541_v58  ;;  %v1454_v21 = vmul.f32 %v5521_v38, %v4803_v47 }
 0x172   : > { %v5532_v33 = vpop.eup %3707  ;;  %v942_v36 = vadd.f32 %v878_v11, %v654_v41  ;;  %v1137_v61 = vmul.f32 %v5387_v16, %v6950_v62  ;;  %v573_v55 = vmul.f32 %v6939_v22, %v6911_v8  ;;  %v1425_v49 = vmul.f32 %v5400_v40, %v6951_v15 }
 0x173   : > { %1791 = vmatmul.mubr.f32.gmra.mxu0 %v5538_v45  ;;  %v913_v24 = vadd.f32 %v849_v60, %v625_v3  ;;  %v881_v19 = vmul.f32 %v5425_v18, %v6948_v42  ;;  %v1169_v53 = vmul.f32 %v5435_v2, %v6950_v62  ;;  %v1457_v11 = vmul.f32 %v5440_v25, %v6951_v15  ;;  %v6954_v3 = vld [vmem:[#allocation82_spill] sm:$0xff] }
 0x174   : > { %v1230_v58 = vadd.f32 %v1166_v37, %v942_v36  ;;  %v657_v41 = vadd.f32 %v6949_v27, %v573_v55  ;;  %v2526_v28 = vmul.f32 %v5278_v57, %v6952_v31  ;;  %v5559_v47 = vpop.eup %3709  ;;  %v2527_v44 = vmul.f32 %v6955_v23, %v6954_v3 }
 0x175   : > { %6953 = vst [vmem:[#allocation19_spill] sm:$0xff] %v5559_v47  ;;  %v1201_v60 = vadd.f32 %v1137_v61, %v913_v24  ;;  %v2524_v43 = vmul.f32 %v5278_v57, %v6956_v29  ;;  %v2525_v37 = vmul.f32 %v6955_v23, %v6957_v6  ;;  %v540_v7 = vmul.f32 %v5465_v0, %v6911_v8 }
 0x176   : > { %v1518_v36 = vadd.f32 %v1454_v21, %v1230_v58  ;;  %v945_v55 = vadd.f32 %v881_v19, %v657_v41  ;;  %v2590_v9 = vmax.f32 %v2526_v28, 1e-06  ;;  %v2591_v31 = vmax.f32 %v2527_v44, 1e-06 }
 0x177   : > { %v1489_v10 = vadd.f32 %v1425_v49, %v1201_v60  ;;  %v2588_v52 = vmax.f32 %v2524_v43, 1e-06  ;;  %v2589_v47 = vmax.f32 %v2525_v37, 1e-06  ;;  %v5569_v61 = vpop.eup %3711  ;;  %v624_v29 = vadd.f32 %v6949_v27, %v540_v7 }
 0x178   : > { %v5571_v24 = vmax.f32 %v1518_v36, 0.0  ;;  %v1233_v3 = vadd.f32 %v1169_v53, %v945_v55  ;;  %v2654_v17 = vmul.f32 %v2590_v9, %v2590_v9  ;;  %v2655_v6 = vmul.f32 %v2591_v31, %v2591_v31 }
 0x179   : > { %v5574_v57 = vmax.f32 %v1489_v10, 0.0  ;;  %v2652_v21 = vmul.f32 %v2588_v52, %v2588_v52  ;;  %v2653_v28 = vmul.f32 %v2589_v47, %v2589_v47  ;;  %v5577_v19 = vadd.f32 %v2459_v46, %v5493_v1 }
 0x17a   : > { %1887 = vmatmul.mubr.f32.gmra.mxu1 %v5571_v24  ;;  %v1521_v43 = vadd.f32 %v1457_v11, %v1233_v3  ;;  %v2718_v44 = vmul.f32 %v2654_v17, %v2590_v9  ;;  %v848_v49 = vmul.f32 %v5468_v48, %v6948_v42  ;;  %v2391_v53 = vrot.slane %v5536_v32, 1 }
 0x17b   : > { %1796 = vmatprep.mubr.f32.mxu0 %v5574_v57  ;;  %v2719_v7 = vmul.f32 %v2655_v6, %v2591_v31  ;;  %v2716_v10 = vmul.f32 %v2652_v21, %v2588_v52  ;;  %v2717_v58 = vmul.f32 %v2653_v28, %v2589_v47  ;;  %v1136_v1 = vmul.f32 %v5479_v13, %v6950_v62 }
 0x17c   : > { %v5584_v41 = vmax.f32 %v1521_v43, 0.0  ;;  %v912_v60 = vadd.f32 %v848_v49, %v624_v29  ;;  %v1424_v46 = vmul.f32 %v5496_v12, %v6951_v15  ;;  %v572_v37 = vmul.f32 %v5499_v30, %v6911_v8 }
 0x17d   : > { %v2783_v9 = vadd.f32 %v2719_v7, %v2718_v44  ;;  %v2780_v11 = vadd.f32 %v2717_v58, %v2716_v10  ;;  %v2497_v36 = vmax.f32 %v5534_v56, 1e-24  ;;  %v880_v55 = vmul.f32 %v5514_v39, %v6948_v42  ;;  %v6958_v58 = vld [vmem:[#allocation94_spill] sm:$0xff] }
 0x17e   : > { %1892 = vmatprep.mubr.f32.mxu1 %v5584_v41  ;;  %v1200_v52 = vadd.f32 %v1136_v1, %v912_v60  ;;  %v2461_v31 = vrot.slane %v5577_v19, 2  ;;  %v656_v3 = vadd.f32 %v6949_v27, %v572_v37  ;;  %v1168_v29 = vmul.f32 %v5517_v54, %v6950_v62 }
 0x17f   : > { %2784 = vadd.xlane.f32.xlu0 %v2783_v9  ;;  %2781 = vadd.xlane.f32.xlu1 %v2780_v11  ;;  %v543_v8 = vmul.f32 %v6930_v59, %v6919_v50  ;;  %v2392_v56 = vadd.f32 %v2391_v53, %v5536_v32  ;;  %v1456_v21 = vmul.f32 %v5521_v38, %v6951_v15  ;;  %v6960_v11 = vld [vmem:[#allocation67_spill] sm:$0xff]  ;;  %3713 = vrsqrt.f32 %v2497_v36 }
 0x180   : > { %v1488_v6 = vadd.f32 %v1424_v46, %v1200_v52  ;;  %v851_v42 = vmul.f32 %v5384_v26, %v6861_v20  ;;  %v944_v28 = vadd.f32 %v880_v55, %v656_v3  ;;  %v1139_v27 = vmul.f32 %v5387_v16, %v4713_v35  ;;  %v6959_v46 = vld [vmem:[#allocation91_spill] sm:$0xff] }
 0x181   : > { %v627_v43 = vadd.f32 %v4645_v34, %v543_v8  ;;  %v575_v62 = vmul.f32 %v6939_v22, %v6919_v50  ;;  %v1427_v32 = vmul.f32 %v5400_v40, %v4884_v4  ;;  %v883_v15 = vmul.f32 %v5425_v18, %v6861_v20  ;;  %v6961_v52 = vld [vmem:[#allocation75_spill] sm:$0xff] }
 0x182   : > { %v5614_v44 = vmax.f32 %v1488_v6, 0.0  ;;  %v1171_v49 = vmul.f32 %v5435_v2, %v4713_v35  ;;  %v1232_v53 = vadd.f32 %v1168_v29, %v944_v28  ;;  %v2532_v60 = vmul.f32 %v5569_v61, %v6958_v58 }
 0x183   : > { %v915_v7 = vadd.f32 %v851_v42, %v627_v43  ;;  %v659_v10 = vadd.f32 %v4645_v34, %v575_v62  ;;  %v1459_v1 = vmul.f32 %v5440_v25, %v4884_v4  ;;  %v2533_v9 = vmul.f32 %v5532_v33, %v6959_v46 }
 0x184   : > { %1797 = vmatmul.mubr.f32.gmra.mxu0 %v5614_v44  ;;  %v2534_v37 = vmul.f32 %v5569_v61, %v6960_v11  ;;  %v2535_v55 = vmul.f32 %v5532_v33, %v6961_v52  ;;  %v1520_v3 = vadd.f32 %v1456_v21, %v1232_v53  ;;  %v2596_v6 = vmax.f32 %v2532_v60, 1e-06 }
 0x185   : > { %v1203_v29 = vadd.f32 %v1139_v27, %v915_v7  ;;  %v947_v8 = vadd.f32 %v883_v15, %v659_v10  ;;  %v5636_v42 = vmul.f32 %v5449_v14, %v5449_v14  ;;  %v2597_v28 = vmax.f32 %v2533_v9, 1e-06 }
 0x186   : > { %v2598_v43 = vmax.f32 %v2534_v37, 1e-06  ;;  %v2599_v62 = vmax.f32 %v2535_v55, 1e-06  ;;  %v5638_v58 = vmax.f32 %v1520_v3, 0.0  ;;  %v2660_v17 = vmul.f32 %v2596_v6, %v2596_v6 }
 0x187   : > { %v1491_v46 = vadd.f32 %v1427_v32, %v1203_v29  ;;  %v1235_v47 = vadd.f32 %v1171_v49, %v947_v8  ;;  %v2661_v11 = vmul.f32 %v2597_v28, %v2597_v28  ;;  %v542_v21 = vmul.f32 %v5465_v0, %v6919_v50 }
 0x188   : > { %v2662_v63 = vmul.f32 %v2598_v43, %v2598_v43  ;;  %v2663_v51 = vmul.f32 %v2599_v62, %v2599_v62  ;;  %v2496_v27 = vmax.f32 %v2392_v56, 1e-24  ;;  %1893 = vmatmul.mubr.f32.gmra.mxu1 %v5638_v58  ;;  %v2724_v7 = vmul.f32 %v2660_v17, %v2596_v6 }
 0x189   : > { %v5643_v15 = vmax.f32 %v1491_v46, 0.0  ;;  %v1523_v53 = vadd.f32 %v1459_v1, %v1235_v47  ;;  %v2725_v10 = vmul.f32 %v2661_v11, %v2597_v28  ;;  %v626_v32 = vadd.f32 %v4645_v34, %v542_v21  ;;  %v6962_v28 = vld [vmem:[#allocation71_spill] sm:$0xff]  ;;  %v6965_v21 = vld [vmem:[#allocation32_spill] sm:$0xff] }
 0x18a   : > { %v2726_v60 = vmul.f32 %v2662_v63, %v2598_v43  ;;  %v2727_v9 = vmul.f32 %v2663_v51, %v2599_v62  ;;  %v5647_v49 = vadd.f32 %v2461_v31, %v5577_v19  ;;  %v850_v56 = vmul.f32 %v5468_v48, %v6861_v20  ;;  %v6963_v43 = vld [vmem:[#allocation79_spill] sm:$0xff] }
 0x18b   : > { %1802 = vmatprep.mubr.f32.mxu0 %v5643_v15  ;;  %v5650_v37 = vmax.f32 %v1523_v53, 0.0  ;;  %v5656_v47 = vmul.f32 %v5476_v5, %v5476_v5  ;;  %v2792_v17 = vadd.f32 %v2725_v10, %v2724_v7  ;;  %v1138_v51 = vmul.f32 %v5479_v13, %v4713_v35  ;;  %v6964_v46 = vld [vmem:[#allocation35_spill] sm:$0xff]  ;;  %v6966_v53 = vld [vmem:[#allocation77_spill] sm:$0xff]  ;;  %v6967_v10 = vld [vmem:[#allocation86_spill] sm:$0xff] }
 0x18c   : > { %v2795_v63 = vadd.f32 %v2727_v9, %v2726_v60  ;;  %v5662_v19 = vmul.f32 %v5538_v45, %v5538_v45  ;;  %v914_v36 = vadd.f32 %v850_v56, %v626_v32  ;;  %v1426_v31 = vmul.f32 %v5496_v12, %v4884_v4  ;;  %v6969_v56 = vld [vmem:[#allocation38_spill] sm:$0xff] }
 0x18d   : > { %1898 = vmatprep.mubr.f32.mxu1 %v5650_v37  ;;  %v574_v1 = vmul.f32 %v5499_v30, %v6919_v50  ;;  %3715 = vrsqrt.f32 %v2496_v27  ;;  %v2311_v52 = vmul.f32 %v5574_v57, %v5574_v57  ;;  %2793 = vadd.xlane.f32.xlu0 %v2792_v17  ;;  %v882_v55 = vmul.f32 %v5514_v39, %v6861_v20 }
 0x18e   : > { %2796 = vadd.xlane.f32.xlu1 %v2795_v63  ;;  %v1170_v3 = vmul.f32 %v5517_v54, %v4713_v35  ;;  %v1202_v29 = vadd.f32 %v1138_v51, %v914_v36  ;;  %v1458_v6 = vmul.f32 %v5521_v38, %v4884_v4  ;;  %v545_v50 = vmul.f32 %v6930_v59, %v6962_v28  ;;  %v6970_v51 = vld [vmem:[#allocation68_spill] sm:$0xff] }
 0x18f   : > { %v658_v8 = vadd.f32 %v4645_v34, %v574_v1  ;;  %v853_v62 = vmul.f32 %v5384_v26, %v6963_v43  ;;  %v1141_v11 = vmul.f32 %v5387_v16, %v6964_v46  ;;  %v1429_v20 = vmul.f32 %v5400_v40, %v6965_v21  ;;  %v6968_v40 = vld [vmem:[#allocation59_spill] sm:$0xff] }
 0x190   : > { %v577_v35 = vmul.f32 %v6939_v22, %v6962_v28  ;;  %v1490_v27 = vadd.f32 %v1426_v31, %v1202_v29  ;;  %v629_v7 = vadd.f32 %v6966_v53, %v545_v50  ;;  %v885_v4 = vmul.f32 %v5425_v18, %v6963_v43  ;;  %v6971_v31 = vld [vmem:[#allocation72_spill] sm:$0xff] }
 0x191   : > { %v946_v34 = vadd.f32 %v882_v55, %v658_v8  ;;  %v1173_v26 = vmul.f32 %v5435_v2, %v6964_v46  ;;  %v1461_v16 = vmul.f32 %v5440_v25, %v6965_v21  ;;  %v2528_v60 = vmul.f32 %v6968_v40, %v6967_v10 }
 0x192   : > { %v661_v59 = vadd.f32 %v6966_v53, %v577_v35  ;;  %v5698_v9 = vmax.f32 %v1490_v27, 0.0  ;;  %v917_v32 = vadd.f32 %v853_v62, %v629_v7  ;;  %v2529_v17 = vmul.f32 %v6955_v23, %v6969_v56 }
 0x193   : > { %v1234_v22 = vadd.f32 %v1170_v3, %v946_v34  ;;  %v2592_v18 = vmax.f32 %v2528_v60, 1e-06  ;;  %v2536_v36 = vmul.f32 %v5569_v61, %v6970_v51  ;;  %v2537_v2 = vmul.f32 %v5532_v33, %v6971_v31 }
 0x194   : > { %v949_v63 = vadd.f32 %v885_v4, %v661_v59  ;;  %v2313_v25 = vmul.f32 %v5643_v15, %v5643_v15  ;;  %1803 = vmatmul.mubr.f32.gmra.mxu0 %v5698_v9  ;;  %v1205_v55 = vadd.f32 %v1141_v11, %v917_v32  ;;  %v2593_v3 = vmax.f32 %v2529_v17, 1e-06  ;;  %v5712_v4 = vpop.eup %3713 }
 0x195   : > { %v1522_v1 = vadd.f32 %v1458_v6, %v1234_v22  ;;  %v2656_v8 = vmul.f32 %v2592_v18, %v2592_v18  ;;  %v2600_v50 = vmax.f32 %v2536_v36, 1e-06  ;;  %v2601_v62 = vmax.f32 %v2537_v2, 1e-06 }
 0x196   : > { %v1237_v29 = vadd.f32 %v1173_v26, %v949_v63  ;;  %v2411_v35 = vadd.f32 %v2311_v52, %v5636_v42  ;;  %v1493_v34 = vadd.f32 %v1429_v20, %v1205_v55  ;;  %v2657_v7 = vmul.f32 %v2593_v3, %v2593_v3 }
 0x197   : > { %v5710_v27 = vmax.f32 %v1522_v1, 0.0  ;;  %v2720_v10 = vmul.f32 %v2656_v8, %v2592_v18  ;;  %v2664_v60 = vmul.f32 %v2600_v50, %v2600_v50  ;;  %v2665_v56 = vmul.f32 %v2601_v62, %v2601_v62  ;;  %v6972_v8 = vld [vmem:[#allocation46_spill] sm:$0xff] }
 0x198   : > { %v1525_v59 = vadd.f32 %v1461_v16, %v1237_v29  ;;  %v2412_v51 = vadd.f32 %v2411_v35, %v2313_v25  ;;  %v5715_v6 = vmax.f32 %v1493_v34, 0.0  ;;  %v2721_v11 = vmul.f32 %v2657_v7, %v2593_v3 }
 0x199   : > { %1899 = vmatmul.mubr.f32.gmra.mxu1 %v5710_v27  ;;  %v544_v26 = vmul.f32 %v5465_v0, %v6962_v28  ;;  %v2728_v52 = vmul.f32 %v2664_v60, %v2600_v50  ;;  %v2729_v20 = vmul.f32 %v2665_v56, %v2601_v62  ;;  %v852_v22 = vmul.f32 %v5468_v48, %v6963_v43  ;;  %v6978_v60 = vld [vmem:[#allocation24_spill] sm:$0xff] }
 0x19a   : > { %v5719_v42 = vmax.f32 %v1525_v59, 0.0  ;;  %v5723_v16 = vpop.eup %3715  ;;  %v2310_v32 = vmul.f32 %v5614_v44, %v5614_v44  ;;  %1808 = vmatprep.mubr.f32.mxu0 %v5715_v6  ;;  %v2315_v17 = vmul.f32 %v5715_v6, %v5715_v6  ;;  %v2786_v63 = vadd.f32 %v2721_v11, %v2720_v10  ;;  %v6976_v59 = vld [vmem:[#allocation50_spill] sm:$0xff]  ;;  %v6979_v11 = vld [vmem:[#allocation56_spill] sm:$0xff] }
 0x19b   : > { %v628_v0 = vadd.f32 %v6966_v53, %v544_v26  ;;  %v2312_v18 = vmul.f32 %v5698_v9, %v5698_v9  ;;  %v2798_v36 = vadd.f32 %v2729_v20, %v2728_v52  ;;  %v1140_v48 = vmul.f32 %v5479_v13, %v6964_v46  ;;  %v6977_v10 = vld [vmem:[#allocation74_spill] sm:$0xff]  ;;  %v6981_v20 = vld [vmem:[#allocation27_spill] sm:$0xff] }
 0x19c   : > { %1904 = vmatprep.mubr.f32.mxu1 %v5719_v42  ;;  %v1428_v31 = vmul.f32 %v5496_v12, %v6965_v21  ;;  %v2413_v2 = vadd.f32 %v2412_v51, %v2315_v17  ;;  %2787 = vadd.xlane.f32.xlu0 %v2786_v63  ;;  %v576_v1 = vmul.f32 %v5499_v30, %v6962_v28  ;;  %v6973_v12 = vld [vmem:[#allocation22_spill] sm:$0xff]  ;;  %v6975_v28 = vld [vmem:[#allocation23_spill] sm:$0xff] }
 0x19d   : > { %v916_v25 = vadd.f32 %v852_v22, %v628_v0  ;;  %v884_v55 = vmul.f32 %v5514_v39, %v6963_v43  ;;  %v2340_v3 = vmul.f32 %v5571_v24, %v5571_v24  ;;  %v2402_v29 = vadd.f32 %v2310_v32, %v5662_v19  ;;  %2799 = vadd.xlane.f32.xlu1 %v2798_v36  ;;  %v6974_v30 = vld [vmem:[#allocation66_spill] sm:$0xff]  ;;  %v6982_v32 = vld [vmem:[#allocation36_spill] sm:$0xff]  ;;  %v6983_v63 = vld [vmem:[#allocation55_spill] sm:$0xff] }
 0x19e   : > { %v1172_v13 = vmul.f32 %v5517_v54, %v6964_v46  ;;  %v547_v50 = vmul.f32 %v6973_v12, %v6972_v8  ;;  %v2414_v62 = vrot.slane %v2413_v2, 4  ;;  %v660_v34 = vadd.f32 %v6966_v53, %v576_v1  ;;  %v6980_v53 = vld [vmem:[#allocation81_spill] sm:$0xff] }
 0x19f   : > { %v1204_v35 = vadd.f32 %v1140_v48, %v916_v25  ;;  %v855_v7 = vmul.f32 %v6975_v28, %v6974_v30  ;;  %v2403_v39 = vadd.f32 %v2402_v29, %v2312_v18  ;;  %v1460_v43 = vmul.f32 %v5521_v38, %v6965_v21  ;;  %v6984_v25 = vld [vmem:[#allocation54_spill] sm:$0xff] }
 0x1a0   : > { %v631_v19 = vadd.f32 %v6976_v59, %v547_v50  ;;  %v1143_v56 = vmul.f32 %v6978_v60, %v6977_v10  ;;  %v2415_v54 = vadd.f32 %v2414_v62, %v2413_v2  ;;  %v948_v51 = vadd.f32 %v884_v55, %v660_v34 }
 0x1a1   : > { %v1492_v46 = vadd.f32 %v1428_v31, %v1204_v35  ;;  %v2540_v26 = vmul.f32 %v5723_v16, %v6979_v11  ;;  %v1431_v22 = vmul.f32 %v6981_v20, %v6980_v53  ;;  %v2541_v17 = vmul.f32 %v5712_v4, %v6982_v32 }
 0x1a2   : > { %v919_v52 = vadd.f32 %v855_v7, %v631_v19  ;;  %v2542_v38 = vmul.f32 %v5723_v16, %v6983_v63  ;;  %v2416_v21 = vrot.slane %v2415_v54, 2  ;;  %v1236_v18 = vadd.f32 %v1172_v13, %v948_v51 }
 0x1a3   : > { %v5765_v0 = vmax.f32 %v1492_v46, 0.0  ;;  %v2604_v36 = vmax.f32 %v2540_v26, 1e-06  ;;  %v2343_v48 = vmul.f32 %v5584_v41, %v5584_v41  ;;  %v2605_v2 = vmax.f32 %v2541_v17, 1e-06 }
 0x1a4   : > { %v1207_v31 = vadd.f32 %v1143_v56, %v919_v52  ;;  %v2543_v1 = vmul.f32 %v5712_v4, %v6984_v25  ;;  %v2417_v55 = vadd.f32 %v2416_v21, %v2415_v54  ;;  %v1524_v12 = vadd.f32 %v1460_v43, %v1236_v18  ;;  %v6986_v25 = vld [vmem:[#allocation25_spill] sm:$0xff] }
 0x1a5   : > { %1809 = vmatmul.mubr.f32.gmra.mxu0 %v5765_v0  ;;  %v2314_v29 = vmul.f32 %v5765_v0, %v5765_v0  ;;  %v2668_v50 = vmul.f32 %v2604_v36, %v2604_v36  ;;  %v2342_v13 = vmul.f32 %v5638_v58, %v5638_v58  ;;  %v2669_v35 = vmul.f32 %v2605_v2, %v2605_v2 }
 0x1a6   : > { %v1495_v62 = vadd.f32 %v1431_v22, %v1207_v31  ;;  %v2606_v34 = vmax.f32 %v2542_v38, 1e-06  ;;  %v2418_v28 = vrot.slane %v2417_v55, 1  ;;  %v5776_v19 = vmax.f32 %v1524_v12, 0.0  ;;  %v6988_v12 = vld [vmem:[#allocation53_spill] sm:$0xff] }
 0x1a7   : > { %v2404_v7 = vadd.f32 %v2403_v39, %v2314_v29  ;;  %v2732_v60 = vmul.f32 %v2668_v50, %v2604_v36  ;;  %v2345_v56 = vmul.f32 %v5650_v37, %v5650_v37  ;;  %v2733_v46 = vmul.f32 %v2669_v35, %v2605_v2  ;;  %v6985_v36 = vld [vmem:[#allocation69_spill] sm:$0xff] }
 0x1a8   : > { %v5780_v54 = vmax.f32 %v1495_v62, 0.0  ;;  %v2607_v51 = vmax.f32 %v2543_v1, 1e-06  ;;  %v2344_v43 = vmul.f32 %v5710_v27, %v5710_v27  ;;  %v2419_v11 = vadd.f32 %v2418_v28, %v2417_v55  ;;  %1905 = vmatmul.mubr.f32.gmra.mxu1 %v5776_v19  ;;  %v6987_v55 = vld [vmem:[#allocation26_spill] sm:$0xff] }
 0x1a9   : > { %v2405_v26 = vrot.slane %v2404_v7, 4  ;;  %v2670_v52 = vmul.f32 %v2606_v34, %v2606_v34  ;;  %v2483_v39 = vadd.f32 %v2343_v48, %v5656_v47  ;;  %v2804_v22 = vadd.f32 %v2733_v46, %v2732_v60 }
 0x1aa   : > { %1814 = vmatprep.mubr.f32.mxu0 %v5780_v54  ;;  %v2317_v20 = vmul.f32 %v5780_v54, %v5780_v54  ;;  %v2671_v32 = vmul.f32 %v2607_v51, %v2607_v51  ;;  %v2474_v17 = vadd.f32 %v2342_v13, %v2340_v3  ;;  %v2499_v63 = vmax.f32 %v2419_v11, 1e-24  ;;  %v6993_v11 = vld [vmem:[#allocation88_spill] sm:$0xff] }
 0x1ab   : > { %v2406_v38 = vadd.f32 %v2405_v26, %v2404_v7  ;;  %v2734_v21 = vmul.f32 %v2670_v52, %v2606_v34  ;;  %v2484_v18 = vadd.f32 %v2483_v39, %v2345_v56  ;;  %2805 = vadd.xlane.f32.xlu0 %v2804_v22  ;;  %v546_v1 = vmul.f32 %v6986_v25, %v6972_v8  ;;  %v6989_v8 = vld [vmem:[#allocation28_spill] sm:$0xff]  ;;  %v6990_v7 = vld [vmem:[#allocation29_spill] sm:$0xff]  ;;  %v6995_v22 = vld [vmem:[#allocation30_spill] sm:$0xff] }
 0x1ac   : > { %v2429_v31 = vadd.f32 %v6985_v36, %v2317_v20  ;;  %v2735_v2 = vmul.f32 %v2671_v32, %v2607_v51  ;;  %v2475_v47 = vadd.f32 %v2474_v17, %v2344_v43  ;;  %3717 = vrsqrt.f32 %v2499_v63  ;;  %v6991_v56 = vld [vmem:[#allocation52_spill] sm:$0xff]  ;;  %v6992_v51 = vld [vmem:[#allocation90_spill] sm:$0xff]  ;;  %v6994_v39 = vld [vmem:[#allocation33_spill] sm:$0xff] }
 0x1ad   : > { %v2407_v48 = vrot.slane %v2406_v38, 2  ;;  %v854_v29 = vmul.f32 %v6987_v55, %v6974_v30  ;;  %v2347_v3 = vmul.f32 %v5719_v42, %v5719_v42  ;;  %v630_v62 = vadd.f32 %v6976_v59, %v546_v1 }
 0x1ae   : > { %v2430_v50 = vadd.f32 %v2429_v31, %v6988_v12  ;;  %v2807_v13 = vadd.f32 %v2735_v2, %v2734_v21  ;;  %v2346_v34 = vmul.f32 %v5776_v19, %v5776_v19  ;;  %v1142_v28 = vmul.f32 %v6989_v8, %v6977_v10 }
 0x1af   : > { %v2408_v35 = vadd.f32 %v2407_v48, %v2406_v38  ;;  %v1430_v60 = vmul.f32 %v6990_v7, %v6980_v53  ;;  %v918_v46 = vadd.f32 %v854_v29, %v630_v62  ;;  %v2530_v43 = vmul.f32 %v6968_v40, %v6992_v51  ;;  %v6998_v51 = vld [vmem:[#allocation21_spill] sm:$0xff] }
 0x1b0   : > { %v2431_v30 = vadd.f32 %v2430_v50, %v6991_v56  ;;  %2808 = vadd.xlane.f32.xlu1 %v2807_v13  ;;  %v2531_v59 = vmul.f32 %v6955_v23, %v6993_v11  ;;  %v2476_v52 = vadd.f32 %v2475_v47, %v2346_v34  ;;  %v2538_v20 = vmul.f32 %v5569_v61, %v6994_v39  ;;  %v6996_v34 = vld [vmem:[#allocation43_spill] sm:$0xff]  ;;  %v6997_v56 = vld [vmem:[#allocation62_spill] sm:$0xff] }
 0x1b1   : > { %v2409_v26 = vrot.slane %v2408_v35, 1  ;;  %v2539_v10 = vmul.f32 %v5532_v33, %v6995_v22  ;;  %v1206_v53 = vadd.f32 %v1142_v28, %v918_v46  ;;  %v2594_v17 = vmax.f32 %v2530_v43, 1e-06 }
 0x1b2   : > { %v2432_v32 = vrot.slane %v2431_v30, 4  ;;  %v2595_v63 = vmax.f32 %v2531_v59, 1e-06  ;;  %v2485_v38 = vadd.f32 %v2484_v18, %v2347_v3  ;;  %v2602_v36 = vmax.f32 %v2538_v20, 1e-06  ;;  %v7000_v59 = vld [vmem:[#allocation39_spill] sm:$0xff] }
 0x1b3   : > { %v2410_v21 = vadd.f32 %v2409_v26, %v2408_v35  ;;  %v2603_v31 = vmax.f32 %v2539_v10, 1e-06  ;;  %v1494_v2 = vadd.f32 %v1430_v60, %v1206_v53  ;;  %v2658_v25 = vmul.f32 %v2594_v17, %v2594_v17  ;;  %v7001_v20 = vld [vmem:[#allocation18_spill] sm:$0xff] }
 0x1b4   : > { %v2433_v40 = vadd.f32 %v2432_v32, %v2431_v30  ;;  %v2659_v23 = vmul.f32 %v2595_v63, %v2595_v63  ;;  %v2477_v47 = vrot.slane %v2476_v52, 4  ;;  %v2666_v48 = vmul.f32 %v2602_v36, %v2602_v36 }
 0x1b5   : > { %v2498_v1 = vmax.f32 %v2410_v21, 1e-24  ;;  %v2667_v55 = vmul.f32 %v2603_v31, %v2603_v31  ;;  %v5813_v29 = vmax.f32 %v1494_v2, 0.0  ;;  %v2722_v33 = vmul.f32 %v2658_v25, %v2594_v17 }
 0x1b6   : > { %v2434_v61 = vrot.slane %v2433_v40, 2  ;;  %v2723_v12 = vmul.f32 %v2659_v23, %v2595_v63  ;;  %v2463_v50 = vrot.slane %v5647_v49, 1  ;;  %v2730_v18 = vmul.f32 %v2666_v48, %v2602_v36  ;;  %v7003_v63 = vld [vmem:[#allocation57_spill] sm:$0xff]  ;;  %v7004_v23 = vld [vmem:[#allocation15_spill] sm:$0xff]  ;;  %v7005_v48 = vld [vmem:[#allocation48_spill] sm:$0xff] }
 0x1b7   : > { %3719 = vrsqrt.f32 %v2498_v1  ;;  %v2731_v3 = vmul.f32 %v2667_v55, %v2603_v31  ;;  %1815 = vmatmul.mubr.f32.gmra.mxu0 %v5813_v29  ;;  %v2316_v62 = vmul.f32 %v5813_v29, %v5813_v29  ;;  %v2544_v8 = vmul.f32 %v5723_v16, %v6996_v34 }
 0x1b8   : > { %v2435_v13 = vadd.f32 %v2434_v61, %v2433_v40  ;;  %v2789_v35 = vadd.f32 %v2723_v12, %v2722_v33  ;;  %v2486_v28 = vrot.slane %v2485_v38, 4  ;;  %v2478_v7 = vadd.f32 %v2477_v47, %v2476_v52  ;;  %v7006_v61 = vld [vmem:[#allocation96_spill] sm:$0xff] }
 0x1b9   : > { %v2801_v60 = vadd.f32 %v2731_v3, %v2730_v18  ;;  %v2545_v30 = vmul.f32 %v5712_v4, %v6997_v56  ;;  %v3718_v46 = vpop.eup %3717  ;;  %v6999_v43 = vmax.f32 %v6998_v51, 1e-24  ;;  %v2420_v26 = vadd.f32 %v7000_v59, %v2316_v62 }
 0x1ba   : > { %v2436_v11 = vrot.slane %v2435_v13, 1  ;;  %2790 = vadd.xlane.f32.xlu0 %v2789_v35  ;;  %v2608_v39 = vmax.f32 %v2544_v8, 1e-06  ;;  %v7002_v22 = vrot.slane %v7001_v20, 1  ;;  %v2464_v32 = vadd.f32 %v2463_v50, %v5647_v49 }
 0x1bb   : > { %3721 = vrsqrt.f32 %v6999_v43  ;;  %2802 = vadd.xlane.f32.xlu1 %v2801_v60  ;;  %v2609_v52 = vmax.f32 %v2545_v30, 1e-06  ;;  %v2549_v53 = vmul.f32 %v3718_v46, %v5449_v14  ;;  %v2421_v21 = vadd.f32 %v2420_v26, %v7003_v63 }
 0x1bc   : > { %v2473_v10 = vadd.f32 %v7002_v22, %v7001_v20  ;;  %v2437_v17 = vadd.f32 %v2436_v11, %v2435_v13  ;;  %v2672_v36 = vmul.f32 %v2608_v39, %v2608_v39  ;;  %v2551_v31 = vmul.f32 %v3718_v46, %v5574_v57 }
 0x1bd   : > { %v2487_v40 = vadd.f32 %v2486_v28, %v2485_v38  ;;  %v2479_v2 = vrot.slane %v2478_v7, 2  ;;  %v2673_v25 = vmul.f32 %v2609_v52, %v2609_v52  ;;  %v2546_v1 = vmul.f32 %v5723_v16, %v7004_v23 }
 0x1be   : > { %v2501_v47 = vmax.f32 %v2437_v17, 1e-24  ;;  %v2422_v55 = vadd.f32 %v2421_v21, %v7005_v48  ;;  %v2736_v49 = vmul.f32 %v2672_v36, %v2608_v39  ;;  %v2547_v33 = vmul.f32 %v5712_v4, %v7006_v61  ;;  %v7007_v48 = vld [vmem:[#allocation95_spill] sm:$0xff] }
 0x1bf   : > { %v2505_v14 = vmax.f32 %v2473_v10, 1e-24  ;;  %v2737_v12 = vmul.f32 %v2673_v25, %v2609_v52  ;;  %v2613_v50 = vmax.f32 %v2549_v53, 1e-06  ;;  %v2504_v18 = vmax.f32 %v2464_v32, 1e-24 }
 0x1c0   : > { %v2423_v3 = vrot.slane %v2422_v55, 4  ;;  %v2615_v13 = vmax.f32 %v2551_v31, 1e-06  ;;  %v2553_v57 = vmul.f32 %v3718_v46, %v5643_v15  ;;  %v2488_v38 = vrot.slane %v2487_v40, 2 }
 0x1c1   : > { %v2480_v62 = vadd.f32 %v2479_v2, %v2478_v7  ;;  %v2810_v35 = vadd.f32 %v2737_v12, %v2736_v49  ;;  %3723 = vrsqrt.f32 %v2501_v47  ;;  %v2610_v34 = vmax.f32 %v2546_v1, 1e-06 }
 0x1c2   : > { %v2424_v16 = vadd.f32 %v2423_v3, %v2422_v55  ;;  %v2611_v8 = vmax.f32 %v2547_v33, 1e-06  ;;  %3725 = vrsqrt.f32 %v2505_v14  ;;  %v2677_v28 = vmul.f32 %v2613_v50, %v2613_v50  ;;  %v7008_v14 = vld [vmem:[#allocation93_spill] sm:$0xff]  ;;  %v7010_v3 = vld [vmem:[#allocation44_spill] sm:$0xff] }
 0x1c3   : > { %2811 = vadd.xlane.f32.xlu0 %v2810_v35  ;;  %3727 = vrsqrt.f32 %v2504_v18  ;;  %v2679_v56 = vmul.f32 %v2615_v13, %v2615_v13  ;;  %v2617_v30 = vmax.f32 %v2553_v57, 1e-06  ;;  %v2489_v51 = vadd.f32 %v2488_v38, %v2487_v40  ;;  %v7011_v57 = vld [vmem:[#allocation76_spill] sm:$0xff] }
 0x1c4   : > { %v3720_v60 = vpop.eup %3719  ;;  %v2425_v4 = vrot.slane %v2424_v16, 2  ;;  %v2481_v11 = vrot.slane %v2480_v62, 1  ;;  %v2674_v26 = vmul.f32 %v2610_v34, %v2610_v34  ;;  %v2675_v39 = vmul.f32 %v2611_v8, %v2611_v8 }
 0x1c5   : > { %v2548_v43 = vmul.f32 %v3720_v60, %v5538_v45  ;;  %v2550_v15 = vmul.f32 %v3720_v60, %v5614_v44  ;;  %v2552_v7 = vmul.f32 %v3720_v60, %v5698_v9  ;;  %v2741_v10 = vmul.f32 %v2677_v28, %v2613_v50 }
 0x1c6   : > { %v2426_v59 = vadd.f32 %v2425_v4, %v2424_v16  ;;  %v2743_v17 = vmul.f32 %v2679_v56, %v2615_v13  ;;  %v2681_v63 = vmul.f32 %v2617_v30, %v2617_v30  ;;  %v2555_v21 = vmul.f32 %v3718_v46, %v5715_v6  ;;  %v7009_v6 = vld [vmem:[#allocation19_spill] sm:$0xff] }
 0x1c7   : > { %v2612_v22 = vmax.f32 %v2548_v43, 1e-06  ;;  %v2614_v32 = vmax.f32 %v2550_v15, 1e-06  ;;  %v2616_v52 = vmax.f32 %v2552_v7, 1e-06  ;;  %v2554_v9 = vmul.f32 %v3720_v60, %v5765_v0 }
 0x1c8   : > { %v5842_v20 = vpop.eup %3721  ;;  %v2427_v53 = vrot.slane %v2426_v59, 1  ;;  %v2490_v31 = vrot.slane %v2489_v51, 1  ;;  %v2482_v40 = vadd.f32 %v2481_v11, %v2480_v62  ;;  %v2738_v25 = vmul.f32 %v2674_v26, %v2610_v34  ;;  %v7012_v7 = vld [vmem:[#allocation41_spill] sm:$0xff] }
 0x1c9   : > { %v2676_v45 = vmul.f32 %v2612_v22, %v2612_v22  ;;  %v2678_v36 = vmul.f32 %v2614_v32, %v2614_v32  ;;  %v2680_v44 = vmul.f32 %v2616_v52, %v2616_v52  ;;  %v2739_v47 = vmul.f32 %v2675_v39, %v2611_v8  ;;  %v7013_v39 = vld [vmem:[#allocation42_spill] sm:$0xff] }
 0x1ca   : > { %v2428_v2 = vadd.f32 %v2427_v53, %v2426_v59  ;;  %v2564_v55 = vmul.f32 %v5842_v20, %v7007_v48  ;;  %v2745_v61 = vmul.f32 %v2681_v63, %v2617_v30  ;;  %v2619_v33 = vmax.f32 %v2555_v21, 1e-06  ;;  %v7017_v48 = vld [vmem:[#allocation49_spill] sm:$0xff] }
 0x1cb   : > { %v2740_v23 = vmul.f32 %v2676_v45, %v2612_v22  ;;  %v2742_v1 = vmul.f32 %v2678_v36, %v2614_v32  ;;  %v2565_v46 = vmul.f32 %v7009_v6, %v7008_v14  ;;  %v2744_v18 = vmul.f32 %v2680_v44, %v2616_v52 }
 0x1cc   : > { %v2500_v49 = vmax.f32 %v2428_v2, 1e-24  ;;  %v2618_v0 = vmax.f32 %v2554_v9, 1e-06  ;;  %v2566_v13 = vmul.f32 %v5842_v20, %v7010_v3  ;;  %v2567_v38 = vmul.f32 %v7009_v6, %v7011_v57  ;;  %v7015_v9 = vld [vmem:[#allocation40_spill] sm:$0xff] }
 0x1cd   : > { %v2816_v12 = vadd.f32 %v2741_v10, %v2740_v23  ;;  %v2819_v50 = vadd.f32 %v2743_v17, %v2742_v1  ;;  %v2491_v16 = vadd.f32 %v2490_v31, %v2489_v51  ;;  %v2506_v34 = vmax.f32 %v2482_v40, 1e-24  ;;  %v7016_v40 = vld [vmem:[#allocation37_spill] sm:$0xff]  ;;  %v7018_v57 = vld [vmem:[#allocation80_spill] sm:$0xff] }
 0x1ce   : > { %3729 = vrsqrt.f32 %v2500_v49  ;;  %v3724_v62 = vpop.eup %3723  ;;  %v2813_v8 = vadd.f32 %v2739_v47, %v2738_v25  ;;  %v2628_v28 = vmax.f32 %v2564_v55, 1e-06  ;;  %v2822_v4 = vadd.f32 %v2745_v61, %v2744_v18  ;;  %v5866_v25 = vpop.f32.mrf.mxu0 }
 0x1cf   : > { %2817 = vadd.xlane.f32.xlu1 %v2816_v12  ;;  %2820 = vadd.xlane.f32.xlu0 %v2819_v50  ;;  %v5854_v35 = vpop.eup %3725  ;;  %v2682_v56 = vmul.f32 %v2618_v0, %v2618_v0  ;;  %v2683_v30 = vmul.f32 %v2619_v33, %v2619_v33  ;;  %v2629_v43 = vmax.f32 %v2565_v46, 1e-06  ;;  %v2557_v15 = vmul.f32 %v3724_v62, %v5780_v54  ;;  %v7014_v54 = vld [vmem:[#allocation89_spill] sm:$0xff] }
 0x1d0   : > { %v5856_v60 = vpop.eup %3727  ;;  %v2559_v11 = vmul.f32 %v3724_v62, %v7012_v7  ;;  %v2630_v59 = vmax.f32 %v2566_v13, 1e-06  ;;  %v2631_v26 = vmax.f32 %v2567_v38, 1e-06  ;;  %v2561_v22 = vmul.f32 %v3724_v62, %v7013_v39  ;;  %v5882_v3 = vpop.f32.mrf.mxu0 }
 0x1d1   : > { %v2507_v51 = vmax.f32 %v2491_v16, 1e-24  ;;  %3731 = vrsqrt.f32 %v2506_v34  ;;  %v2746_v10 = vmul.f32 %v2682_v56, %v2618_v0  ;;  %v2747_v32 = vmul.f32 %v2683_v30, %v2619_v33  ;;  %v7020_v34 = vld [vmem:[#allocation47_spill] sm:$0xff]  ;;  %v7022_v30 = vld [vmem:[#allocation58_spill] sm:$0xff] }
 0x1d2   : > { %v2692_v52 = vmul.f32 %v2628_v28, %v2628_v28  ;;  %v2693_v53 = vmul.f32 %v2629_v43, %v2629_v43  ;;  %v2621_v17 = vmax.f32 %v2557_v15, 1e-06  ;;  %v2623_v63 = vmax.f32 %v2559_v11, 1e-06  ;;  %v7023_v15 = vld [vmem:[#allocation34_spill] sm:$0xff] }
 0x1d3   : > { %2814 = vadd.xlane.f32.xlu1 %v2813_v8  ;;  %2823 = vadd.xlane.f32.xlu0 %v2822_v4  ;;  %v2694_v21 = vmul.f32 %v2630_v59, %v2630_v59  ;;  %v2695_v45 = vmul.f32 %v2631_v26, %v2631_v26  ;;  %v2625_v36 = vmax.f32 %v2561_v22, 1e-06  ;;  %v2563_v44 = vmul.f32 %v3724_v62, %v7014_v54  ;;  %v7019_v62 = vld [vmem:[#allocation87_spill] sm:$0xff]  ;;  %v7021_v4 = vld [vmem:[#allocation61_spill] sm:$0xff] }
 0x1d4   : > { %v2568_v31 = vmul.f32 %v5842_v20, %v7015_v9  ;;  %v2569_v2 = vmul.f32 %v7009_v6, %v7016_v40  ;;  %3733 = vrsqrt.f32 %v2507_v51  ;;  %v5868_v23 = vadd.f32 %v2747_v32, %v2746_v10  ;;  %v7025_v10 = vld [vmem:[#allocation92_spill] sm:$0xff] }
 0x1d5   : > { %v5870_v1 = vmul.f32 %v2692_v52, %v2628_v28  ;;  %v5872_v47 = vmul.f32 %v2693_v53, %v2629_v43  ;;  %v2572_v55 = vmul.f32 %v5856_v60, %v7017_v48  ;;  %v2685_v49 = vmul.f32 %v2621_v17, %v2621_v17  ;;  %v5898_v53 = vpop.f32.mrf.mxu0 }
 0x1d6   : > { %v2687_v61 = vmul.f32 %v2623_v63, %v2623_v63  ;;  %v5876_v33 = vmul.f32 %v2694_v21, %v2630_v59  ;;  %v5878_v14 = vmul.f32 %v2695_v45, %v2631_v26  ;;  %v2689_v12 = vmul.f32 %v2625_v36, %v2625_v36  ;;  %v7024_v26 = vld [vmem:[#allocation31_spill] sm:$0xff] }
 0x1d7   : > { %v5880_v50 = vmax.f32 %v2563_v44, 1e-06  ;;  %v2632_v18 = vmax.f32 %v2568_v31, 1e-06  ;;  %v2633_v0 = vmax.f32 %v2569_v2, 1e-06  ;;  %v2573_v8 = vmul.f32 %v5854_v35, %v7020_v34 }
 0x1d8   : > { %v2636_v28 = vmax.f32 %v2572_v55, 1e-06  ;;  %v2574_v56 = vmul.f32 %v5856_v60, %v7021_v4  ;;  %v2575_v43 = vmul.f32 %v5854_v35, %v7022_v30  ;;  %v2570_v7 = vmul.f32 %v5842_v20, %v7023_v15  ;;  %v7026_v2 = vld [vmem:[#allocation45_spill] sm:$0xff]  ;;  %v7027_v55 = vld [vmem:[#allocation51_spill] sm:$0xff] }
 0x1d9   : > { %v2571_v39 = vmul.f32 %v7009_v6, %v7024_v26  ;;  %v2749_v22 = vmul.f32 %v2685_v49, %v2621_v17  ;;  %v2751_v51 = vmul.f32 %v2687_v61, %v2623_v63  ;;  %v2696_v52 = vmul.f32 %v2632_v18, %v2632_v18 }
 0x1da   : > { %v2637_v44 = vmax.f32 %v2573_v8, 1e-06  ;;  %v2638_v20 = vmax.f32 %v2574_v56, 1e-06  ;;  %v2639_v31 = vmax.f32 %v2575_v43, 1e-06  ;;  %v2576_v48 = vmul.f32 %v5856_v60, %v7026_v2 }
 0x1db   : > { %v3730_v46 = vpop.eup %3729  ;;  %v2634_v40 = vmax.f32 %v2570_v7, 1e-06  ;;  %v2635_v63 = vmax.f32 %v2571_v39, 1e-06  ;;  %v2577_v49 = vmul.f32 %v5854_v35, %v7027_v55  ;;  %v2753_v61 = vmul.f32 %v2689_v12, %v2625_v36 }
 0x1dc   : > { %v2556_v13 = vmul.f32 %v3730_v46, %v5813_v29  ;;  %v2558_v38 = vmul.f32 %v3730_v46, %v7018_v57  ;;  %v2560_v16 = vmul.f32 %v3730_v46, %v7019_v62  ;;  %v2562_v32 = vmul.f32 %v3730_v46, %v7025_v10 }
 0x1dd   : > { %v2700_v57 = vmul.f32 %v2636_v28, %v2636_v28  ;;  %v2701_v8 = vmul.f32 %v2637_v44, %v2637_v44  ;;  %v2702_v56 = vmul.f32 %v2638_v20, %v2638_v20  ;;  %v2703_v30 = vmul.f32 %v2639_v31, %v2639_v31 }
 0x1de   : > { %v2620_v11 = vmax.f32 %v2556_v13, 1e-06  ;;  %v2622_v59 = vmax.f32 %v2558_v38, 1e-06  ;;  %v2624_v29 = vmax.f32 %v2560_v16, 1e-06  ;;  %v5900_v9 = vpop.eup %3731  ;;  %v2697_v13 = vmul.f32 %v2633_v0, %v2633_v0  ;;  %v5906_v38 = vpop.f32.mrf.mxu0 }
 0x1df   : > { %v2626_v46 = vmax.f32 %v2562_v32, 1e-06  ;;  %v2698_v43 = vmul.f32 %v2634_v40, %v2634_v40  ;;  %v2640_v15 = vmax.f32 %v2576_v48, 1e-06  ;;  %v2691_v36 = vmul.f32 %v5880_v50, %v5880_v50 }
 0x1e0   : > { %v2684_v21 = vmul.f32 %v2620_v11, %v2620_v11  ;;  %v2686_v45 = vmul.f32 %v2622_v59, %v2622_v59  ;;  %v2688_v54 = vmul.f32 %v2624_v29, %v2624_v29  ;;  %v5910_v7 = vpop.f32.mrf.mxu0  ;;  %v2760_v12 = vmul.f32 %v2696_v52, %v2632_v18 }
 0x1e1   : > { %v5908_v4 = vpop.eup %3733  ;;  %v2690_v26 = vmul.f32 %v2626_v46, %v2626_v46  ;;  %v2761_v39 = vmul.f32 %v2697_v13, %v2633_v0  ;;  %v2765_v10 = vmul.f32 %v2701_v8, %v2637_v44  ;;  %v2762_v2 = vmul.f32 %v2698_v43, %v2634_v40  ;;  %v5925_v44 = vpop.f32.mrf.mxu1 }
 0x1e2   : > { %v2748_v6 = vmul.f32 %v2684_v21, %v2620_v11  ;;  %v2750_v17 = vmul.f32 %v2686_v45, %v2622_v59  ;;  %v2752_v34 = vmul.f32 %v2688_v54, %v2624_v29  ;;  %v2699_v11 = vmul.f32 %v2635_v63, %v2635_v63  ;;  %v5920_v52 = vpop.f32.mrf.mxu0 }
 0x1e3   : > { %v2641_v59 = vmax.f32 %v2577_v49, 1e-06  ;;  %v2764_v29 = vmul.f32 %v2700_v57, %v2636_v28  ;;  %v2581_v32 = vmul.f32 %v5908_v4, %v5476_v5  ;;  %v2582_v21 = vmul.f32 %v5900_v9, %v5638_v58  ;;  %v7028_v49 = vld [vmem:[#allocation16_spill] sm:$0xff] }
 0x1e4   : > { %v2828_v62 = vadd.f32 %v2749_v22, %v2748_v6  ;;  %v2831_v16 = vadd.f32 %v2751_v51, %v2750_v17  ;;  %v2580_v22 = vmul.f32 %v5900_v9, %v5571_v24  ;;  %v2834_v51 = vadd.f32 %v2753_v61, %v2752_v34  ;;  %v5934_v61 = vpop.f32.mrf.mxu0 }
 0x1e5   : > { %v2766_v45 = vmul.f32 %v2702_v56, %v2638_v20  ;;  %v2767_v54 = vmul.f32 %v2703_v30, %v2639_v31  ;;  %v2704_v18 = vmul.f32 %v2640_v15, %v2640_v15  ;;  %v2763_v0 = vmul.f32 %v2699_v11, %v2635_v63 }
 0x1e6   : > { %2829 = vadd.xlane.f32.xlu1 %v2828_v62  ;;  %2832 = vadd.xlane.f32.xlu0 %v2831_v16  ;;  %v2705_v28 = vmul.f32 %v2641_v59, %v2641_v59  ;;  %v2583_v24 = vmul.f32 %v5908_v4, %v5584_v41  ;;  %v2840_v5 = vadd.f32 %v5872_v47, %v5870_v1  ;;  %v2644_v31 = vmax.f32 %v2580_v22, 1e-06 }
 0x1e7   : > { %v2754_v58 = vmul.f32 %v2690_v26, %v2626_v46  ;;  %v2755_v20 = vmul.f32 %v2691_v36, %v5880_v50  ;;  %v2843_v40 = vadd.f32 %v5878_v14, %v5876_v33  ;;  %v2846_v48 = vadd.f32 %v2761_v39, %v2760_v12  ;;  %v7029_v46 = vld [vmem:[#allocation63_spill] sm:$0xff]  ;;  %v5938_v33 = vpop.f32.mrf.mxu1 }
 0x1e8   : > { %v2646_v6 = vmax.f32 %v2582_v21, 1e-06  ;;  %v2852_v17 = vadd.f32 %v2765_v10, %v2764_v29  ;;  %v2855_v63 = vadd.f32 %v2767_v54, %v2766_v45  ;;  %v2768_v55 = vmul.f32 %v2704_v18, %v2640_v15  ;;  %v5956_v15 = vpop.f32.mrf.mxu0 }
 0x1e9   : > { %v2578_v41 = vmul.f32 %v5856_v60, %v7028_v49  ;;  %v2849_v1 = vadd.f32 %v2763_v0, %v2762_v2  ;;  %v2769_v47 = vmul.f32 %v2705_v28, %v2641_v59  ;;  %v2647_v50 = vmax.f32 %v2583_v24, 1e-06  ;;  %v5948_v30 = vpop.f32.mrf.mxu1 }
 0x1ea   : > { %2826 = vadd.xlane.f32.xlu1 %v5868_v23  ;;  %2835 = vadd.xlane.f32.xlu0 %v2834_v51  ;;  %v2645_v23 = vmax.f32 %v2581_v32, 1e-06  ;;  %v2579_v13 = vmul.f32 %v5854_v35, %v7029_v46  ;;  %v2837_v14 = vadd.f32 %v2755_v20, %v2754_v58  ;;  %v2708_v57 = vmul.f32 %v2644_v31, %v2644_v31 }
 0x1eb   : > { %v2584_v62 = vmul.f32 %v5900_v9, %v5710_v27  ;;  %v2585_v60 = vmul.f32 %v5908_v4, %v5650_v37  ;;  %v2710_v34 = vmul.f32 %v2646_v6, %v2646_v6  ;;  %v1911_v8 = vmul.f32 %v5866_v25, %v5866_v25  ;;  %v5964_v51 = vpop.f32.mrf.mxu1 }
 0x1ec   : > { %v2709_v16 = vmul.f32 %v2645_v23, %v2645_v23  ;;  %v1913_v56 = vmul.f32 %v5898_v53, %v5898_v53  ;;  %v2642_v35 = vmax.f32 %v2578_v41, 1e-06  ;;  %v2586_v43 = vmul.f32 %v5900_v9, %v5776_v19 }
 0x1ed   : > { %v1912_v27 = vmul.f32 %v5882_v3, %v5882_v3  ;;  %v1914_v37 = vmul.f32 %v5906_v38, %v5906_v38  ;;  %v2711_v36 = vmul.f32 %v2647_v50, %v2647_v50  ;;  %v2643_v12 = vmax.f32 %v2579_v13, 1e-06 }
 0x1ee   : > { %2841 = vadd.xlane.f32.xlu1 %v2840_v5  ;;  %2844 = vadd.xlane.f32.xlu0 %v2843_v40  ;;  %v1975_v11 = vadd.f32 %v1913_v56, %v1911_v8  ;;  %v1915_v59 = vmul.f32 %v5910_v7, %v5910_v7  ;;  %v2648_v26 = vmax.f32 %v2584_v62, 1e-06  ;;  %v2649_v39 = vmax.f32 %v2585_v60, 1e-06 }
 0x1ef   : > { %v1984_v29 = vadd.f32 %v1914_v37, %v1912_v27  ;;  %v1916_v19 = vmul.f32 %v5920_v52, %v5920_v52  ;;  %v2587_v9 = vmul.f32 %v5908_v4, %v5719_v42  ;;  %v1917_v10 = vmul.f32 %v5934_v61, %v5934_v61 }
 0x1f0   : > { %v1976_v22 = vadd.f32 %v1975_v11, %v1915_v59  ;;  %v1918_v32 = vmul.f32 %v5956_v15, %v5956_v15  ;;  %v2858_v21 = vadd.f32 %v2769_v47, %v2768_v55  ;;  %v2772_v45 = vmul.f32 %v2708_v57, %v2644_v31  ;;  %v5976_v59 = vpop.f32.mrf.mxu0 }
 0x1f1   : > { %v2773_v54 = vmul.f32 %v2709_v16, %v2645_v23  ;;  %v1985_v2 = vadd.f32 %v1984_v29, %v1916_v19  ;;  %v2774_v18 = vmul.f32 %v2710_v34, %v2646_v6  ;;  %v2706_v0 = vmul.f32 %v2642_v35, %v2642_v35 }
 0x1f2   : > { %2838 = vadd.xlane.f32.xlu1 %v2837_v14  ;;  %2847 = vadd.xlane.f32.xlu0 %v2846_v48  ;;  %v1977_v28 = vadd.f32 %v1976_v22, %v1917_v10  ;;  %v2775_v24 = vmul.f32 %v2711_v36, %v2647_v50  ;;  %v2707_v42 = vmul.f32 %v2643_v12, %v2643_v12  ;;  %v2650_v20 = vmax.f32 %v2586_v43, 1e-06  ;;  %v5970_v48 = vpop.f32.mrf.mxu1  ;;  %v5980_v29 = vpop.f32.mrf.mxu0 }
 0x1f3   : > { %v2712_v4 = vmul.f32 %v2648_v26, %v2648_v26  ;;  %v1986_v5 = vadd.f32 %v1985_v2, %v1918_v32  ;;  %v2713_v58 = vmul.f32 %v2649_v39, %v2649_v39  ;;  %v2651_v40 = vmax.f32 %v2587_v9, 1e-06 }
 0x1f4   : > { %v1978_v49 = vrot.slane %v1977_v28, 4  ;;  %v2864_v31 = vadd.f32 %v2773_v54, %v2772_v45  ;;  %v2770_v23 = vmul.f32 %v2706_v0, %v2642_v35  ;;  %v2771_v6 = vmul.f32 %v2707_v42, %v2643_v12  ;;  %v5972_v57 = vpop.f32.mrf.mxu1  ;;  %v5984_v9 = vpop.f32.mrf.mxu0 }
 0x1f5   : > { %v1987_v41 = vrot.slane %v1986_v5, 4  ;;  %v2776_v55 = vmul.f32 %v2712_v4, %v2648_v26  ;;  %v2777_v50 = vmul.f32 %v2713_v58, %v2649_v39  ;;  %v2714_v46 = vmul.f32 %v2650_v20, %v2650_v20 }
 0x1f6   : > { %2853 = vadd.xlane.f32.xlu1 %v2852_v17  ;;  %2856 = vadd.xlane.f32.xlu0 %v2855_v63  ;;  %v1979_v17 = vadd.f32 %v1978_v49, %v1977_v28  ;;  %v2867_v63 = vadd.f32 %v2775_v24, %v2774_v18  ;;  %v2715_v13 = vmul.f32 %v2651_v40, %v2651_v40  ;;  %v5974_v43 = vpop.f32.mrf.mxu1  ;;  %v5991_v32 = vpop.f32.mrf.mxu0 }
 0x1f7   : > { %v1988_v47 = vadd.f32 %v1987_v41, %v1986_v5  ;;  %v2861_v16 = vadd.f32 %v2771_v6, %v2770_v23  ;;  %v2870_v34 = vadd.f32 %v2777_v50, %v2776_v55  ;;  %v2778_v8 = vmul.f32 %v2714_v46, %v2650_v20 }
 0x1f8   : > { %v1980_v14 = vrot.slane %v1979_v17, 2  ;;  %v2779_v56 = vmul.f32 %v2715_v13, %v2651_v40  ;;  %v5978_v26 = vpop.f32.mrf.mxu1  ;;  %v1951_v45 = vmul.f32 %v5974_v43, %v5974_v43  ;;  %v1919_v54 = vmul.f32 %v5976_v59, %v5976_v59  ;;  %v6009_v40 = vpop.f32.mrf.mxu0 }
 0x1f9   : > { %v1989_v62 = vrot.slane %v1988_v47, 2  ;;  %v1921_v0 = vmul.f32 %v5984_v9, %v5984_v9  ;;  %v1920_v6 = vmul.f32 %v5980_v29, %v5980_v29 }
 0x1fa   : > { %2850 = vadd.xlane.f32.xlu1 %v2849_v1  ;;  %2859 = vadd.xlane.f32.xlu0 %v2858_v21  ;;  %v1981_v60 = vadd.f32 %v1980_v14, %v1979_v17  ;;  %v2873_v12 = vadd.f32 %v2779_v56, %v2778_v8  ;;  %v5982_v19 = vpop.f32.mrf.mxu1 }
 0x1fb   : > { %v1990_v1 = vadd.f32 %v1989_v62, %v1988_v47  ;;  %v1953_v10 = vmul.f32 %v5982_v19, %v5982_v19 }
 0x1fc   : > { %v1982_v35 = vrot.slane %v1981_v60, 1  ;;  %v5986_v22 = vpop.f32.mrf.mxu1 }
 0x1fd   : > { %v1991_v27 = vrot.slane %v1990_v1, 1  ;;  %v2065_v18 = vadd.f32 %v1953_v10, %v1951_v45  ;;  %v1954_v28 = vmul.f32 %v5986_v22, %v5986_v22 }
 0x1fe   : > { %2865 = vadd.xlane.f32.xlu1 %v2864_v31  ;;  %2868 = vadd.xlane.f32.xlu0 %v2867_v63  ;;  %v1983_v37 = vadd.f32 %v1982_v35, %v1981_v60  ;;  %v5993_v21 = vpop.f32.mrf.mxu1 }
 0x1ff   : > { %v1992_v36 = vadd.f32 %v1991_v27, %v1990_v1  ;;  %v1955_v24 = vmul.f32 %v5993_v21, %v5993_v21 }
 0x200   : > { %v2119_v11 = vmax.f32 %v1983_v37, 1e-24  ;;  %v6011_v49 = vpop.f32.mrf.mxu1 }
 0x201   : > { %v2120_v39 = vmax.f32 %v1992_v36, 1e-24 }
 0x202   : > { %2862 = vadd.xlane.f32.xlu1 %v2861_v16  ;;  %2871 = vadd.xlane.f32.xlu0 %v2870_v34  ;;  %3735 = vrsqrt.f32 %v2119_v11 }
 0x203   : > { %3737 = vrsqrt.f32 %v2120_v39 }
 0x206   : > { %2874 = vadd.xlane.f32.xlu1 %v2873_v12 }
 0x20f   : > { %v3736_v2 = vpop.eup %3735 }
 0x210   : > { %v3738_v42 = vpop.eup %3737  ;;  %v2151_v4 = vmul.f32 %v3736_v2, %v5866_v25  ;;  %v2153_v5 = vmul.f32 %v3736_v2, %v5898_v53  ;;  %v2155_v58 = vmul.f32 %v3736_v2, %v5910_v7  ;;  %v2157_v20 = vmul.f32 %v3736_v2, %v5934_v61 }
 0x211   : > { %v2152_v41 = vmul.f32 %v3738_v42, %v5882_v3  ;;  %v2154_v31 = vmul.f32 %v3738_v42, %v5906_v38  ;;  %v2156_v23 = vmul.f32 %v3738_v42, %v5920_v52  ;;  %v2158_v17 = vmul.f32 %v3738_v42, %v5956_v15  ;;  %v6029_v38 = vpop.f32.mrf.mxu0  ;;  %v6033_v52 = vpop.f32.mrf.mxu1 }
 0x212   : > { %2215 = vst [vmem:[%s6017_s15] sm:$0xff] %v2151_v4  ;;  %2217 = vst [vmem:[%s6017_s15 + $0x10] sm:$0xff] %v2153_v5  ;;  %v1952_v25 = vmul.f32 %v5978_v26, %v5978_v26  ;;  %v1922_v3 = vmul.f32 %v5991_v32, %v5991_v32  ;;  %v1923_v53 = vmul.f32 %v6009_v40, %v6009_v40 }
 0x213   : > { %2219 = vst [vmem:[%s6017_s15 + $0x20] sm:$0xff] %v2155_v58  ;;  %2221 = vst [vmem:[%s6017_s15 + $0x30] sm:$0xff] %v2157_v20  ;;  %v1956_v7 = vmul.f32 %v6011_v49, %v6011_v49  ;;  %v1993_v61 = vadd.f32 %v1921_v0, %v1919_v54  ;;  %v2066_v15 = vadd.f32 %v2065_v18, %v1955_v24  ;;  %v6045_v50 = vpop.f32.mrf.mxu0  ;;  %v6047_v46 = vpop.f32.mrf.mxu1  ;;  %v2282_v58 = vld [vmem:[%s6582_s4 + $0x18] sm:$0xff] }
 0x214   : > { %2216 = vst [vmem:[%s6017_s15 + $0x8] sm:$0xff] %v2152_v41  ;;  %2218 = vst [vmem:[%s6017_s15 + $0x18] sm:$0xff] %v2154_v31  ;;  %v1957_v63 = vmul.f32 %v6033_v52, %v6033_v52  ;;  %v2074_v55 = vadd.f32 %v1954_v28, %v1952_v25  ;;  %v1924_v47 = vmul.f32 %v6029_v38, %v6029_v38 }
 0x215   : > { %2220 = vst [vmem:[%s6017_s15 + $0x28] sm:$0xff] %v2156_v23  ;;  %2222 = vst [vmem:[%s6017_s15 + $0x38] sm:$0xff] %v2158_v17  ;;  %v1994_v13 = vadd.f32 %v1993_v61, %v1923_v53  ;;  %v1925_v62 = vmul.f32 %v6045_v50, %v6045_v50  ;;  %v2002_v60 = vadd.f32 %v1922_v3, %v1920_v6  ;;  %v6051_v1 = vpop.f32.mrf.mxu0  ;;  %v6055_v8 = vpop.f32.mrf.mxu1  ;;  %v4063_v17 = vmov 0.0  }
 0x216   : > { %v2067_v14 = vadd.f32 %v2066_v15, %v1957_v63  ;;  %v2075_v16 = vadd.f32 %v2074_v55, %v1956_v7  ;;  %v1958_v34 = vmul.f32 %v6047_v46, %v6047_v46  ;;  %v1926_v37 = vmul.f32 %v6051_v1, %v6051_v1  ;;  %3541 = vmatprep.subr.mxu1 %v4063_v17 }
 0x217   : > { %v1995_v35 = vadd.f32 %v1994_v13, %v1925_v62  ;;  %v2003_v27 = vadd.f32 %v2002_v60, %v1924_v47  ;;  %v6059_v12 = vpop.f32.mrf.mxu0  ;;  %v6061_v11 = vpop.f32.mrf.mxu1  ;;  %3542 = vmatpush3.msra.mxu1 %v2282_v58  ;;  %v1959_v13 = vmul.f32 %v6055_v8, %v6055_v8  ;;  %3549 = vmatprep.mubr.msk.f32.mxu1 %vm4064_vm0, %v4063_v17 }
 0x218   : > { %v2068_v56 = vrot.slane %v2067_v14, 4  ;;  %v2076_v36 = vadd.f32 %v2075_v16, %v1958_v34  ;;  %3543 = vmatprep.subr.mxu1 %v4063_v17  ;;  %v1927_v16 = vmul.f32 %v6059_v12, %v6059_v12 }
 0x219   : > { %v1996_v10 = vrot.slane %v1995_v35, 4  ;;  %v2004_v45 = vadd.f32 %v2003_v27, %v1926_v37  ;;  %v6063_v2 = vpop.f32.mrf.mxu0  ;;  %v6065_v18 = vpop.f32.mrf.mxu1 }
 0x21a   : > { %v2069_v39 = vadd.f32 %v2068_v56, %v2067_v14  ;;  %v2077_v54 = vrot.slane %v2076_v36, 4  ;;  %v2281_v14 = vld [vmem:[%s6582_s4 + $0x10] sm:$0xff]  ;;  %v1961_v34 = vmul.f32 %v6065_v18, %v6065_v18 }
 0x21b   : > { %v1997_v28 = vadd.f32 %v1996_v10, %v1995_v35  ;;  %v2005_v24 = vrot.slane %v2004_v45, 4  ;;  %v6067_v4 = vpop.f32.mrf.mxu0  ;;  %v6069_v5 = vpop.f32.mrf.mxu1  ;;  %3544 = vmatpush3.msra.mxu1 %v2281_v14 }
 0x21c   : > { %v2070_v0 = vrot.slane %v2069_v39, 2  ;;  %v2078_v42 = vadd.f32 %v2077_v54, %v2076_v36  ;;  %v1929_v37 = vmul.f32 %v6067_v4, %v6067_v4  ;;  %3545 = vmatprep.subr.mxu1 %v4063_v17  ;;  %v1962_v58 = vmul.f32 %v6069_v5, %v6069_v5 }
 0x21d   : > { %v1998_v41 = vrot.slane %v1997_v28, 2  ;;  %v2006_v31 = vadd.f32 %v2005_v24, %v2004_v45  ;;  %v6075_v25 = vpop.f32.mrf.mxu0  ;;  %v6077_v3 = vpop.f32.mrf.mxu1  ;;  %v1960_v45 = vmul.f32 %v6061_v11, %v6061_v11 }
 0x21e   : > { %v2071_v20 = vadd.f32 %v2070_v0, %v2069_v39  ;;  %v2079_v23 = vrot.slane %v2078_v42, 2  ;;  %v1930_v36 = vmul.f32 %v6075_v25, %v6075_v25  ;;  %v1963_v54 = vmul.f32 %v6077_v3, %v6077_v3 }
 0x21f   : > { %v1999_v7 = vadd.f32 %v1998_v41, %v1997_v28  ;;  %v2007_v61 = vrot.slane %v2006_v31, 2  ;;  %v6079_v63 = vpop.f32.mrf.mxu0  ;;  %v6081_v6 = vpop.f32.mrf.mxu1 }
 0x220   : > { %v2072_v53 = vrot.slane %v2071_v20, 1  ;;  %v2080_v15 = vadd.f32 %v2079_v23, %v2078_v42  ;;  %v1928_v42 = vmul.f32 %v6063_v2, %v6063_v2  ;;  %v2083_v23 = vadd.f32 %v1961_v34, %v1959_v13 }
 0x221   : > { %v2000_v47 = vrot.slane %v1999_v7, 1  ;;  %v2008_v62 = vadd.f32 %v2007_v61, %v2006_v31  ;;  %v6093_v56 = vpop.f32.mrf.mxu0  ;;  %v6104_v0 = vpop.f32.mrf.mxu1  ;;  %v2092_v13 = vadd.f32 %v1962_v58, %v1960_v45 }
 0x222   : > { %v2073_v55 = vadd.f32 %v2072_v53, %v2071_v20  ;;  %v2081_v60 = vrot.slane %v2080_v15, 1  ;;  %v1931_v20 = vmul.f32 %v6079_v63, %v6079_v63  ;;  %v1932_v53 = vmul.f32 %v6093_v56, %v6093_v56 }
 0x223   : > { %v2001_v27 = vadd.f32 %v2000_v47, %v1999_v7  ;;  %v2009_v39 = vrot.slane %v2008_v62, 1  ;;  %v6106_v28 = vpop.f32.mrf.mxu0  ;;  %v2011_v7 = vadd.f32 %v1929_v37, %v1927_v16  ;;  %v2020_v61 = vadd.f32 %v1930_v36, %v1928_v42  ;;  %v2785_v42 = vpop.xlane.xlu0 %2784 }
 0x224   : > { %v2129_v35 = vmax.f32 %v2073_v55, 1e-24  ;;  %v2082_v10 = vadd.f32 %v2081_v60, %v2080_v15  ;;  %v1964_v15 = vmul.f32 %v6081_v6, %v6081_v6  ;;  %v2084_v14 = vadd.f32 %v2083_v23, %v1963_v54  ;;  %v2279_v23 = vld [vmem:[%s6582_s4] sm:$0xff] }
 0x225   : > { %v2121_v24 = vmax.f32 %v2001_v27, 1e-24  ;;  %v2010_v41 = vadd.f32 %v2009_v39, %v2008_v62  ;;  %v6118_v55 = vpop.f32.mrf.mxu0  ;;  %v1965_v60 = vmul.f32 %v6104_v0, %v6104_v0  ;;  %v6122_v62 = vpop.f32.mrf.mxu1  ;;  %v2012_v34 = vadd.f32 %v2011_v7, %v1931_v20 }
 0x226   : > { %v2130_v31 = vmax.f32 %v2082_v10, 1e-24  ;;  %3739 = vrsqrt.f32 %v2129_v35  ;;  %v1933_v16 = vmul.f32 %v6106_v28, %v6106_v28  ;;  %v2021_v35 = vadd.f32 %v2020_v61, %v1932_v53  ;;  %v2782_v53 = vpop.xlane.xlu1 %2781 }
 0x227   : > { %3741 = vrsqrt.f32 %v2121_v24  ;;  %v2122_v47 = vmax.f32 %v2010_v41, 1e-24  ;;  %v2085_v27 = vadd.f32 %v2084_v14, %v1965_v60  ;;  %v1934_v37 = vmul.f32 %v6118_v55, %v6118_v55  ;;  %v2794_v14 = vpop.xlane.xlu0 %2793 }
 0x228   : > { %3743 = vrsqrt.f32 %v2130_v31  ;;  %v2093_v36 = vadd.f32 %v2092_v13, %v1964_v15  ;;  %v2013_v39 = vadd.f32 %v2012_v34, %v1933_v16  ;;  %v1966_v10 = vmul.f32 %v6122_v62, %v6122_v62  ;;  %v2280_v31 = vld [vmem:[%s6582_s4 + $0x8] sm:$0xff] }
 0x229   : > { %3745 = vrsqrt.f32 %v2122_v47  ;;  %v2086_v54 = vrot.slane %v2085_v27, 4  ;;  %v2022_v24 = vadd.f32 %v2021_v35, %v1934_v37  ;;  %3546 = vmatpush3.msra.mxu1 %v2280_v31  ;;  %v2878_v37 = vmul.f32 0.00390625, %v2785_v42 }
 0x22a   : > { %v2014_v41 = vrot.slane %v2013_v39, 4  ;;  %v2094_v45 = vadd.f32 %v2093_v36, %v1966_v10  ;;  %3547 = vmatprep.subr.mxu1 %v4063_v17 }
 0x22b   : > { %v2087_v58 = vadd.f32 %v2086_v54, %v2085_v27  ;;  %v2023_v20 = vrot.slane %v2022_v24, 4  ;;  %3548 = vmatpush3.msra.mxu1 %v2279_v23  ;;  %v2877_v54 = vmul.f32 0.00390625, %v2782_v53  ;;  %3747 = vlog2.f32 %v2878_v37 }
 0x22c   : > { %v2015_v61 = vadd.f32 %v2014_v41, %v2013_v39  ;;  %v2095_v47 = vrot.slane %v2094_v45, 4  ;;  %v2797_v41 = vpop.xlane.xlu1 %2796 }
 0x22d   : > { %v2088_v7 = vrot.slane %v2087_v58, 2  ;;  %v2024_v15 = vadd.f32 %v2023_v20, %v2022_v24  ;;  %v2881_v24 = vmul.f32 0.00390625, %v2794_v14  ;;  %3749 = vlog2.f32 %v2877_v54 }
 0x22e   : > { %v2016_v34 = vrot.slane %v2015_v61, 2  ;;  %v2096_v35 = vadd.f32 %v2095_v47, %v2094_v45 }
 0x22f   : > { %v2089_v60 = vadd.f32 %v2088_v7, %v2087_v58  ;;  %v2025_v16 = vrot.slane %v2024_v15, 2  ;;  %3751 = vlog2.f32 %v2881_v24 }
 0x230   : > { %v2097_v31 = vrot.slane %v2096_v35, 2  ;;  %v2800_v47 = vpop.xlane.xlu1 %2799 }
 0x231   : > { %v2090_v42 = vrot.slane %v2089_v60, 1 }
 0x232   : > { %v2098_v14 = vadd.f32 %v2097_v31, %v2096_v35 }
 0x233   : > { %v3740_v13 = vpop.eup %3739 }
 0x234   : > { %v3742_v27 = vpop.eup %3741  ;;  %v2191_v36 = vmul.f32 %v3740_v13, %v5974_v43  ;;  %v2193_v39 = vmul.f32 %v3740_v13, %v5982_v19  ;;  %v2195_v17 = vmul.f32 %v3740_v13, %v5993_v21  ;;  %v2197_v58 = vmul.f32 %v3740_v13, %v6033_v52 }
 0x235   : > { %v3744_v10 = vpop.eup %3743  ;;  %v2159_v20 = vmul.f32 %v3742_v27, %v5976_v59  ;;  %v2161_v43 = vmul.f32 %v3742_v27, %v5984_v9  ;;  %v2163_v19 = vmul.f32 %v3742_v27, %v6009_v40  ;;  %v2165_v21 = vmul.f32 %v3742_v27, %v6045_v50 }
 0x236   : > { %2255 = vst [vmem:[%s6017_s15 + $0x140] sm:$0xff] %v2191_v36  ;;  %2257 = vst [vmem:[%s6017_s15 + $0x150] sm:$0xff] %v2193_v39  ;;  %v2192_v45 = vmul.f32 %v3744_v10, %v5978_v26  ;;  %v2017_v52 = vadd.f32 %v2016_v34, %v2015_v61  ;;  %v2026_v59 = vadd.f32 %v2025_v16, %v2024_v15  ;;  %v3746_v23 = vpop.eup %3745  ;;  %v2788_v26 = vpop.xlane.xlu0 %2787  ;;  %v2882_v61 = vmul.f32 0.00390625, %v2797_v41 }
 0x237   : > { %2259 = vst [vmem:[%s6017_s15 + $0x160] sm:$0xff] %v2195_v17  ;;  %2261 = vst [vmem:[%s6017_s15 + $0x170] sm:$0xff] %v2197_v58  ;;  %v2194_v9 = vmul.f32 %v3744_v10, %v5986_v22  ;;  %v2196_v40 = vmul.f32 %v3744_v10, %v6011_v49  ;;  %v2160_v50 = vmul.f32 %v3746_v23, %v5980_v29  ;;  %v2879_v13 = vmul.f32 0.00390625, %v2788_v26 }
 0x238   : > { %2223 = vst [vmem:[%s6017_s15 + $0x40] sm:$0xff] %v2159_v20  ;;  %2225 = vst [vmem:[%s6017_s15 + $0x50] sm:$0xff] %v2161_v43  ;;  %v2162_v53 = vmul.f32 %v3746_v23, %v5991_v32  ;;  %v2164_v7 = vmul.f32 %v3746_v23, %v6029_v38  ;;  %v2166_v15 = vmul.f32 %v3746_v23, %v6051_v1  ;;  %v2018_v29 = vrot.slane %v2017_v52, 1  ;;  %v6170_v20 = vpop.f32.mrf.mxu0 }
 0x239   : > { %2227 = vst [vmem:[%s6017_s15 + $0x60] sm:$0xff] %v2163_v19  ;;  %2229 = vst [vmem:[%s6017_s15 + $0x70] sm:$0xff] %v2165_v21  ;;  %v2198_v22 = vmul.f32 %v3744_v10, %v6047_v46  ;;  %v2091_v49 = vadd.f32 %v2090_v42, %v2089_v60  ;;  %v2027_v32 = vrot.slane %v2026_v59, 1  ;;  %v2099_v1 = vrot.slane %v2098_v14, 1  ;;  %v2809_v17 = vpop.xlane.xlu1 %2808  ;;  %v3748_v10 = vpop.eup %3747 }
 0x23a   : > { %2256 = vst [vmem:[%s6017_s15 + $0x148] sm:$0xff] %v2192_v45  ;;  %2258 = vst [vmem:[%s6017_s15 + $0x158] sm:$0xff] %v2194_v9  ;;  %v2019_v34 = vadd.f32 %v2018_v29, %v2017_v52  ;;  %v2883_v27 = vmul.f32 0.00390625, %v2800_v47  ;;  %v2806_v46 = vpop.xlane.xlu0 %2805  ;;  %v3750_v24 = vpop.eup %3749  ;;  %v2912_v43 = vmul.f32 0.6931472, %v3748_v10  ;;  %v2886_v19 = vmul.f32 0.00390625, %v2809_v17 }
 0x23b   : > { %2260 = vst [vmem:[%s6017_s15 + $0x168] sm:$0xff] %v2196_v40  ;;  %2224 = vst [vmem:[%s6017_s15 + $0x48] sm:$0xff] %v2160_v50  ;;  %v2131_v38 = vmax.f32 %v2091_v49, 1e-24  ;;  %v2028_v16 = vadd.f32 %v2027_v32, %v2026_v59  ;;  %v2100_v37 = vadd.f32 %v2099_v1, %v2098_v14  ;;  %v2885_v35 = vmul.f32 0.00390625, %v2806_v46  ;;  %v6172_v23 = vpop.f32.mrf.mxu1 }
 0x23c   : > { %2226 = vst [vmem:[%s6017_s15 + $0x58] sm:$0xff] %v2162_v53  ;;  %2228 = vst [vmem:[%s6017_s15 + $0x68] sm:$0xff] %v2164_v7  ;;  %v2123_v60 = vmax.f32 %v2019_v34, 1e-24  ;;  %v3752_v41 = vpop.eup %3751  ;;  %v2910_v42 = vmul.f32 0.6931472, %v3750_v24  ;;  %v6178_v7 = vpop.f32.mrf.mxu0 }
 0x23d   : > { %2230 = vst [vmem:[%s6017_s15 + $0x78] sm:$0xff] %v2166_v15  ;;  %2262 = vst [vmem:[%s6017_s15 + $0x178] sm:$0xff] %v2198_v22  ;;  %3753 = vrsqrt.f32 %v2131_v38  ;;  %v2124_v36 = vmax.f32 %v2028_v16, 1e-24  ;;  %v2132_v39 = vmax.f32 %v2100_v37, 1e-24  ;;  %v6184_v47 = vpop.f32.mrf.mxu1 }
 0x23e   : > { %3755 = vlog2.f32 %v2882_v61  ;;  %v2918_v45 = vmul.f32 0.6931472, %v3752_v41 }
 0x23f   : > { %3757 = vlog2.f32 %v2879_v13 }
 0x240   : > { %3759 = vlog2.f32 %v2883_v27 }
 0x241   : > { %3761 = vrsqrt.f32 %v2123_v60 }
 0x242   : > { %3763 = vrsqrt.f32 %v2124_v36 }
 0x243   : > { %v2791_v54 = vpop.xlane.xlu0 %2790  ;;  %3765 = vrsqrt.f32 %v2132_v39 }
 0x244   : > { %3767 = vlog2.f32 %v2885_v35  ;;  %v2803_v58 = vpop.xlane.xlu1 %2802  ;;  %v2880_v52 = vmul.f32 0.00390625, %v2791_v54  ;;  %v6186_v29 = vpop.f32.mrf.mxu0 }
 0x245   : > { %v2884_v59 = vmul.f32 0.00390625, %v2803_v58  ;;  %3769 = vlog2.f32 %v2886_v19 }
 0x246   : > { %3771 = vlog2.f32 %v2880_v52  ;;  %v6206_v36 = vpop.f32.mrf.mxu0  ;;  %v1935_v52 = vmul.f32 %v6170_v20, %v6170_v20 }
 0x247   : > { %3773 = vlog2.f32 %v2884_v59  ;;  %v1936_v59 = vmul.f32 %v6178_v7, %v6178_v7 }
 0x248   : > { %v6200_v37 = vpop.f32.mrf.mxu1 }
 0x24a   : > { %v3754_v21 = vpop.eup %3753  ;;  %v6216_v54 = vpop.f32.mrf.mxu1 }
 0x24b   : > { %v3756_v9 = vpop.eup %3755  ;;  %v2199_v40 = vmul.f32 %v3754_v21, %v6055_v8  ;;  %v2201_v26 = vmul.f32 %v3754_v21, %v6065_v18  ;;  %v2203_v50 = vmul.f32 %v3754_v21, %v6077_v3  ;;  %v2205_v53 = vmul.f32 %v3754_v21, %v6104_v0 }
 0x24c   : > { %v2812_v31 = vpop.xlane.xlu0 %2811  ;;  %v3758_v61 = vpop.eup %3757  ;;  %v2920_v49 = vmul.f32 0.6931472, %v3756_v9  ;;  %v2974_v18 = vmul.f32 0.33333334, %v2912_v43  ;;  %v2973_v3 = vmul.f32 0.33333334, %v2910_v42  ;;  %v1937_v21 = vmul.f32 %v6186_v29, %v6186_v29 }
 0x24d   : > { %v2887_v15 = vmul.f32 0.00390625, %v2812_v31  ;;  %2263 = vst [vmem:[%s6017_s15 + $0x180] sm:$0xff] %v2199_v40  ;;  %2265 = vst [vmem:[%s6017_s15 + $0x190] sm:$0xff] %v2201_v26  ;;  %v3760_v22 = vpop.eup %3759  ;;  %v2977_v0 = vmul.f32 0.33333334, %v2918_v45  ;;  %v1938_v31 = vmul.f32 %v6206_v36, %v6206_v36 }
 0x24e   : > { %2267 = vst [vmem:[%s6017_s15 + $0x1a0] sm:$0xff] %v2203_v50  ;;  %2269 = vst [vmem:[%s6017_s15 + $0x1b0] sm:$0xff] %v2205_v53  ;;  %v3762_v8 = vpop.eup %3761  ;;  %v2914_v14 = vmul.f32 0.6931472, %v3758_v61  ;;  %v2978_v60 = vmul.f32 0.33333334, %v2920_v49  ;;  %v1967_v49 = vmul.f32 %v6172_v23, %v6172_v23 }
 0x24f   : > { %v3764_v32 = vpop.eup %3763  ;;  %v2167_v38 = vmul.f32 %v3762_v8, %v6059_v12  ;;  %v2169_v13 = vmul.f32 %v3762_v8, %v6067_v4  ;;  %v2171_v34 = vmul.f32 %v3762_v8, %v6079_v63  ;;  %3775 = vlog2.f32 %v2887_v15 }
 0x250   : > { %v3766_v16 = vpop.eup %3765  ;;  %v2173_v1 = vmul.f32 %v3762_v8, %v6106_v28  ;;  %v2168_v27 = vmul.f32 %v3764_v32, %v6063_v2  ;;  %v2170_v46 = vmul.f32 %v3764_v32, %v6075_v25  ;;  %v2172_v12 = vmul.f32 %v3764_v32, %v6093_v56 }
 0x251   : > { %2231 = vst [vmem:[%s6017_s15 + $0x80] sm:$0xff] %v2167_v38  ;;  %2233 = vst [vmem:[%s6017_s15 + $0x90] sm:$0xff] %v2169_v13  ;;  %v2174_v4 = vmul.f32 %v3764_v32, %v6118_v55  ;;  %v2200_v63 = vmul.f32 %v3766_v16, %v6061_v11  ;;  %v3007_v28 = vmul.f32 1.442695, %v2974_v18  ;;  %v3005_v2 = vmul.f32 1.442695, %v2973_v3  ;;  %v3768_v56 = vpop.eup %3767 }
 0x252   : > { %2235 = vst [vmem:[%s6017_s15 + $0xa0] sm:$0xff] %v2171_v34  ;;  %2237 = vst [vmem:[%s6017_s15 + $0xb0] sm:$0xff] %v2173_v1  ;;  %v2202_v25 = vmul.f32 %v3766_v16, %v6069_v5  ;;  %v2975_v39 = vmul.f32 0.33333334, %v2914_v14  ;;  %v2922_v55 = vmul.f32 0.6931472, %v3760_v22  ;;  %v2204_v11 = vmul.f32 %v3766_v16, %v6081_v6  ;;  %v3770_v19 = vpop.eup %3769 }
 0x253   : > { %2232 = vst [vmem:[%s6017_s15 + $0x88] sm:$0xff] %v2168_v27  ;;  %2234 = vst [vmem:[%s6017_s15 + $0x98] sm:$0xff] %v2170_v46  ;;  %v2206_v17 = vmul.f32 %v3766_v16, %v6122_v62  ;;  %v3013_v35 = vmul.f32 1.442695, %v2977_v0  ;;  %v3015_v10 = vmul.f32 1.442695, %v2978_v60  ;;  %3777 = vpow2.f32 %v3007_v28  ;;  %v3772_v42 = vpop.eup %3771 }
 0x254   : > { %2236 = vst [vmem:[%s6017_s15 + $0xa8] sm:$0xff] %v2172_v12  ;;  %2238 = vst [vmem:[%s6017_s15 + $0xb8] sm:$0xff] %v2174_v4  ;;  %v2926_v5 = vmul.f32 0.6931472, %v3768_v56  ;;  %v6218_v41 = vpop.f32.mrf.mxu0  ;;  %3779 = vpow2.f32 %v3005_v2  ;;  %v3009_v58 = vmul.f32 1.442695, %v2975_v39  ;;  %v3774_v26 = vpop.eup %3773  ;;  %v1968_v8 = vmul.f32 %v6184_v47, %v6184_v47 }
 0x255   : > { %2264 = vst [vmem:[%s6017_s15 + $0x188] sm:$0xff] %v2200_v63  ;;  %2266 = vst [vmem:[%s6017_s15 + $0x198] sm:$0xff] %v2202_v25  ;;  %v2979_v43 = vmul.f32 0.33333334, %v2922_v55  ;;  %3781 = vpow2.f32 %v3013_v35  ;;  %v1939_v61 = vmul.f32 %v6218_v41, %v6218_v41  ;;  %v2928_v15 = vmul.f32 0.6931472, %v3770_v19 }
 0x256   : > { %2268 = vst [vmem:[%s6017_s15 + $0x1a8] sm:$0xff] %v2204_v11  ;;  %2270 = vst [vmem:[%s6017_s15 + $0x1b8] sm:$0xff] %v2206_v17  ;;  %3783 = vpow2.f32 %v3015_v10  ;;  %v2981_v45 = vmul.f32 0.33333334, %v2926_v5  ;;  %v6230_v40 = vpop.f32.mrf.mxu0  ;;  %v1969_v18 = vmul.f32 %v6200_v37, %v6200_v37  ;;  %v2916_v0 = vmul.f32 0.6931472, %v3772_v42 }
 0x257   : > { %3785 = vpow2.f32 %v3009_v58  ;;  %v3017_v50 = vmul.f32 1.442695, %v2979_v43  ;;  %v2029_v32 = vadd.f32 %v1937_v21, %v1935_v52  ;;  %v1940_v14 = vmul.f32 %v6230_v40, %v6230_v40 }
 0x258   : > { %v2818_v24 = vpop.xlane.xlu1 %2817  ;;  %v2821_v6 = vpop.xlane.xlu0 %2820  ;;  %v3021_v38 = vmul.f32 1.442695, %v2981_v45  ;;  %v2924_v13 = vmul.f32 0.6931472, %v3774_v26  ;;  %v2038_v34 = vadd.f32 %v1938_v31, %v1936_v59  ;;  %v2982_v63 = vmul.f32 0.33333334, %v2928_v15 }
 0x259   : > { %v2889_v62 = vmul.f32 0.00390625, %v2818_v24  ;;  %v6228_v9 = vpop.f32.mrf.mxu1  ;;  %v2890_v53 = vmul.f32 0.00390625, %v2821_v6  ;;  %v2030_v12 = vadd.f32 %v2029_v32, %v1939_v61  ;;  %v2101_v2 = vadd.f32 %v1969_v18, %v1967_v49 }
 0x25a   : > { %v1971_v16 = vmul.f32 %v6228_v9, %v6228_v9  ;;  %v1970_v25 = vmul.f32 %v6216_v54, %v6216_v54  ;;  %v2976_v39 = vmul.f32 0.33333334, %v2916_v0  ;;  %v2039_v55 = vadd.f32 %v2038_v34, %v1940_v14 }
 0x25b   : > { %3787 = vlog2.f32 %v2889_v62  ;;  %v6244_v1 = vpop.f32.mrf.mxu1  ;;  %v2980_v35 = vmul.f32 0.33333334, %v2924_v13  ;;  %v3023_v42 = vmul.f32 1.442695, %v2982_v63 }
 0x25c   : > { %v2815_v22 = vpop.xlane.xlu1 %2814  ;;  %v3776_v3 = vpop.eup %3775  ;;  %3789 = vlog2.f32 %v2890_v53  ;;  %v2102_v5 = vadd.f32 %v2101_v2, %v1971_v16  ;;  %v1972_v24 = vmul.f32 %v6244_v1, %v6244_v1  ;;  %v2110_v52 = vadd.f32 %v1970_v25, %v1968_v8 }
 0x25d   : > { %v2888_v46 = vmul.f32 0.00390625, %v2815_v22  ;;  %v2824_v60 = vpop.xlane.xlu0 %2823  ;;  %v2930_v28 = vmul.f32 0.6931472, %v3776_v3  ;;  %v3011_v26 = vmul.f32 1.442695, %v2976_v39  ;;  %v1947_v39 = vmul.f32 %v5948_v30, %v5948_v30 }
 0x25e   : > { %v2891_v10 = vmul.f32 0.00390625, %v2824_v60  ;;  %v3019_v49 = vmul.f32 1.442695, %v2980_v35  ;;  %v2111_v18 = vadd.f32 %v2110_v52, %v1972_v24 }
 0x25f   : > { %3791 = vlog2.f32 %v2888_v46  ;;  %v2983_v45 = vmul.f32 0.33333334, %v2930_v28 }
 0x260   : > { %v6260_v43 = vpop.eup %3777  ;;  %3793 = vpow2.f32 %v3017_v50 }
 0x261   : > { %v6264_v21 = vpop.eup %3779  ;;  %3795 = vlog2.f32 %v2891_v10  ;;  %v3025_v32 = vmul.f32 1.442695, %v2983_v45  ;;  %v1949_v45 = vmul.f32 %v5970_v48, %v5970_v48 }
 0x262   : > { %v6268_v31 = vpop.eup %3781  ;;  %3797 = vpow2.f32 %v3021_v38  ;;  %v6280_v38 = vmul.f32 %v5938_v33, %v5938_v33 }
 0x263   : > { %v6270_v22 = vpop.eup %3783  ;;  %3799 = vpow2.f32 %v3023_v42 }
 0x264   : > { %v6274_v8 = vpop.eup %3785  ;;  %3801 = vpow2.f32 %v3011_v26 }
 0x265   : > { %v6246_v27 = vpop.f32.mrf.mxu0  ;;  %3803 = vpow2.f32 %v3019_v49 }
 0x266   : > { %v1941_v4 = vmul.f32 %v6246_v27, %v6246_v27 }
 0x267   : > { %v6252_v56 = vpop.f32.mrf.mxu0 }
 0x268   : > { %v2031_v11 = vadd.f32 %v2030_v12, %v1941_v4  ;;  %v1942_v17 = vmul.f32 %v6252_v56, %v6252_v56  ;;  %v6258_v58 = vpop.f32.mrf.mxu1  ;;  %v3788_v60 = vpop.eup %3787  ;;  %v1945_v12 = vmul.f32 %v5925_v44, %v5925_v44 }
 0x269   : > { %v1973_v19 = vmul.f32 %v6258_v58, %v6258_v58  ;;  %v3790_v25 = vpop.eup %3789  ;;  %v2934_v10 = vmul.f32 0.6931472, %v3788_v60 }
 0x26a   : > { %v2032_v6 = vrot.slane %v2031_v11, 4  ;;  %v2040_v62 = vadd.f32 %v2039_v55, %v1942_v17  ;;  %v6266_v59 = vpop.f32.mrf.mxu1  ;;  %v2936_v52 = vmul.f32 0.6931472, %v3790_v25 }
 0x26b   : > { %v2103_v61 = vadd.f32 %v2102_v5, %v1973_v19  ;;  %v1974_v3 = vmul.f32 %v6266_v59, %v6266_v59 }
 0x26c   : > { %v2033_v53 = vadd.f32 %v2032_v6, %v2031_v11  ;;  %v2041_v15 = vrot.slane %v2040_v62, 4 }
 0x26d   : > { %v2104_v0 = vrot.slane %v2103_v61, 4  ;;  %v2112_v16 = vadd.f32 %v2111_v18, %v1974_v3 }
 0x26e   : > { %v2034_v50 = vrot.slane %v2033_v53, 2  ;;  %v2042_v34 = vadd.f32 %v2041_v15, %v2040_v62 }
 0x26f   : > { %v2830_v14 = vpop.xlane.xlu1 %2829  ;;  %v2833_v13 = vpop.xlane.xlu0 %2832  ;;  %v2105_v28 = vadd.f32 %v2104_v0, %v2103_v61  ;;  %v2113_v35 = vrot.slane %v2112_v16, 4  ;;  %v2985_v0 = vmul.f32 0.33333334, %v2934_v10 }
 0x270   : > { %v2893_v46 = vmul.f32 0.00390625, %v2830_v14  ;;  %v2894_v4 = vmul.f32 0.00390625, %v2833_v13  ;;  %v2035_v63 = vadd.f32 %v2034_v50, %v2033_v53  ;;  %v2043_v2 = vrot.slane %v2042_v34, 2  ;;  %v3792_v53 = vpop.eup %3791 }
 0x271   : > { %v2106_v6 = vrot.slane %v2105_v28, 2  ;;  %v2114_v42 = vadd.f32 %v2113_v35, %v2112_v16  ;;  %v6286_v50 = vpop.eup %3793 }
 0x272   : > { %3805 = vlog2.f32 %v2893_v46  ;;  %v2036_v17 = vrot.slane %v2035_v63, 1  ;;  %v2044_v62 = vadd.f32 %v2043_v2, %v2042_v34 }
 0x273   : > { %3807 = vpow2.f32 %v3025_v32  ;;  %v2827_v55 = vpop.xlane.xlu1 %2826  ;;  %v2836_v11 = vpop.xlane.xlu0 %2835  ;;  %v2107_v26 = vadd.f32 %v2106_v6, %v2105_v28  ;;  %v2115_v3 = vrot.slane %v2114_v42, 2  ;;  %v2932_v28 = vmul.f32 0.6931472, %v3792_v53 }
 0x274   : > { %v2892_v5 = vmul.f32 0.00390625, %v2827_v55  ;;  %v2895_v24 = vmul.f32 0.00390625, %v2836_v11  ;;  %3809 = vlog2.f32 %v2894_v4  ;;  %v2037_v19 = vadd.f32 %v2036_v17, %v2035_v63  ;;  %v3796_v4 = vpop.eup %3795 }
 0x275   : > { %v2045_v18 = vrot.slane %v2044_v62, 1  ;;  %v2108_v13 = vrot.slane %v2107_v26, 1  ;;  %v2116_v46 = vadd.f32 %v2115_v3, %v2114_v42  ;;  %v2986_v63 = vmul.f32 0.33333334, %v2936_v52  ;;  %v6294_v55 = vpop.eup %3797 }
 0x276   : > { %3811 = vlog2.f32 %v2892_v5  ;;  %v2125_v49 = vmax.f32 %v2037_v19, 1e-24 }
 0x277   : > { %3813 = vlog2.f32 %v2895_v24  ;;  %v2842_v61 = vpop.xlane.xlu1 %2841  ;;  %v2845_v15 = vpop.xlane.xlu0 %2844  ;;  %v2046_v16 = vadd.f32 %v2045_v18, %v2044_v62  ;;  %v2109_v2 = vadd.f32 %v2108_v13, %v2107_v26  ;;  %v2117_v10 = vrot.slane %v2116_v46, 1 }
 0x278   : > { %v2897_v32 = vmul.f32 0.00390625, %v2842_v61  ;;  %v2898_v14 = vmul.f32 0.00390625, %v2845_v15  ;;  %v6288_v34 = vpop.f32.mrf.mxu0  ;;  %3815 = vrsqrt.f32 %v2125_v49  ;;  %v6296_v24 = vpop.eup %3799  ;;  %v2938_v26 = vmul.f32 0.6931472, %v3796_v4 }
 0x279   : > { %v1943_v60 = vmul.f32 %v6288_v34, %v6288_v34  ;;  %v2126_v35 = vmax.f32 %v2046_v16, 1e-24  ;;  %v2133_v62 = vmax.f32 %v2109_v2, 1e-24  ;;  %v6300_v52 = vpop.eup %3801  ;;  %v2118_v53 = vadd.f32 %v2117_v10, %v2116_v46 }
 0x27a   : > { %3817 = vlog2.f32 %v2897_v32  ;;  %v6292_v25 = vpop.f32.mrf.mxu0  ;;  %v6302_v15 = vpop.eup %3803  ;;  %v3029_v49 = vmul.f32 1.442695, %v2985_v0  ;;  %v2984_v18 = vmul.f32 0.33333334, %v2932_v28  ;;  %v2987_v46 = vmul.f32 0.33333334, %v2938_v26 }
 0x27b   : > { %3819 = vlog2.f32 %v2898_v14  ;;  %v2839_v11 = vpop.xlane.xlu1 %2838  ;;  %v2848_v17 = vpop.xlane.xlu0 %2847  ;;  %v2047_v5 = vadd.f32 %v1945_v12, %v1943_v60  ;;  %v1944_v42 = vmul.f32 %v6292_v25, %v6292_v25  ;;  %v2134_v14 = vmax.f32 %v2118_v53, 1e-24 }
 0x27c   : > { %v2896_v6 = vmul.f32 0.00390625, %v2839_v11  ;;  %v2899_v19 = vmul.f32 0.00390625, %v2848_v17  ;;  %3821 = vrsqrt.f32 %v2126_v35  ;;  %v1948_v17 = vmul.f32 %v5964_v51, %v5964_v51 }
 0x27d   : > { %v2048_v61 = vadd.f32 %v2047_v5, %v1947_v39  ;;  %v2056_v16 = vadd.f32 %v6280_v38, %v1944_v42  ;;  %v3031_v39 = vmul.f32 1.442695, %v2986_v63  ;;  %v3027_v35 = vmul.f32 1.442695, %v2984_v18 }
 0x27e   : > { %3823 = vlog2.f32 %v2896_v6  ;;  %v7030_v5 = vlaneseq }
 0x27f   : > { %v3806_v12 = vpop.eup %3805  ;;  %3825 = vlog2.f32 %v2899_v19  ;;  %v2854_v3 = vpop.xlane.xlu1 %2853  ;;  %v2049_v13 = vadd.f32 %v2048_v61, %v1949_v45  ;;  %v2057_v53 = vadd.f32 %v2056_v16, %v1948_v17  ;;  %v3033_v61 = vmul.f32 1.442695, %v2987_v46 }
 0x280   : > { %v2857_v32 = vpop.xlane.xlu0 %2856  ;;  %v6305_v60 = vpop.eup %3807  ;;  %v2942_v2 = vmul.f32 0.6931472, %v3806_v12  ;;  %v2901_v4 = vmul.f32 0.00390625, %v2854_v3  ;;  %3827 = vrsqrt.f32 %v2133_v62  ;;  %v6310_v38 = vand.u32 127, %v7030_v5 }
 0x281   : > { %v2902_v11 = vmul.f32 0.00390625, %v2857_v32  ;;  %3829 = vrsqrt.f32 %v2134_v14  ;;  %v2050_v0 = vrot.slane %v2049_v13, 4  ;;  %v3810_v28 = vpop.eup %3809  ;;  %v1950_v32 = vmul.f32 %v5972_v57, %v5972_v57 }
 0x282   : > { %v2989_v10 = vmul.f32 0.33333334, %v2942_v2  ;;  %3831 = vlog2.f32 %v2901_v4  ;;  %v2944_v6 = vmul.f32 0.6931472, %v3810_v28 }
 0x283   : > { %v3812_v45 = vpop.eup %3811  ;;  %3833 = vlog2.f32 %v2902_v11  ;;  %v2851_v19 = vpop.xlane.xlu1 %2850  ;;  %v6312_v3 = vadd.f32 %v2050_v0, %v2049_v13  ;;  %v6317_v11 = vadd.s32 4294967288, %v6310_v38  ;;  %v6321_v0 = vadd.s32 4294967280, %v6310_v38 }
 0x284   : > { %v2860_v42 = vpop.xlane.xlu0 %2859  ;;  %v3814_v62 = vpop.eup %3813  ;;  %3835 = vpow2.f32 %v3029_v49  ;;  %v2900_v63 = vmul.f32 0.00390625, %v2851_v19  ;;  %v2940_v12 = vmul.f32 0.6931472, %v3812_v45  ;;  %v3037_v14 = vmul.f32 1.442695, %v2989_v10 }
 0x285   : > { %v2903_v26 = vmul.f32 0.00390625, %v2860_v42  ;;  %3837 = vpow2.f32 %v3031_v39  ;;  %v3816_v18 = vpop.eup %3815  ;;  %v2990_v2 = vmul.f32 0.33333334, %v2944_v6  ;;  %v2946_v49 = vmul.f32 0.6931472, %v3814_v62 }
 0x286   : > { %3839 = vpow2.f32 %v3027_v35  ;;  %v2175_v46 = vmul.f32 %v3816_v18, %v6170_v20  ;;  %v6323_v17 = vadd.f32 %v2057_v53, %v1950_v32  ;;  %v2988_v35 = vmul.f32 0.33333334, %v2940_v12 }
 0x287   : > { %v3818_v4 = vpop.eup %3817  ;;  %3841 = vlog2.f32 %v2900_v63  ;;  %v2866_v16 = vpop.xlane.xlu1 %2865  ;;  %v2052_v45 = vrot.slane %v6312_v3, 2  ;;  %v3039_v6 = vmul.f32 1.442695, %v2990_v2  ;;  %v2177_v20 = vmul.f32 %v3816_v18, %v6186_v29 }
 0x288   : > { %v2869_v39 = vpop.xlane.xlu0 %2868  ;;  %v3820_v13 = vpop.eup %3819  ;;  %3843 = vlog2.f32 %v2903_v26  ;;  %v2905_v28 = vmul.f32 0.00390625, %v2866_v16  ;;  %2239 = vst [vmem:[%s6017_s15 + $0xc0] sm:$0xff] %v2175_v46  ;;  %v2179_v19 = vmul.f32 %v3816_v18, %v6218_v41  ;;  %v2991_v62 = vmul.f32 0.33333334, %v2946_v49 }
 0x289   : > { %3845 = vpow2.f32 %v3033_v61  ;;  %v2906_v10 = vmul.f32 0.00390625, %v2869_v39  ;;  %v3822_v5 = vpop.eup %3821  ;;  %v2950_v63 = vmul.f32 0.6931472, %v3818_v4  ;;  %v2181_v61 = vmul.f32 %v3816_v18, %v6246_v27  ;;  %2241 = vst [vmem:[%s6017_s15 + $0xd0] sm:$0xff] %v2177_v20 }
 0x28a   : > { %3847 = vpow2.f32 %v3037_v14  ;;  %v2176_v12 = vmul.f32 %v3822_v5, %v6178_v7  ;;  %v2952_v16 = vmul.f32 0.6931472, %v3820_v13  ;;  %2243 = vst [vmem:[%s6017_s15 + $0xe0] sm:$0xff] %v2179_v19  ;;  %v2059_v29 = vrot.slane %v6323_v17, 4 }
 0x28b   : > { %v3824_v42 = vpop.eup %3823  ;;  %v2863_v26 = vpop.xlane.xlu1 %2862  ;;  %3849 = vlog2.f32 %v2905_v28  ;;  %v3035_v2 = vmul.f32 1.442695, %v2988_v35  ;;  %2245 = vst [vmem:[%s6017_s15 + $0xf0] sm:$0xff] %v2181_v61  ;;  %v3041_v13 = vmul.f32 1.442695, %v2991_v62  ;;  %v2182_v61 = vmul.f32 %v3822_v5, %v6252_v56 }
 0x28c   : > { %v2872_v53 = vpop.xlane.xlu0 %2871  ;;  %v3826_v32 = vpop.eup %3825  ;;  %v2904_v14 = vmul.f32 0.00390625, %v2863_v26  ;;  %v2948_v49 = vmul.f32 0.6931472, %v3824_v42  ;;  %3851 = vlog2.f32 %v2906_v10  ;;  %2240 = vst [vmem:[%s6017_s15 + $0xc8] sm:$0xff] %v2176_v12  ;;  %v2993_v28 = vmul.f32 0.33333334, %v2950_v63 }
 0x28d   : > { %v3828_v41 = vpop.eup %3827  ;;  %v2907_v4 = vmul.f32 0.00390625, %v2872_v53  ;;  %3853 = vpow2.f32 %v3039_v6  ;;  %v2954_v7 = vmul.f32 0.6931472, %v3826_v32  ;;  %v2994_v42 = vmul.f32 0.33333334, %v2952_v16  ;;  %2246 = vst [vmem:[%s6017_s15 + $0xf8] sm:$0xff] %v2182_v61 }
 0x28e   : > { %v3830_v39 = vpop.eup %3829  ;;  %v2207_v27 = vmul.f32 %v3828_v41, %v6172_v23  ;;  %v2209_v18 = vmul.f32 %v3828_v41, %v6200_v37  ;;  %v2211_v10 = vmul.f32 %v3828_v41, %v6228_v9  ;;  %v2213_v20 = vmul.f32 %v3828_v41, %v6258_v58 }
 0x28f   : > { %v3832_v46 = vpop.eup %3831  ;;  %v2875_v35 = vpop.xlane.xlu1 %2874  ;;  %3855 = vlog2.f32 %v2904_v14  ;;  %v2992_v37 = vmul.f32 0.33333334, %v2948_v49  ;;  %v2178_v63 = vmul.f32 %v3822_v5, %v6206_v36  ;;  %v2995_v58 = vmul.f32 0.33333334, %v2954_v7 }
 0x290   : > { %v3834_v19 = vpop.eup %3833  ;;  %v2958_v26 = vmul.f32 0.6931472, %v3832_v46  ;;  %v2908_v6 = vmul.f32 0.00390625, %v2875_v35  ;;  %2271 = vst [vmem:[%s6017_s15 + $0x1c0] sm:$0xff] %v2207_v27  ;;  %2273 = vst [vmem:[%s6017_s15 + $0x1d0] sm:$0xff] %v2209_v18  ;;  %3857 = vlog2.f32 %v2907_v4  ;;  %v2180_v53 = vmul.f32 %v3822_v5, %v6230_v40 }
 0x291   : > { %v6342_v23 = vpop.eup %3835  ;;  %v2960_v62 = vmul.f32 0.6931472, %v3834_v19  ;;  %2275 = vst [vmem:[%s6017_s15 + $0x1e0] sm:$0xff] %v2211_v10  ;;  %2277 = vst [vmem:[%s6017_s15 + $0x1f0] sm:$0xff] %v2213_v20  ;;  %3859 = vpow2.f32 %v3035_v2  ;;  %v3045_v32 = vmul.f32 1.442695, %v2993_v28  ;;  %v2208_v14 = vmul.f32 %v3830_v39, %v6184_v47 }
 0x292   : > { %v6347_v9 = vpop.eup %3837  ;;  %v2997_v16 = vmul.f32 0.33333334, %v2958_v26  ;;  %2242 = vst [vmem:[%s6017_s15 + $0xd8] sm:$0xff] %v2178_v63  ;;  %v2210_v36 = vmul.f32 %v3830_v39, %v6216_v54  ;;  %v3047_v49 = vmul.f32 1.442695, %v2994_v42  ;;  %3861 = vlog2.f32 %v2908_v6  ;;  %2244 = vst [vmem:[%s6017_s15 + $0xe8] sm:$0xff] %v2180_v53 }
 0x293   : > { %v6351_v12 = vpop.eup %3839  ;;  %v2998_v4 = vmul.f32 0.33333334, %v2960_v62  ;;  %v2212_v40 = vmul.f32 %v3830_v39, %v6244_v1  ;;  %v3043_v5 = vmul.f32 1.442695, %v2992_v37  ;;  %v2214_v7 = vmul.f32 %v3830_v39, %v6266_v59  ;;  %2272 = vst [vmem:[%s6017_s15 + $0x1c8] sm:$0xff] %v2208_v14 }
 0x294   : > { %v3842_v41 = vpop.eup %3841  ;;  %2274 = vst [vmem:[%s6017_s15 + $0x1d8] sm:$0xff] %v2210_v36  ;;  %v2053_v47 = vadd.f32 %v2052_v45, %v6312_v3  ;;  %3863 = vpow2.f32 %v3041_v13  ;;  %v3049_v27 = vmul.f32 1.442695, %v2995_v58  ;;  %v2060_v1 = vadd.f32 %v2059_v29, %v6323_v17  ;;  %v7031_v13 = vld [vmem:[#allocation14_spill] sm:$0xff] }
 0x295   : > { %v3844_v56 = vpop.eup %3843  ;;  %v2956_v2 = vmul.f32 0.6931472, %v3842_v41  ;;  %2276 = vst [vmem:[%s6017_s15 + $0x1e8] sm:$0xff] %v2212_v40  ;;  %3865 = vpow2.f32 %v3045_v32  ;;  %v3053_v59 = vmul.f32 1.442695, %v2997_v16  ;;  %2278 = vst [vmem:[%s6017_s15 + $0x1f8] sm:$0xff] %v2214_v7  ;;  %v6376_v20 = vsub.s32 %v6317_v11, %v7031_v13 }
 0x296   : > { %v6365_v54 = vpop.eup %3845  ;;  %v2962_v18 = vmul.f32 0.6931472, %v3844_v56  ;;  %v2054_v28 = vrot.slane %v2053_v47, 1  ;;  %3867 = vpow2.f32 %v3047_v49  ;;  %v3055_v35 = vmul.f32 1.442695, %v2998_v4 }
 0x297   : > { %v6371_v46 = vpop.eup %3847  ;;  %v2996_v39 = vmul.f32 0.33333334, %v2956_v2  ;;  %v2061_v45 = vrot.slane %v2060_v1, 2  ;;  %v3127_v19 = vadd.s32 4294967272, %v6310_v38  ;;  %3869 = vpow2.f32 %v3043_v5 }
 0x298   : > { %v2999_v3 = vmul.f32 0.33333334, %v2962_v18  ;;  %v3850_v10 = vpop.eup %3849  ;;  %v2055_v17 = vadd.f32 %v2054_v28, %v2053_v47  ;;  %3871 = vpow2.f32 %v3049_v27  ;;  %v6383_v11 = vsub.s32 %v6310_v38, %v7031_v13 }
 0x299   : > { %v3852_v29 = vpop.eup %3851  ;;  %v3051_v42 = vmul.f32 1.442695, %v2996_v39  ;;  %v2966_v26 = vmul.f32 0.6931472, %v3850_v10  ;;  %v2062_v6 = vadd.f32 %v2061_v45, %v2060_v1  ;;  %3873 = vpow2.f32 %v3053_v59 }
 0x29a   : > { %v6379_v37 = vpop.eup %3853  ;;  %v3057_v62 = vmul.f32 1.442695, %v2999_v3  ;;  %v2968_v63 = vmul.f32 0.6931472, %v3852_v29  ;;  %v2127_v58 = vmax.f32 %v2055_v17, 1e-24  ;;  %3875 = vpow2.f32 %v3055_v35 }
 0x29b   : > { %v3001_v53 = vmul.f32 0.33333334, %v2966_v26  ;;  %v2063_v61 = vrot.slane %v2062_v6, 1  ;;  %v6387_v16 = vsub.s32 %v6321_v0, %v7031_v13  ;;  %v6390_v14 = vsub.s32 %v3127_v19, %v7031_v13 }
 0x29c   : > { %v3856_v32 = vpop.eup %3855  ;;  %v3002_v36 = vmul.f32 0.33333334, %v2968_v63  ;;  %3877 = vrsqrt.f32 %v2127_v58  ;;  %v3117_v56 = vrot.slane %v6260_v43, %v6376_v20  ;;  %v3112_v0 = vrot.slane %v6264_v21, %v6383_v11 }
 0x29d   : > { %v3858_v41 = vpop.eup %3857  ;;  %3879 = vpow2.f32 %v3051_v42  ;;  %v3061_v49 = vmul.f32 1.442695, %v3001_v53  ;;  %v2964_v4 = vmul.f32 0.6931472, %v3856_v32  ;;  %v2064_v40 = vadd.f32 %v2063_v61, %v2062_v6 }
 0x29e   : > { %v6392_v38 = vpop.eup %3859  ;;  %3881 = vpow2.f32 %v3057_v62  ;;  %v3063_v5 = vmul.f32 1.442695, %v3002_v36  ;;  %v2970_v2 = vmul.f32 0.6931472, %v3858_v41  ;;  %v3137_v18 = vrot.slane %v6268_v31, %v6383_v11 }
 0x29f   : > { %3883 = vpow2.f32 %v3061_v49  ;;  %v3000_v7 = vmul.f32 0.33333334, %v2964_v4  ;;  %v2128_v47 = vmax.f32 %v2064_v40, 1e-24  ;;  %v3862_v27 = vpop.eup %3861  ;;  %v3141_v1 = vrot.slane %v6270_v22, %v6376_v20 }
 0x2a0   : > { %3885 = vpow2.f32 %v3063_v5  ;;  %v3003_v59 = vmul.f32 0.33333334, %v2970_v2  ;;  %v2972_v43 = vmul.f32 0.6931472, %v3862_v27  ;;  %v3124_v21 = vrot.slane %v6274_v8, %v6387_v16 }
 0x2a1   : > { %v3059_v39 = vmul.f32 1.442695, %v3000_v7  ;;  %3887 = vrsqrt.f32 %v2128_v47  ;;  %v6402_v28 = vpop.eup %3863  ;;  %v3146_v35 = vrot.slane %v6286_v50, %v6387_v16  ;;  %v3119_v31 = vsel %vm3118_vm1, %v3117_v56, %v3112_v0 }
 0x2a2   : > { %v3065_v3 = vmul.f32 1.442695, %v3003_v59  ;;  %v6408_v45 = vpop.eup %3865  ;;  %v3004_v22 = vmul.f32 0.33333334, %v2972_v43  ;;  %v3142_v13 = vsel %vm3118_vm1, %v3141_v1, %v3137_v18  ;;  %v3131_v19 = vrot.slane %v6300_v52, %v6390_v14 }
 0x2a3   : > { %3889 = vpow2.f32 %v3059_v39  ;;  %v6411_v10 = vpop.eup %3867  ;;  %v3151_v8 = vrot.slane %v6302_v15, %v6390_v14  ;;  %v3156_v17 = vrot.slane %v6294_v55, %v6383_v11  ;;  %v3160_v29 = vrot.slane %v6296_v24, %v6376_v20 }
 0x2a4   : > { %3891 = vpow2.f32 %v3065_v3  ;;  %v6418_v50 = vpop.eup %3869  ;;  %v3179_v42 = vrot.slane %v6347_v9, %v6376_v20  ;;  %v3067_v26 = vmul.f32 1.442695, %v3004_v22  ;;  %v3126_v52 = vsel %vm3125_vm2, %v3124_v21, %v3119_v31 }
 0x2a5   : > { %v6426_v6 = vpop.eup %3871  ;;  %v3147_v62 = vsel %vm3125_vm2, %v3146_v35, %v3142_v13  ;;  %v3165_v63 = vrot.slane %v6305_v60, %v6387_v16  ;;  %v3175_v55 = vrot.slane %v6342_v23, %v6383_v11  ;;  %v3184_v24 = vrot.slane %v6365_v54, %v6387_v16 }
 0x2a6   : > { %v6430_v15 = vpop.eup %3873  ;;  %3893 = vpow2.f32 %v3067_v26  ;;  %v3133_v58 = vsel %vm3132_vm3, %v3131_v19, %v3126_v52  ;;  %v3152_v53 = vsel %vm3132_vm3, %v3151_v8, %v3147_v62  ;;  %v3161_v32 = vsel %vm3118_vm1, %v3160_v29, %v3156_v17 }
 0x2a7   : > { %v3876_v9 = vpop.eup %3875  ;;  %v3180_v36 = vsel %vm3118_vm1, %v3179_v42, %v3175_v55  ;;  %v3170_v40 = vrot.slane %v6351_v12, %v6390_v14  ;;  %v3166_v56 = vsel %vm3125_vm2, %v3165_v63, %v3161_v32  ;;  %v3189_v2 = vrot.slane %v6392_v38, %v6390_v14 }
 0x2a8   : > { %v3185_v5 = vsel %vm3125_vm2, %v3184_v24, %v3180_v36  ;;  %v3203_v12 = vrot.slane %v6402_v28, %v6387_v16  ;;  %v3213_v7 = vrot.slane %v6408_v45, %v6383_v11  ;;  %v3222_v38 = vrot.slane %v6426_v6, %v6387_v16 }
 0x2a9   : > { %v3878_v61 = vpop.eup %3877  ;;  %v3236_v27 = vrot.slane %v3876_v9, %v6376_v20  ;;  %v3232_v3 = vrot.slane %v6430_v15, %v6383_v11  ;;  %v3171_v45 = vsel %vm3132_vm3, %v3170_v40, %v3166_v56  ;;  %v3190_v31 = vsel %vm3132_vm3, %v3189_v2, %v3185_v5  ;;  %v3522_v9 = vld [vmem:[%s6583_s5] ss:$0 sm:$0xff] }
 0x2aa   : > { %v3880_v60 = vpop.eup %3879  ;;  %v2183_v23 = vmul.f32 %v3878_v61, %v6288_v34  ;;  %v2185_v54 = vmul.f32 %v3878_v61, %v5925_v44  ;;  %v2187_v41 = vmul.f32 %v3878_v61, %v5948_v30  ;;  %v2189_v49 = vmul.f32 %v3878_v61, %v5970_v48 }
 0x2ab   : > { %v3882_v4 = vpop.eup %3881  ;;  %v3268_v34 = vsel %vm3267_vm4, %v3152_v53, %v3133_v58  ;;  %v3194_v30 = vrot.slane %v6371_v46, %v6383_v11  ;;  %v3198_v48 = vrot.slane %v6379_v37, %v6376_v20  ;;  %v3217_v46 = vrot.slane %v6411_v10, %v6376_v20 }
 0x2ac   : > { %v3884_v44 = vpop.eup %3883  ;;  %2247 = vst [vmem:[%s6017_s15 + $0x100] sm:$0xff] %v2183_v23  ;;  %2249 = vst [vmem:[%s6017_s15 + $0x110] sm:$0xff] %v2185_v54  ;;  %v3208_v37 = vrot.slane %v6418_v50, %v6390_v14  ;;  %v3227_v18 = vrot.slane %v3880_v60, %v6390_v14  ;;  %v3241_v1 = vrot.slane %v3882_v4, %v6387_v16 }
 0x2ad   : > { %2251 = vst [vmem:[%s6017_s15 + $0x120] sm:$0xff] %v2187_v41  ;;  %2253 = vst [vmem:[%s6017_s15 + $0x130] sm:$0xff] %v2189_v49  ;;  %v3886_v0 = vpop.eup %3885  ;;  %v3199_v22 = vsel %vm3118_vm1, %v3198_v48, %v3194_v30  ;;  %v3237_v19 = vsel %vm3118_vm1, %v3236_v27, %v3232_v3  ;;  %v3270_v42 = vsel %vm3269_vm5, %v3171_v45, %v3268_v34 }
 0x2ae   : > { %v3888_v47 = vpop.eup %3887  ;;  %v3255_v59 = vrot.slane %v3886_v0, %v6376_v20  ;;  %v3242_v17 = vsel %vm3125_vm2, %v3241_v1, %v3237_v19  ;;  %v3272_v52 = vsel %vm3271_vm6, %v3190_v31, %v3270_v42 }
 0x2af   : > { %v2184_v39 = vmul.f32 %v3888_v47, %v6292_v25  ;;  %v2186_v43 = vmul.f32 %v3888_v47, %v5938_v33  ;;  %v2188_v28 = vmul.f32 %v3888_v47, %v5964_v51  ;;  %v2190_v21 = vmul.f32 %v3888_v47, %v5972_v57 }
 0x2b0   : > { %v3890_v35 = vpop.eup %3889  ;;  %v3204_v33 = vsel %vm3125_vm2, %v3203_v12, %v3199_v22  ;;  %v3218_v51 = vsel %vm3118_vm1, %v3217_v46, %v3213_v7  ;;  %v3251_v25 = vrot.slane %v3884_v44, %v6383_v11 }
 0x2b1   : > { %v3892_v10 = vpop.eup %3891  ;;  %2248 = vst [vmem:[%s6017_s15 + $0x108] sm:$0xff] %v2184_v39  ;;  %2250 = vst [vmem:[%s6017_s15 + $0x118] sm:$0xff] %v2186_v43  ;;  %v3246_v57 = vrot.slane %v3890_v35, %v6390_v14  ;;  %v3209_v20 = vsel %vm3132_vm3, %v3208_v37, %v3204_v33  ;;  %v3223_v13 = vsel %vm3125_vm2, %v3222_v38, %v3218_v51 }
 0x2b2   : > { %2252 = vst [vmem:[%s6017_s15 + $0x128] sm:$0xff] %v2188_v28  ;;  %2254 = vst [vmem:[%s6017_s15 + $0x138] sm:$0xff] %v2190_v21  ;;  %v3260_v8 = vrot.slane %v3892_v10, %v6387_v16  ;;  %v3228_v50 = vsel %vm3132_vm3, %v3227_v18, %v3223_v13  ;;  %v3256_v29 = vsel %vm3118_vm1, %v3255_v59, %v3251_v25 }
 0x2b3   : > { %v3894_v26 = vpop.eup %3893  ;;  %v3247_v6 = vsel %vm3132_vm3, %v3246_v57, %v3242_v17  ;;  %v3274_v16 = vsel %vm3273_vm7, %v3209_v20, %v3272_v52 }
 0x2b4   : > { %v3261_v11 = vsel %vm3125_vm2, %v3260_v8, %v3256_v29  ;;  %v3265_v62 = vrot.slane %v3894_v26, %v6390_v14  ;;  %v3276_v15 = vsel %vm3275_vm8, %v3228_v50, %v3274_v16 }
 0x2b5   : > { %v3278_v55 = vsel %vm3277_vm9, %v3247_v6, %v3276_v15 }
 0x2b6   : > { %v3266_v63 = vsel %vm3132_vm3, %v3265_v62, %v3261_v11 }
 0x2b7   : > { %v3280_v24 = vsel %vm3279_vm10, %v3266_v63, %v3278_v55 }
 0x2b8   : > { %3550 = vmatmul.mubr.msk.f32.vlgmr.msra.gmra.mxu1 %vm3281_vm11, %v3280_v24 }
 0x378   : > { %v3350_v58 = vpop.f32.mrf.mxu1 }
 0x379   : > { %v3351_v14 = vadd.f32 %v3522_v9, %v3350_v58 }
 0x37a   : > { %v3551_v53 = vpop.f32.mrf.mxu1 }
 0x37b   : > { %v3354_v61 = vmul.f32 %v3351_v14, %v3351_v14 }
 0x37d   : > { %3355 = vadd.xlane.f32.xlu0 %v3354_v61 }
 0x37e   : > { %3966 = shalt.err (!%p3963_p0)
}
 0x37f   : > { %s3967_s15 = scalar_lea.hbm %s6514_s30, 8192  ;;  %s3971_s9 = scalar_lea.hbm %s6584_s6, 16384 }
 0x380   : > { %p3968_p5 = scmp.ne.s32.totalorder %s6514_s30, %s3967_s15  ;;  %p3972_p4 = scmp.lt.s32.totalorder %s6514_s30, %s6584_s6 }
 0x381   : > { %p3973_p6 = scmp.lt.s32.totalorder %s3971_s9, %s3967_s15 }
 0x382   : > { %p3969_p9 = pnand %p3968_p5, %p7032_p11 }
 0x383   : > { %p3974_p8 = por %p3973_p6, %p3972_p4 }
 0x384   : > { %p3970_p1 = pneg %p3969_p9 }
 0x386   : > { %p3975_p3 = pnand %p3974_p8, %p3970_p1 }
 0x388   : > { %3978 = shalt.err (!%p3975_p3)
}
 0x389   : > { %s4066_s16 = smov 256   ;;  %s4067_s11 = smov 16  }
 0x38a   : > { %3622 = dma.vmem_to_hbm [thread:$0]  (%p7032_p11), %s6517_s17, 8192, %s6514_s30, %s3362_s23, %s4066_s16, %s4066_s16, %s4067_s11  }
 0x38b   : > { %s3521_s20 = sshll.u32 %s4225_s10, 3  ;;  %s3529_s18 = sshll.u32 %s4130_s28, 7 }
 0x38c   : > { %s323_s29 = scalar_lea.vmem [#allocation8], %s3521_s20  ;;  %s3395_s9 = scalar_lea.hbm %s6585_s7, %s3529_s18 }
 0x38d   : > { %s3397_s15 = sshll.u32 %s323_s29, 4  ;;  %s3367_s19 = scalar_lea.sflag [#allocation9], %s4225_s10  ;;  %s3398_s15 = int_to_ptr.vmem [resolvable:$true] %s3397_s15 }
 0x38e   : > { %s3979_s14 = scalar_lea.vmem %s3398_s15, 128  ;;  %s4068_s30 = smov [#allocation8]  }
 0x38f   : > { %p3980_p7 = scmp.ne.s32.totalorder %s3398_s15, %s3979_s14  ;;  %s3983_s17 = sshll.u32 %s4068_s30, 4  ;;  %s3984_s17 = int_to_ptr.vmem [resolvable:$false] %s3983_s17 }
 0x390   : > { %s3985_s28 = scalar_lea.vmem %s3984_s17, 256  ;;  %p3986_p2 = scmp.lt.s32.totalorder %s3398_s15, %s3984_s17 }
 0x391   : > { %p3981_p12 = pnand %p3980_p7, %p7032_p11  ;;  %p3987_p13 = scmp.lt.s32.totalorder %s3985_s28, %s3979_s14 }
 0x393   : > { %p3982_p10 = pneg %p3981_p12  ;;  %p3988_p0 = por %p3987_p13, %p3986_p2 }
 0x395   : > { %p3989_p5 = pnand %p3988_p0, %p3982_p10 }
 0x406   : > { %v3356_v32 = vpop.xlane.xlu0 %3355 }
 0x407   : > { %v3357_v36 = vmax.f32 %v3356_v32, 1e-24 }
 0x409   : > { %3895 = vrsqrt.f32 %v3357_v36 }
 0x416   : > { %v3896_v60 = vpop.eup %3895 }
 0x417   : > { %v3359_v23 = vmul.f32 %v3896_v60, %v3351_v14 }
 0x419   : > { %3360 = vst [vmem:[%s323_s29] sm:$0xff] %v3359_v23 }
 0x41a   : > { %3992 = shalt.err (!%p3989_p5)
}
 0x41b   : > { %s3993_s23 = scalar_lea.hbm %s3395_s9, 128  ;;  %s3997_s11 = scalar_lea.hbm %s6585_s7, 256 }
 0x41c   : > { %p3994_p9 = scmp.ne.s32.totalorder %s3395_s9, %s3993_s23  ;;  %p3998_p6 = scmp.lt.s32.totalorder %s3395_s9, %s6585_s7 }
 0x41d   : > { %p3999_p8 = scmp.lt.s32.totalorder %s3997_s11, %s3993_s23 }
 0x41e   : > { %p3995_p1 = pnand %p3994_p9, %p7032_p11 }
 0x41f   : > { %p4000_p3 = por %p3999_p8, %p3998_p6 }
 0x420   : > { %p3996_p4 = pneg %p3995_p1 }
 0x422   : > { %p4001_p7 = pnand %p4000_p3, %p3996_p4 }
 0x424   : > { %4004 = shalt.err (!%p4001_p7)
}
 0x425   : > { %3623 = dma.vmem_to_hbm [thread:$0]  (%p7032_p11), %s3398_s15, 128, %s3395_s9, %s3367_s19  }
 0x426 PF: > { %s3409_s29 = sand.u32 1, %s4039_s24   ;;  %p7033_p12 = scmp.ne.s32.totalorder %s6750_s8, 0 }
 0x427   : > { %p7034_p10 = scmp.ge.s32.totalorder %s4051_s27, 2  ;;  %s3410_s3 = scalar_lea.sflag [#allocation4], %s3409_s29 }
 0x429   : > { %p3635_p2 = pnand %p7034_p10, %p7033_p12 }
 0x42b   : > { %p3636_p13 = pneg %p3635_p2 }
 0x42d   : > { %4030 = dma.done.wait (%p3636_p13), %s3410_s3, 8192  }
 0x42e   : > { %4032 = vsyncadd (%p3636_p13), %s3410_s3, 4294959104  ;;  %s3419_s12 = scalar_lea.sflag [#allocation9], %s3409_s29 }
 0x42f   : > { %4034 = dma.done.wait (%p3636_p13), %s3419_s12, 128  }
 0x430   : > { %4036 = vsyncadd (%p3636_p13), %s3419_s12, 4294967168  ;;  %p25_p11 = scmp.ge.s32.totalorder %s4163_s13, 4   ;;  %s7035_s24 = smov %s4043_s25 }
 0x431   : > { %s7036_s25 = smov %s4047_s26  ;;  %s7037_s26 = smov %s4180_s21 }
 0x432   : > { %s7038_s27 = smov %s4163_s13  ;;  %27 = sbr.rel (!%p25_p11) target bundleno = 10 (0xa), region = 110 }
 0x437   :  { %3424 = vsyncpa [#allocation3], 1 }
 0x438   :  { %3426 = vsyncpa [#allocation3 + $0x1], 1 }
 0x439   :  { %3427 = vsyncpa [#allocation6], 1 }
 0x43a   :  { %3428 = vsyncpa [#allocation4], 1 }
 0x43b   :  { %3430 = vsyncpa [#allocation4 + $0x1], 1 }
 0x43c   :  { %3431 = vsyncpa [#allocation9], 1 }
 0x43d   :  { %3433 = vsyncpa [#allocation9 + $0x1], 1 }

</bundles_post_ra>
